<compile_context>
chip_gen: v6e
topology: v6e:2x2x1
jax: 0.10.0
libtpu: 0.0.40
codegen_flags: <defaults>
</compile_context>

<pallas_src>
import functools

import jax
import jax.numpy as jnp
from jax.experimental import pallas as pl
from jax.experimental.pallas import tpu as pltpu

# -------------------- model hyper-parameters (small, synthetic) -------------
B = 2            # batch
S = 8            # sequence length (tokenizer.model_max_length)
D1 = 32          # hidden size of text_encoder
D2 = 64          # hidden size of text_encoder_2
PROJ = 64        # text_projection output dim
NUM_HEADS = 2
NUM_LAYERS = 2
VOCAB = 100
EOS_ID = VOCAB - 1
CLIP_SKIP = -1   # must satisfy -NUM_LAYERS <= clip_skip <= -1 for this kernel

# rows of the packed per-layer "vec" slab (all (D,)-sized per-layer vectors)
_LN1_G, _LN1_B, _LN2_G, _LN2_B, _BQ, _BK, _BV, _BO, _B2 = range(9)


# -------------------- helpers usable inside & outside kernels ---------------
def _layernorm(x, g, b, eps=1e-5):
    mu = jnp.mean(x, axis=-1, keepdims=True)
    var = jnp.mean((x - mu) ** 2, axis=-1, keepdims=True)
    return (x - mu) * jax.lax.rsqrt(var + eps) * g + b


def _quick_gelu(x):
    return x * jax.nn.sigmoid(1.702 * x)


# -------------------- in-kernel CLIP layer math ------------------------------
def _clip_layer_math(x, add_mask, vec, wqkv, wo, w1, b1, w2, *,
                     num_heads, batch, seq):
    """One pre-LN CLIP encoder layer on a flattened (B*S, D) activation slab.

    x:        (B*S, D) float32
    add_mask: (S, S)   additive causal mask (0 / -1e9), broadcast over batch
    vec:      (9, D)   packed [ln1_g, ln1_b, ln2_g, ln2_b, bq, bk, bv, bo, b2]
    wqkv:     (3, D, D); wo: (D, D); w1: (D, 4D); b1: (4D,); w2: (4D, D)
    """
    n, d = x.shape
    dh = d // num_heads
    scale = 1.0 / (dh ** 0.5)

    # --- self-attention block ---
    h = _layernorm(x, vec[_LN1_G], vec[_LN1_B])
    q = jnp.dot(h, wqkv[0], preferred_element_type=jnp.float32) + vec[_BQ]
    k = jnp.dot(h, wqkv[1], preferred_element_type=jnp.float32) + vec[_BK]
    v = jnp.dot(h, wqkv[2], preferred_element_type=jnp.float32) + vec[_BV]
    q3 = q.reshape(batch, seq, d)
    k3 = k.reshape(batch, seq, d)
    v3 = v.reshape(batch, seq, d)

    attn = None
    for hd in range(num_heads):                 # static, tiny head count
        sl = slice(hd * dh, (hd + 1) * dh)
        qh, kh, vh = q3[:, :, sl], k3[:, :, sl], v3[:, :, sl]
        s = jnp.einsum("bqd,bkd->bqk", qh, kh,
                       preferred_element_type=jnp.float32) * scale
        s = s + add_mask                        # (S,S) broadcast over batch
        m = jnp.max(s, axis=-1, keepdims=True)
        e = jnp.exp(s - m)
        p = e * pl.reciprocal(jnp.sum(e, axis=-1, keepdims=True), approx=True)
        ctx = jnp.einsum("bqk,bkd->bqd", p, vh,
                         preferred_element_type=jnp.float32)
        part = jnp.dot(ctx.reshape(n, dh), wo[sl, :],
                       preferred_element_type=jnp.float32)
        attn = part if attn is None else attn + part

    x = x + attn + vec[_BO]

    # --- MLP block ---
    h2 = _layernorm(x, vec[_LN2_G], vec[_LN2_B])
    mlp = _quick_gelu(jnp.dot(h2, w1, preferred_element_type=jnp.float32) + b1)
    mlp = jnp.dot(mlp, w2, preferred_element_type=jnp.float32) + vec[_B2]
    return x + mlp


# -------------------- single fused kernel (both encoders + epilogue) ---------
def fused_text_kernel(
        eos_ref,                                            # SMEM scalar prefetch
        x1_ref, x2_ref, mask_ref,
        vec1_ref, wqkv1_ref, wo1_ref, w11_ref, b11_ref, w21_ref,
        vec2_ref, wqkv2_ref, wo2_ref, w12_ref, b12_ref, w22_ref,
        fln_ref, proj_ref, zmask_ref,
        ehs_ref, pooled_ref,
        x1_scr, x2_scr,
        *, num_heads, batch, seq, num_layers, out_layer, d1, d2):
    l = pl.program_id(0)

    @pl.when(l == 0)
    def _():
        x1_scr[...] = x1_ref[...]
        x2_scr[...] = x2_ref[...]

    add_mask = mask_ref[...]                     # load once per grid step

    # -- encoder 1, layer l --
    x1_new = _clip_layer_math(
        x1_scr[...], add_mask, vec1_ref[0], wqkv1_ref[0], wo1_ref[0],
        w11_ref[0], b11_ref[0, 0], w21_ref[0],
        num_heads=num_heads, batch=batch, seq=seq)
    x1_scr[...] = x1_new

    # -- encoder 2, layer l --
    x2_new = _clip_layer_math(
        x2_scr[...], add_mask, vec2_ref[0], wqkv2_ref[0], wo2_ref[0],
        w12_ref[0], b12_ref[0, 0], w22_ref[0],
        num_heads=num_heads, batch=batch, seq=seq)
    x2_scr[...] = x2_new

    # hidden_states[clip_skip] for both encoders, concatenated in-kernel and
    # written as one lane-dense full-block store.
    @pl.when(l == out_layer)
    def _():
        ehs_ref[...] = jnp.concatenate(
            [x1_new.reshape(batch, seq, d1),
             x2_new.reshape(batch, seq, d2)], axis=-1)

    # encoder-2 epilogue: pooled output = final LayerNorm of the (first) EOS
    # row per batch element, then text_projection, then empty-prompt zeroing.
    @pl.when(l == num_layers - 1)
    def _():
        rows = [x2_scr[pl.ds(b * seq + eos_ref[b], 1), :] for b in range(batch)]
        pooled = jnp.concatenate(rows, axis=0)               # (B, D2)
        fln = fln_ref[...]
        pooled = _layernorm(pooled, fln[0], fln[1])
        proj = jnp.dot(pooled, proj_ref[...],
                       preferred_element_type=jnp.float32)
        pooled_ref[...] = proj * zmask_ref[...]


# -------------------- pallas_call wrapper ------------------------------------
def _layer_specs(d, dm):
    return [
        pl.BlockSpec((1, 9, d), lambda l, *_: (l, 0, 0)),        # packed vectors
        pl.BlockSpec((1, 3, d, d), lambda l, *_: (l, 0, 0, 0)),  # wq/wk/wv
        pl.BlockSpec((1, d, d), lambda l, *_: (l, 0, 0)),        # wo
        pl.BlockSpec((1, d, dm), lambda l, *_: (l, 0, 0)),       # w1
        pl.BlockSpec((1, 1, dm), lambda l, *_: (l, 0, 0)),       # b1
        pl.BlockSpec((1, dm, d), lambda l, *_: (l, 0, 0)),       # w2
    ]


def run_fused(eos_index, x1_flat, x2_flat, add_mask, p1, p2, text_projection,
              zero_mask, *, clip_skip, num_heads, batch, seq):
    num_layers, _, d1 = p1["vec"].shape
    d2 = p2["vec"].shape[-1]
    dm1 = p1["w1"].shape[-1]
    dm2 = p2["w1"].shape[-1]
    proj_dim = text_projection.shape[-1]
    out_layer = num_layers + clip_skip           # hidden_states[clip_skip]

    grid_spec = pltpu.PrefetchScalarGridSpec(
        num_scalar_prefetch=1,                    # eos_index -> SMEM
        grid=(num_layers,),
        in_specs=[pl.BlockSpec((batch * seq, d1), lambda l, *_: (0, 0)),
                  pl.BlockSpec((batch * seq, d2), lambda l, *_: (0, 0)),
                  pl.BlockSpec((seq, seq), lambda l, *_: (0, 0))]
                 + _layer_specs(d1, dm1)
                 + _layer_specs(d2, dm2)
                 + [pl.BlockSpec((2, d2), lambda l, *_: (0, 0)),         # final LN g/b
                    pl.BlockSpec((d2, proj_dim), lambda l, *_: (0, 0)),  # text projection
                    pl.BlockSpec((batch, 1), lambda l, *_: (0, 0))],     # zero mask
        out_specs=(pl.BlockSpec((batch, seq, d1 + d2), lambda l, *_: (0, 0, 0)),
                   pl.BlockSpec((batch, proj_dim), lambda l, *_: (0, 0))),
        scratch_shapes=[pltpu.VMEM((batch * seq, d1), jnp.float32),
                        pltpu.VMEM((batch * seq, d2), jnp.float32)],
    )
    return pl.pallas_call(
        functools.partial(fused_text_kernel, num_heads=num_heads, batch=batch,
                          seq=seq, num_layers=num_layers, out_layer=out_layer,
                          d1=d1, d2=d2),
        grid_spec=grid_spec,
        out_shape=(jax.ShapeDtypeStruct((batch, seq, d1 + d2), jnp.float32),
                   jax.ShapeDtypeStruct((batch, proj_dim), jnp.float32)),
        compiler_params=pltpu.CompilerParams(
            dimension_semantics=("arbitrary",)),   # layer axis carries state
    )(eos_index, x1_flat, x2_flat, add_mask,
      p1["vec"], p1["wqkv"], p1["wo"], p1["w1"], p1["b1"], p1["w2"],
      p2["vec"], p2["wqkv"], p2["wo"], p2["w1"], p2["b1"], p2["w2"],
      p2["fln"], text_projection, zero_mask)


# -------------------- TextModel.get_hidden_states (SDXL branch) --------------
def text_model_forward(tokens, tokens_2, params, clip_skip=CLIP_SKIP, eos_id=EOS_ID):
    enc1, enc2 = params["enc1"], params["enc2"]
    b, s = tokens.shape

    # embedding gathers are glue and stay in plain JAX
    x1 = (enc1["tok_emb"][tokens] + enc1["pos_emb"][None, :s, :]).reshape(b * s, -1)
    x2 = (enc2["tok_emb"][tokens_2] + enc2["pos_emb"][None, :s, :]).reshape(b * s, -1)

    # additive causal mask, built once (hoisted out of the per-layer body)
    add_mask = jnp.where(jnp.tril(jnp.ones((s, s), dtype=bool)),
                         0.0, -1e9).astype(jnp.float32)

    eos_index = jnp.argmax((tokens_2 == eos_id).astype(jnp.int32),
                           axis=1).astype(jnp.int32)                  # first EOS
    zero_mask = (tokens_2[:, 1] != eos_id).astype(jnp.float32)[:, None]

    encoder_hidden_states, pooled = run_fused(
        eos_index, x1, x2, add_mask, enc1, enc2, params["text_projection"],
        zero_mask, clip_skip=clip_skip, num_heads=NUM_HEADS, batch=b, seq=s)
    return encoder_hidden_states, pooled


# -------------------- deterministic parameter init ----------------------------
def init_encoder(key, d, vocab, max_len, num_layers):
    dm = 4 * d
    k = jax.random.split(key, 8)

    def nrm(kk, shape):
        return (0.02 * jax.random.normal(kk, shape)).astype(jnp.float32)

    vec = jnp.zeros((num_layers, 9, d), jnp.float32)
    vec = vec.at[:, _LN1_G, :].set(1.0)
    vec = vec.at[:, _LN2_G, :].set(1.0)
    vec = vec.at[:, _BQ:_B2 + 1, :].set(nrm(k[0], (num_layers, 5, d)))
    return {
        "tok_emb": nrm(k[1], (vocab, d)),
        "pos_emb": nrm(k[2], (max_len, d)),
        "vec": vec,                                   # ln1/ln2 g,b + biases
        "wqkv": nrm(k[3], (num_layers, 3, d, d)),
        "wo": nrm(k[4], (num_layers, d, d)),
        "w1": nrm(k[5], (num_layers, d, dm)),
        "b1": nrm(k[6], (num_layers, 1, dm)),
        "w2": nrm(k[7], (num_layers, dm, d)),
        "fln": jnp.stack([jnp.ones((d,)), jnp.zeros((d,))]).astype(jnp.float32),
    }


# -------------------- pure-JAX reference (for correctness check) --------------
def ref_layer(x, p, li, num_heads):
    b, s, d = x.shape
    dh = d // num_heads
    scale = 1.0 / (dh ** 0.5)
    vec = p["vec"][li]
    h = _layernorm(x, vec[_LN1_G], vec[_LN1_B])
    q = h @ p["wqkv"][li, 0] + vec[_BQ]
    k = h @ p["wqkv"][li, 1] + vec[_BK]
    v = h @ p["wqkv"][li, 2] + vec[_BV]
    q = q.reshape(b, s, num_heads, dh).transpose(0, 2, 1, 3)
    k = k.reshape(b, s, num_heads, dh).transpose(0, 2, 1, 3)
    v = v.reshape(b, s, num_heads, dh).transpose(0, 2, 1, 3)
    scores = jnp.einsum("bhqd,bhkd->bhqk", q, k) * scale
    causal = jnp.tril(jnp.ones((s, s), bool))
    scores = jnp.where(causal, scores, -1e9)
    probs = jax.nn.softmax(scores, axis=-1)
    ctx = jnp.einsum("bhqk,bhkd->bhqd", probs, v)
    ctx = ctx.transpose(0, 2, 1, 3).reshape(b, s, d)
    x = x + ctx @ p["wo"][li] + vec[_BO]
    h2 = _layernorm(x, vec[_LN2_G], vec[_LN2_B])
    m = _quick_gelu(h2 @ p["w1"][li] + p["b1"][li, 0])
    m = m @ p["w2"][li] + vec[_B2]
    return x + m


def ref_encoder(tokens, p, num_heads):
    x = p["tok_emb"][tokens] + p["pos_emb"][None, :tokens.shape[1], :]
    hs = [x]
    for li in range(p["vec"].shape[0]):
        x = ref_layer(x, p, li, num_heads)
        hs.append(x)
    last = _layernorm(x, p["fln"][0], p["fln"][1])
    return hs, last


def ref_forward(tokens, tokens_2, params, clip_skip=CLIP_SKIP, eos_id=EOS_ID):
    hs1, _ = ref_encoder(tokens, params["enc1"], NUM_HEADS)
    hs2, last2 = ref_encoder(tokens_2, params["enc2"], NUM_HEADS)
    eos_index = jnp.argmax((tokens_2 == eos_id).astype(jnp.int32), axis=1)
    pooled = last2[jnp.arange(tokens_2.shape[0]), eos_index]
    pooled = pooled @ params["text_projection"]
    mask = (tokens_2[:, 1] != eos_id).astype(jnp.float32)[:, None]
    pooled = pooled * mask
    ehs = jnp.concatenate([hs1[clip_skip], hs2[clip_skip]], axis=2)
    return ehs, pooled


# -------------------- main -----------------------------------------------------
if __name__ == "__main__":
    key = jax.random.PRNGKey(0)
    k_tok, k_e1, k_e2, k_proj = jax.random.split(key, 4)

    # TODO(synk): CLIPTokenizer (string -> token ids) has no Pallas/TPU
    # equivalent; the forward here starts from deterministic synthetic token ids.
    tokens = jax.random.randint(k_tok, (B, S), 0, VOCAB - 1, dtype=jnp.int32)
    tokens = tokens.at[:, -1].set(EOS_ID)         # EOS at end of each row
    tokens_2 = tokens.at[1, 1].set(EOS_ID)        # exercise the "empty prompt" zeroing path

    params = {
        "enc1": init_encoder(k_e1, D1, VOCAB, S, NUM_LAYERS),
        "enc2": init_encoder(k_e2, D2, VOCAB, S, NUM_LAYERS),
        "text_projection": (0.02 * jax.random.normal(k_proj, (D2, PROJ))
                            ).astype(jnp.float32),
    }

    fwd = jax.jit(lambda t, t2: text_model_forward(t, t2, params))
    ehs, pooled = fwd(tokens, tokens_2)
    jax.block_until_ready((ehs, pooled))

    ehs_ref, pooled_ref = ref_forward(tokens, tokens_2, params)

    assert ehs.shape == (B, S, D1 + D2), ehs.shape
    assert pooled.shape == (B, PROJ), pooled.shape
    assert jnp.allclose(ehs, ehs_ref, atol=2e-3, rtol=2e-3), \
        float(jnp.max(jnp.abs(ehs - ehs_ref)))
    assert jnp.allclose(pooled, pooled_ref, atol=2e-3, rtol=2e-3), \
        float(jnp.max(jnp.abs(pooled - pooled_ref)))
    assert jnp.all(pooled[1] == 0.0)   # row whose token[1] == eos is zeroed

    print("KERNEL_OK")
</pallas_src>

<mosaic_0001>
module attributes {stable_mosaic.version = 11 : i64} {
  func.func @fused_text_kernel(%arg0: i32, %arg1: memref<2xi32, #tpu.memory_space<smem>>, %arg2: memref<16x32xf32, #tpu.memory_space<vmem>>, %arg3: memref<16x64xf32, #tpu.memory_space<vmem>>, %arg4: memref<8x8xf32, #tpu.memory_space<vmem>>, %arg5: memref<1x9x32xf32, #tpu.memory_space<vmem>>, %arg6: memref<1x3x32x32xf32, #tpu.memory_space<vmem>>, %arg7: memref<1x32x32xf32, #tpu.memory_space<vmem>>, %arg8: memref<1x32x128xf32, #tpu.memory_space<vmem>>, %arg9: memref<1x1x128xf32, #tpu.memory_space<vmem>>, %arg10: memref<1x128x32xf32, #tpu.memory_space<vmem>>, %arg11: memref<1x9x64xf32, #tpu.memory_space<vmem>>, %arg12: memref<1x3x64x64xf32, #tpu.memory_space<vmem>>, %arg13: memref<1x64x64xf32, #tpu.memory_space<vmem>>, %arg14: memref<1x64x256xf32, #tpu.memory_space<vmem>>, %arg15: memref<1x1x256xf32, #tpu.memory_space<vmem>>, %arg16: memref<1x256x64xf32, #tpu.memory_space<vmem>>, %arg17: memref<2x64xf32, #tpu.memory_space<vmem>>, %arg18: memref<64x64xf32, #tpu.memory_space<vmem>>, %arg19: memref<2x1xf32, #tpu.memory_space<vmem>>, %arg20: memref<2x8x96xf32, #tpu.memory_space<vmem>>, %arg21: memref<2x64xf32, #tpu.memory_space<vmem>>, %arg22: memref<16x32xf32, #tpu.memory_space<vmem>>, %arg23: memref<16x64xf32, #tpu.memory_space<vmem>>) attributes {dimension_semantics = [#tpu.dimension_semantics<arbitrary>], iteration_bounds = array<i64: 2>, scalar_prefetch = 1 : i64, scratch_operands = 2 : i64, tpu.core_type = #tpu.core_type<tc>, window_params = [{pipeline_mode = #tpu.pipeline_mode<synchronous>, transform_indices = @transform_0, window_bounds = array<i64: 16, 32>}, {pipeline_mode = #tpu.pipeline_mode<synchronous>, transform_indices = @transform_1, window_bounds = array<i64: 16, 64>}, {pipeline_mode = #tpu.pipeline_mode<synchronous>, transform_indices = @transform_2, window_bounds = array<i64: 8, 8>}, {transform_indices = @transform_3, window_bounds = array<i64: 1, 9, 32>}, {transform_indices = @transform_4, window_bounds = array<i64: 1, 3, 32, 32>}, {transform_indices = @transform_5, window_bounds = array<i64: 1, 32, 32>}, {transform_indices = @transform_6, window_bounds = array<i64: 1, 32, 128>}, {transform_indices = @transform_7, window_bounds = array<i64: 1, 1, 128>}, {transform_indices = @transform_8, window_bounds = array<i64: 1, 128, 32>}, {transform_indices = @transform_9, window_bounds = array<i64: 1, 9, 64>}, {transform_indices = @transform_10, window_bounds = array<i64: 1, 3, 64, 64>}, {transform_indices = @transform_11, window_bounds = array<i64: 1, 64, 64>}, {transform_indices = @transform_12, window_bounds = array<i64: 1, 64, 256>}, {transform_indices = @transform_13, window_bounds = array<i64: 1, 1, 256>}, {transform_indices = @transform_14, window_bounds = array<i64: 1, 256, 64>}, {pipeline_mode = #tpu.pipeline_mode<synchronous>, transform_indices = @transform_15, window_bounds = array<i64: 2, 64>}, {pipeline_mode = #tpu.pipeline_mode<synchronous>, transform_indices = @transform_16, window_bounds = array<i64: 64, 64>}, {pipeline_mode = #tpu.pipeline_mode<synchronous>, transform_indices = @transform_17, window_bounds = array<i64: 2, 1>}, {pipeline_mode = #tpu.pipeline_mode<synchronous>, transform_indices = @transform_18, window_bounds = array<i64: 2, 8, 96>}, {pipeline_mode = #tpu.pipeline_mode<synchronous>, transform_indices = @transform_19, window_bounds = array<i64: 2, 64>}]} {
    %c0_i32 = arith.constant 0 : i32
    %0 = arith.cmpi eq, %arg0, %c0_i32 : i32
    %1 = arith.extui %0 : i1 to i32
    %c0_i32_0 = arith.constant 0 : i32
    %2 = arith.cmpi ne, %1, %c0_i32_0 : i32
    scf.if %2 {
      %c0_108 = arith.constant 0 : index
      %c0_109 = arith.constant 0 : index
      %348 = vector.load %arg2[%c0_108, %c0_109] : memref<16x32xf32, #tpu.memory_space<vmem>>, vector<16x32xf32>
      %c0_110 = arith.constant 0 : index
      %c0_111 = arith.constant 0 : index
      %349 = vector.load %arg22[%c0_110, %c0_111] : memref<16x32xf32, #tpu.memory_space<vmem>>, vector<16x32xf32>
      tpu.vector_store %arg22[%c0_110, %c0_111], %348 {strides = array<i32>} : memref<16x32xf32, #tpu.memory_space<vmem>>, vector<16x32xf32>,
      %c0_112 = arith.constant 0 : index
      %c0_113 = arith.constant 0 : index
      %350 = vector.load %arg3[%c0_112, %c0_113] : memref<16x64xf32, #tpu.memory_space<vmem>>, vector<16x64xf32>
      %c0_114 = arith.constant 0 : index
      %c0_115 = arith.constant 0 : index
      %351 = vector.load %arg23[%c0_114, %c0_115] : memref<16x64xf32, #tpu.memory_space<vmem>>, vector<16x64xf32>
      tpu.vector_store %arg23[%c0_114, %c0_115], %350 {strides = array<i32>} : memref<16x64xf32, #tpu.memory_space<vmem>>, vector<16x64xf32>,
    } else {
    }
    %c0 = arith.constant 0 : index
    %c0_1 = arith.constant 0 : index
    %3 = vector.load %arg4[%c0, %c0_1] : memref<8x8xf32, #tpu.memory_space<vmem>>, vector<8x8xf32>
    %c0_2 = arith.constant 0 : index
    %c0_3 = arith.constant 0 : index
    %4 = vector.load %arg22[%c0_2, %c0_3] : memref<16x32xf32, #tpu.memory_space<vmem>>, vector<16x32xf32>
    %c0_4 = arith.constant 0 : index
    %c0_5 = arith.constant 0 : index
    %c0_6 = arith.constant 0 : index
    %5 = vector.load %arg5[%c0_4, %c0_5, %c0_6] : memref<1x9x32xf32, #tpu.memory_space<vmem>>, vector<1x9x32xf32>
    %6 = vector.shape_cast %5 : vector<1x9x32xf32> to vector<9x32xf32>
    %c0_7 = arith.constant 0 : index
    %c0_8 = arith.constant 0 : index
    %c0_9 = arith.constant 0 : index
    %c0_10 = arith.constant 0 : index
    %7 = vector.load %arg6[%c0_7, %c0_8, %c0_9, %c0_10] : memref<1x3x32x32xf32, #tpu.memory_space<vmem>>, vector<1x3x32x32xf32>
    %8 = vector.shape_cast %7 : vector<1x3x32x32xf32> to vector<3x32x32xf32>
    %c0_11 = arith.constant 0 : index
    %c0_12 = arith.constant 0 : index
    %c0_13 = arith.constant 0 : index
    %9 = vector.load %arg7[%c0_11, %c0_12, %c0_13] : memref<1x32x32xf32, #tpu.memory_space<vmem>>, vector<1x32x32xf32>
    %10 = vector.shape_cast %9 : vector<1x32x32xf32> to vector<32x32xf32>
    %c0_14 = arith.constant 0 : index
    %c0_15 = arith.constant 0 : index
    %c0_16 = arith.constant 0 : index
    %11 = vector.load %arg8[%c0_14, %c0_15, %c0_16] : memref<1x32x128xf32, #tpu.memory_space<vmem>>, vector<1x32x128xf32>
    %12 = vector.shape_cast %11 : vector<1x32x128xf32> to vector<32x128xf32>
    %c0_17 = arith.constant 0 : index
    %c0_18 = arith.constant 0 : index
    %c0_19 = arith.constant 0 : index
    %13 = vector.load %arg9[%c0_17, %c0_18, %c0_19] : memref<1x1x128xf32, #tpu.memory_space<vmem>>, vector<1x1x128xf32>
    %14 = vector.shape_cast %13 : vector<1x1x128xf32> to vector<128xf32>
    %c0_20 = arith.constant 0 : index
    %c0_21 = arith.constant 0 : index
    %c0_22 = arith.constant 0 : index
    %15 = vector.load %arg10[%c0_20, %c0_21, %c0_22] : memref<1x128x32xf32, #tpu.memory_space<vmem>>, vector<1x128x32xf32>
    %16 = vector.shape_cast %15 : vector<1x128x32xf32> to vector<128x32xf32>
    %17 = vector.extract_strided_slice %6 {offsets = [0, 0], sizes = [1, 32], strides = [1, 1]} : vector<9x32xf32> to vector<1x32xf32>
    %18 = vector.shape_cast %17 : vector<1x32xf32> to vector<32xf32>
    %19 = vector.extract_strided_slice %6 {offsets = [1, 0], sizes = [1, 32], strides = [1, 1]} : vector<9x32xf32> to vector<1x32xf32>
    %20 = vector.shape_cast %19 : vector<1x32xf32> to vector<32xf32>
    %cst = arith.constant dense<0.000000e+00> : vector<16xf32>
    %21 = vector.multi_reduction <add>, %4, %cst [1] : vector<16x32xf32> to vector<16xf32>
    %22 = vector.shape_cast %21 : vector<16xf32> to vector<16x1xf32>
    %cst_23 = arith.constant 3.200000e+01 : f32
    %23 = vector.broadcast %cst_23 : f32 to vector<16x1xf32>
    %24 = arith.divf %22, %23 : vector<16x1xf32>
    %25 = vector.broadcast %24 : vector<16x1xf32> to vector<16x32xf32>
    %26 = arith.subf %4, %25 : vector<16x32xf32>
    %27 = arith.mulf %26, %26 : vector<16x32xf32>
    %cst_24 = arith.constant dense<0.000000e+00> : vector<16xf32>
    %28 = vector.multi_reduction <add>, %27, %cst_24 [1] : vector<16x32xf32> to vector<16xf32>
    %29 = vector.shape_cast %28 : vector<16xf32> to vector<16x1xf32>
    %cst_25 = arith.constant 3.200000e+01 : f32
    %30 = vector.broadcast %cst_25 : f32 to vector<16x1xf32>
    %31 = arith.divf %29, %30 : vector<16x1xf32>
    %32 = vector.broadcast %24 : vector<16x1xf32> to vector<16x32xf32>
    %33 = arith.subf %4, %32 : vector<16x32xf32>
    %cst_26 = arith.constant 9.99999974E-6 : f32
    %34 = vector.broadcast %cst_26 : f32 to vector<16x1xf32>
    %35 = arith.addf %31, %34 : vector<16x1xf32>
    %36 = math.rsqrt %35 : vector<16x1xf32>
    %37 = vector.broadcast %36 : vector<16x1xf32> to vector<16x32xf32>
    %38 = arith.mulf %33, %37 : vector<16x32xf32>
    %39 = vector.shape_cast %18 : vector<32xf32> to vector<1x32xf32>
    %40 = vector.broadcast %39 : vector<1x32xf32> to vector<16x32xf32>
    %41 = arith.mulf %38, %40 : vector<16x32xf32>
    %42 = vector.shape_cast %20 : vector<32xf32> to vector<1x32xf32>
    %43 = vector.broadcast %42 : vector<1x32xf32> to vector<16x32xf32>
    %44 = arith.addf %41, %43 : vector<16x32xf32>
    %45 = vector.extract_strided_slice %8 {offsets = [0, 0, 0], sizes = [1, 32, 32], strides = [1, 1, 1]} : vector<3x32x32xf32> to vector<1x32x32xf32>
    %46 = vector.shape_cast %45 : vector<1x32x32xf32> to vector<32x32xf32>
    %cst_27 = arith.constant dense<0.000000e+00> : vector<16x32xf32>
    %47 = tpu.matmul %44, %46, %cst_27 {dimension_numbers = #tpu.dot_dimension_numbers<[1], [0], [0], [1], [0, 0, 1, 1], [], []>} : vector<16x32xf32>, vector<32x32xf32>, vector<16x32xf32> -> vector<16x32xf32>
    %48 = vector.extract_strided_slice %6 {offsets = [4, 0], sizes = [1, 32], strides = [1, 1]} : vector<9x32xf32> to vector<1x32xf32>
    %49 = vector.shape_cast %48 : vector<1x32xf32> to vector<32xf32>
    %50 = vector.shape_cast %49 : vector<32xf32> to vector<1x32xf32>
    %51 = vector.broadcast %50 : vector<1x32xf32> to vector<16x32xf32>
    %52 = arith.addf %47, %51 : vector<16x32xf32>
    %53 = vector.extract_strided_slice %8 {offsets = [1, 0, 0], sizes = [1, 32, 32], strides = [1, 1, 1]} : vector<3x32x32xf32> to vector<1x32x32xf32>
    %54 = vector.shape_cast %53 : vector<1x32x32xf32> to vector<32x32xf32>
    %cst_28 = arith.constant dense<0.000000e+00> : vector<16x32xf32>
    %55 = tpu.matmul %44, %54, %cst_28 {dimension_numbers = #tpu.dot_dimension_numbers<[1], [0], [0], [1], [0, 0, 1, 1], [], []>} : vector<16x32xf32>, vector<32x32xf32>, vector<16x32xf32> -> vector<16x32xf32>
    %56 = vector.extract_strided_slice %6 {offsets = [5, 0], sizes = [1, 32], strides = [1, 1]} : vector<9x32xf32> to vector<1x32xf32>
    %57 = vector.shape_cast %56 : vector<1x32xf32> to vector<32xf32>
    %58 = vector.shape_cast %57 : vector<32xf32> to vector<1x32xf32>
    %59 = vector.broadcast %58 : vector<1x32xf32> to vector<16x32xf32>
    %60 = arith.addf %55, %59 : vector<16x32xf32>
    %61 = vector.extract_strided_slice %8 {offsets = [2, 0, 0], sizes = [1, 32, 32], strides = [1, 1, 1]} : vector<3x32x32xf32> to vector<1x32x32xf32>
    %62 = vector.shape_cast %61 : vector<1x32x32xf32> to vector<32x32xf32>
    %cst_29 = arith.constant dense<0.000000e+00> : vector<16x32xf32>
    %63 = tpu.matmul %44, %62, %cst_29 {dimension_numbers = #tpu.dot_dimension_numbers<[1], [0], [0], [1], [0, 0, 1, 1], [], []>} : vector<16x32xf32>, vector<32x32xf32>, vector<16x32xf32> -> vector<16x32xf32>
    %64 = vector.extract_strided_slice %6 {offsets = [6, 0], sizes = [1, 32], strides = [1, 1]} : vector<9x32xf32> to vector<1x32xf32>
    %65 = vector.shape_cast %64 : vector<1x32xf32> to vector<32xf32>
    %66 = vector.shape_cast %65 : vector<32xf32> to vector<1x32xf32>
    %67 = vector.broadcast %66 : vector<1x32xf32> to vector<16x32xf32>
    %68 = arith.addf %63, %67 : vector<16x32xf32>
    %69 = vector.shape_cast %52 : vector<16x32xf32> to vector<2x8x32xf32>
    %70 = vector.shape_cast %60 : vector<16x32xf32> to vector<2x8x32xf32>
    %71 = vector.shape_cast %68 : vector<16x32xf32> to vector<2x8x32xf32>
    %72 = vector.extract_strided_slice %69 {offsets = [0, 0, 0], sizes = [2, 8, 16], strides = [1, 1, 1]} : vector<2x8x32xf32> to vector<2x8x16xf32>
    %73 = vector.extract_strided_slice %70 {offsets = [0, 0, 0], sizes = [2, 8, 16], strides = [1, 1, 1]} : vector<2x8x32xf32> to vector<2x8x16xf32>
    %74 = vector.extract_strided_slice %71 {offsets = [0, 0, 0], sizes = [2, 8, 16], strides = [1, 1, 1]} : vector<2x8x32xf32> to vector<2x8x16xf32>
    "tpu.trace_start"() <{level = 10 : i32, message = "bqd,bkd->bqk"}> : () -> ()
    %cst_30 = arith.constant dense<0.000000e+00> : vector<2x8x8xf32>
    %75 = tpu.matmul %72, %73, %cst_30 {dimension_numbers = #tpu.dot_dimension_numbers<[2], [2], [1], [1], [0, 0, 0, 1, 1, 1], [0], [0]>} : vector<2x8x16xf32>, vector<2x8x16xf32>, vector<2x8x8xf32> -> vector<2x8x8xf32>
    "tpu.trace_stop"() : () -> ()
    %cst_31 = arith.constant 2.500000e-01 : f32
    %76 = vector.broadcast %cst_31 : f32 to vector<2x8x8xf32>
    %77 = arith.mulf %75, %76 : vector<2x8x8xf32>
    %78 = vector.shape_cast %3 : vector<8x8xf32> to vector<1x8x8xf32>
    %79 = vector.broadcast %78 : vector<1x8x8xf32> to vector<2x8x8xf32>
    %80 = arith.addf %77, %79 : vector<2x8x8xf32>
    %cst_32 = arith.constant dense<0xFF800000> : vector<2x8xf32>
    %81 = vector.multi_reduction <maximumf>, %80, %cst_32 [2] : vector<2x8x8xf32> to vector<2x8xf32>
    %82 = vector.shape_cast %81 : vector<2x8xf32> to vector<2x8x1xf32>
    %83 = vector.broadcast %82 : vector<2x8x1xf32> to vector<2x8x8xf32>
    %84 = arith.subf %80, %83 : vector<2x8x8xf32>
    %85 = math.exp %84 : vector<2x8x8xf32>
    %cst_33 = arith.constant dense<0.000000e+00> : vector<2x8xf32>
    %86 = vector.multi_reduction <add>, %85, %cst_33 [2] : vector<2x8x8xf32> to vector<2x8xf32>
    %87 = vector.shape_cast %86 : vector<2x8xf32> to vector<2x8x1xf32>
    %88 = tpu.reciprocal %87 {approx = true} : vector<2x8x1xf32> -> vector<2x8x1xf32>
    %89 = vector.broadcast %88 : vector<2x8x1xf32> to vector<2x8x8xf32>
    %90 = arith.mulf %85, %89 : vector<2x8x8xf32>
    "tpu.trace_start"() <{level = 10 : i32, message = "bqk,bkd->bqd"}> : () -> ()
    %cst_34 = arith.constant dense<0.000000e+00> : vector<2x8x16xf32>
    %91 = tpu.matmul %90, %74, %cst_34 {dimension_numbers = #tpu.dot_dimension_numbers<[2], [1], [1], [2], [0, 0, 0, 1, 1, 2], [0], [0]>} : vector<2x8x8xf32>, vector<2x8x16xf32>, vector<2x8x16xf32> -> vector<2x8x16xf32>
    "tpu.trace_stop"() : () -> ()
    %92 = vector.shape_cast %91 : vector<2x8x16xf32> to vector<16x16xf32>
    %93 = vector.extract_strided_slice %10 {offsets = [0, 0], sizes = [16, 32], strides = [1, 1]} : vector<32x32xf32> to vector<16x32xf32>
    %cst_35 = arith.constant dense<0.000000e+00> : vector<16x32xf32>
    %94 = tpu.matmul %92, %93, %cst_35 {dimension_numbers = #tpu.dot_dimension_numbers<[1], [0], [0], [1], [0, 0, 1, 1], [], []>} : vector<16x16xf32>, vector<16x32xf32>, vector<16x32xf32> -> vector<16x32xf32>
    %95 = vector.extract_strided_slice %69 {offsets = [0, 0, 16], sizes = [2, 8, 16], strides = [1, 1, 1]} : vector<2x8x32xf32> to vector<2x8x16xf32>
    %96 = vector.extract_strided_slice %70 {offsets = [0, 0, 16], sizes = [2, 8, 16], strides = [1, 1, 1]} : vector<2x8x32xf32> to vector<2x8x16xf32>
    %97 = vector.extract_strided_slice %71 {offsets = [0, 0, 16], sizes = [2, 8, 16], strides = [1, 1, 1]} : vector<2x8x32xf32> to vector<2x8x16xf32>
    "tpu.trace_start"() <{level = 10 : i32, message = "bqd,bkd->bqk"}> : () -> ()
    %cst_36 = arith.constant dense<0.000000e+00> : vector<2x8x8xf32>
    %98 = tpu.matmul %95, %96, %cst_36 {dimension_numbers = #tpu.dot_dimension_numbers<[2], [2], [1], [1], [0, 0, 0, 1, 1, 1], [0], [0]>} : vector<2x8x16xf32>, vector<2x8x16xf32>, vector<2x8x8xf32> -> vector<2x8x8xf32>
    "tpu.trace_stop"() : () -> ()
    %cst_37 = arith.constant 2.500000e-01 : f32
    %99 = vector.broadcast %cst_37 : f32 to vector<2x8x8xf32>
    %100 = arith.mulf %98, %99 : vector<2x8x8xf32>
    %101 = vector.shape_cast %3 : vector<8x8xf32> to vector<1x8x8xf32>
    %102 = vector.broadcast %101 : vector<1x8x8xf32> to vector<2x8x8xf32>
    %103 = arith.addf %100, %102 : vector<2x8x8xf32>
    %cst_38 = arith.constant dense<0xFF800000> : vector<2x8xf32>
    %104 = vector.multi_reduction <maximumf>, %103, %cst_38 [2] : vector<2x8x8xf32> to vector<2x8xf32>
    %105 = vector.shape_cast %104 : vector<2x8xf32> to vector<2x8x1xf32>
    %106 = vector.broadcast %105 : vector<2x8x1xf32> to vector<2x8x8xf32>
    %107 = arith.subf %103, %106 : vector<2x8x8xf32>
    %108 = math.exp %107 : vector<2x8x8xf32>
    %cst_39 = arith.constant dense<0.000000e+00> : vector<2x8xf32>
    %109 = vector.multi_reduction <add>, %108, %cst_39 [2] : vector<2x8x8xf32> to vector<2x8xf32>
    %110 = vector.shape_cast %109 : vector<2x8xf32> to vector<2x8x1xf32>
    %111 = tpu.reciprocal %110 {approx = true} : vector<2x8x1xf32> -> vector<2x8x1xf32>
    %112 = vector.broadcast %111 : vector<2x8x1xf32> to vector<2x8x8xf32>
    %113 = arith.mulf %108, %112 : vector<2x8x8xf32>
    "tpu.trace_start"() <{level = 10 : i32, message = "bqk,bkd->bqd"}> : () -> ()
    %cst_40 = arith.constant dense<0.000000e+00> : vector<2x8x16xf32>
    %114 = tpu.matmul %113, %97, %cst_40 {dimension_numbers = #tpu.dot_dimension_numbers<[2], [1], [1], [2], [0, 0, 0, 1, 1, 2], [0], [0]>} : vector<2x8x8xf32>, vector<2x8x16xf32>, vector<2x8x16xf32> -> vector<2x8x16xf32>
    "tpu.trace_stop"() : () -> ()
    %115 = vector.shape_cast %114 : vector<2x8x16xf32> to vector<16x16xf32>
    %116 = vector.extract_strided_slice %10 {offsets = [16, 0], sizes = [16, 32], strides = [1, 1]} : vector<32x32xf32> to vector<16x32xf32>
    %cst_41 = arith.constant dense<0.000000e+00> : vector<16x32xf32>
    %117 = tpu.matmul %115, %116, %cst_41 {dimension_numbers = #tpu.dot_dimension_numbers<[1], [0], [0], [1], [0, 0, 1, 1], [], []>} : vector<16x16xf32>, vector<16x32xf32>, vector<16x32xf32> -> vector<16x32xf32>
    %118 = arith.addf %94, %117 : vector<16x32xf32>
    %119 = arith.addf %4, %118 : vector<16x32xf32>
    %120 = vector.extract_strided_slice %6 {offsets = [7, 0], sizes = [1, 32], strides = [1, 1]} : vector<9x32xf32> to vector<1x32xf32>
    %121 = vector.shape_cast %120 : vector<1x32xf32> to vector<32xf32>
    %122 = vector.shape_cast %121 : vector<32xf32> to vector<1x32xf32>
    %123 = vector.broadcast %122 : vector<1x32xf32> to vector<16x32xf32>
    %124 = arith.addf %119, %123 : vector<16x32xf32>
    %125 = vector.extract_strided_slice %6 {offsets = [2, 0], sizes = [1, 32], strides = [1, 1]} : vector<9x32xf32> to vector<1x32xf32>
    %126 = vector.shape_cast %125 : vector<1x32xf32> to vector<32xf32>
    %127 = vector.extract_strided_slice %6 {offsets = [3, 0], sizes = [1, 32], strides = [1, 1]} : vector<9x32xf32> to vector<1x32xf32>
    %128 = vector.shape_cast %127 : vector<1x32xf32> to vector<32xf32>
    %cst_42 = arith.constant dense<0.000000e+00> : vector<16xf32>
    %129 = vector.multi_reduction <add>, %124, %cst_42 [1] : vector<16x32xf32> to vector<16xf32>
    %130 = vector.shape_cast %129 : vector<16xf32> to vector<16x1xf32>
    %cst_43 = arith.constant 3.200000e+01 : f32
    %131 = vector.broadcast %cst_43 : f32 to vector<16x1xf32>
    %132 = arith.divf %130, %131 : vector<16x1xf32>
    %133 = vector.broadcast %132 : vector<16x1xf32> to vector<16x32xf32>
    %134 = arith.subf %124, %133 : vector<16x32xf32>
    %135 = arith.mulf %134, %134 : vector<16x32xf32>
    %cst_44 = arith.constant dense<0.000000e+00> : vector<16xf32>
    %136 = vector.multi_reduction <add>, %135, %cst_44 [1] : vector<16x32xf32> to vector<16xf32>
    %137 = vector.shape_cast %136 : vector<16xf32> to vector<16x1xf32>
    %cst_45 = arith.constant 3.200000e+01 : f32
    %138 = vector.broadcast %cst_45 : f32 to vector<16x1xf32>
    %139 = arith.divf %137, %138 : vector<16x1xf32>
    %140 = vector.broadcast %132 : vector<16x1xf32> to vector<16x32xf32>
    %141 = arith.subf %124, %140 : vector<16x32xf32>
    %cst_46 = arith.constant 9.99999974E-6 : f32
    %142 = vector.broadcast %cst_46 : f32 to vector<16x1xf32>
    %143 = arith.addf %139, %142 : vector<16x1xf32>
    %144 = math.rsqrt %143 : vector<16x1xf32>
    %145 = vector.broadcast %144 : vector<16x1xf32> to vector<16x32xf32>
    %146 = arith.mulf %141, %145 : vector<16x32xf32>
    %147 = vector.shape_cast %126 : vector<32xf32> to vector<1x32xf32>
    %148 = vector.broadcast %147 : vector<1x32xf32> to vector<16x32xf32>
    %149 = arith.mulf %146, %148 : vector<16x32xf32>
    %150 = vector.shape_cast %128 : vector<32xf32> to vector<1x32xf32>
    %151 = vector.broadcast %150 : vector<1x32xf32> to vector<16x32xf32>
    %152 = arith.addf %149, %151 : vector<16x32xf32>
    %cst_47 = arith.constant dense<0.000000e+00> : vector<16x128xf32>
    %153 = tpu.matmul %152, %12, %cst_47 {dimension_numbers = #tpu.dot_dimension_numbers<[1], [0], [0], [1], [0, 0, 1, 1], [], []>} : vector<16x32xf32>, vector<32x128xf32>, vector<16x128xf32> -> vector<16x128xf32>
    %154 = vector.shape_cast %14 : vector<128xf32> to vector<1x128xf32>
    %155 = vector.broadcast %154 : vector<1x128xf32> to vector<16x128xf32>
    %156 = arith.addf %153, %155 : vector<16x128xf32>
    %cst_48 = arith.constant 1.702000e+00 : f32
    %157 = vector.broadcast %cst_48 : f32 to vector<16x128xf32>
    %158 = arith.mulf %157, %156 : vector<16x128xf32>
    %159 = arith.negf %158 : vector<16x128xf32>
    %160 = math.exp %159 : vector<16x128xf32>
    %cst_49 = arith.constant 1.000000e+00 : f32
    %161 = vector.broadcast %cst_49 : f32 to vector<16x128xf32>
    %162 = arith.addf %161, %160 : vector<16x128xf32>
    %163 = arith.divf %161, %162 : vector<16x128xf32>
    %164 = arith.mulf %156, %163 : vector<16x128xf32>
    %cst_50 = arith.constant dense<0.000000e+00> : vector<16x32xf32>
    %165 = tpu.matmul %164, %16, %cst_50 {dimension_numbers = #tpu.dot_dimension_numbers<[1], [0], [0], [1], [0, 0, 1, 1], [], []>} : vector<16x128xf32>, vector<128x32xf32>, vector<16x32xf32> -> vector<16x32xf32>
    %166 = vector.extract_strided_slice %6 {offsets = [8, 0], sizes = [1, 32], strides = [1, 1]} : vector<9x32xf32> to vector<1x32xf32>
    %167 = vector.shape_cast %166 : vector<1x32xf32> to vector<32xf32>
    %168 = vector.shape_cast %167 : vector<32xf32> to vector<1x32xf32>
    %169 = vector.broadcast %168 : vector<1x32xf32> to vector<16x32xf32>
    %170 = arith.addf %165, %169 : vector<16x32xf32>
    %171 = arith.addf %124, %170 : vector<16x32xf32>
    %c0_51 = arith.constant 0 : index
    %c0_52 = arith.constant 0 : index
    %172 = vector.load %arg22[%c0_51, %c0_52] : memref<16x32xf32, #tpu.memory_space<vmem>>, vector<16x32xf32>
    tpu.vector_store %arg22[%c0_51, %c0_52], %171 {strides = array<i32>} : memref<16x32xf32, #tpu.memory_space<vmem>>, vector<16x32xf32>,
    %c0_53 = arith.constant 0 : index
    %c0_54 = arith.constant 0 : index
    %173 = vector.load %arg23[%c0_53, %c0_54] : memref<16x64xf32, #tpu.memory_space<vmem>>, vector<16x64xf32>
    %c0_55 = arith.constant 0 : index
    %c0_56 = arith.constant 0 : index
    %c0_57 = arith.constant 0 : index
    %174 = vector.load %arg11[%c0_55, %c0_56, %c0_57] : memref<1x9x64xf32, #tpu.memory_space<vmem>>, vector<1x9x64xf32>
    %175 = vector.shape_cast %174 : vector<1x9x64xf32> to vector<9x64xf32>
    %c0_58 = arith.constant 0 : index
    %c0_59 = arith.constant 0 : index
    %c0_60 = arith.constant 0 : index
    %c0_61 = arith.constant 0 : index
    %176 = vector.load %arg12[%c0_58, %c0_59, %c0_60, %c0_61] : memref<1x3x64x64xf32, #tpu.memory_space<vmem>>, vector<1x3x64x64xf32>
    %177 = vector.shape_cast %176 : vector<1x3x64x64xf32> to vector<3x64x64xf32>
    %c0_62 = arith.constant 0 : index
    %c0_63 = arith.constant 0 : index
    %c0_64 = arith.constant 0 : index
    %178 = vector.load %arg13[%c0_62, %c0_63, %c0_64] : memref<1x64x64xf32, #tpu.memory_space<vmem>>, vector<1x64x64xf32>
    %179 = vector.shape_cast %178 : vector<1x64x64xf32> to vector<64x64xf32>
    %c0_65 = arith.constant 0 : index
    %c0_66 = arith.constant 0 : index
    %c0_67 = arith.constant 0 : index
    %180 = vector.load %arg14[%c0_65, %c0_66, %c0_67] : memref<1x64x256xf32, #tpu.memory_space<vmem>>, vector<1x64x256xf32>
    %181 = vector.shape_cast %180 : vector<1x64x256xf32> to vector<64x256xf32>
    %c0_68 = arith.constant 0 : index
    %c0_69 = arith.constant 0 : index
    %c0_70 = arith.constant 0 : index
    %182 = vector.load %arg15[%c0_68, %c0_69, %c0_70] : memref<1x1x256xf32, #tpu.memory_space<vmem>>, vector<1x1x256xf32>
    %183 = vector.shape_cast %182 : vector<1x1x256xf32> to vector<256xf32>
    %c0_71 = arith.constant 0 : index
    %c0_72 = arith.constant 0 : index
    %c0_73 = arith.constant 0 : index
    %184 = vector.load %arg16[%c0_71, %c0_72, %c0_73] : memref<1x256x64xf32, #tpu.memory_space<vmem>>, vector<1x256x64xf32>
    %185 = vector.shape_cast %184 : vector<1x256x64xf32> to vector<256x64xf32>
    %186 = vector.extract_strided_slice %175 {offsets = [0, 0], sizes = [1, 64], strides = [1, 1]} : vector<9x64xf32> to vector<1x64xf32>
    %187 = vector.shape_cast %186 : vector<1x64xf32> to vector<64xf32>
    %188 = vector.extract_strided_slice %175 {offsets = [1, 0], sizes = [1, 64], strides = [1, 1]} : vector<9x64xf32> to vector<1x64xf32>
    %189 = vector.shape_cast %188 : vector<1x64xf32> to vector<64xf32>
    %cst_74 = arith.constant dense<0.000000e+00> : vector<16xf32>
    %190 = vector.multi_reduction <add>, %173, %cst_74 [1] : vector<16x64xf32> to vector<16xf32>
    %191 = vector.shape_cast %190 : vector<16xf32> to vector<16x1xf32>
    %cst_75 = arith.constant 6.400000e+01 : f32
    %192 = vector.broadcast %cst_75 : f32 to vector<16x1xf32>
    %193 = arith.divf %191, %192 : vector<16x1xf32>
    %194 = vector.broadcast %193 : vector<16x1xf32> to vector<16x64xf32>
    %195 = arith.subf %173, %194 : vector<16x64xf32>
    %196 = arith.mulf %195, %195 : vector<16x64xf32>
    %cst_76 = arith.constant dense<0.000000e+00> : vector<16xf32>
    %197 = vector.multi_reduction <add>, %196, %cst_76 [1] : vector<16x64xf32> to vector<16xf32>
    %198 = vector.shape_cast %197 : vector<16xf32> to vector<16x1xf32>
    %cst_77 = arith.constant 6.400000e+01 : f32
    %199 = vector.broadcast %cst_77 : f32 to vector<16x1xf32>
    %200 = arith.divf %198, %199 : vector<16x1xf32>
    %201 = vector.broadcast %193 : vector<16x1xf32> to vector<16x64xf32>
    %202 = arith.subf %173, %201 : vector<16x64xf32>
    %cst_78 = arith.constant 9.99999974E-6 : f32
    %203 = vector.broadcast %cst_78 : f32 to vector<16x1xf32>
    %204 = arith.addf %200, %203 : vector<16x1xf32>
    %205 = math.rsqrt %204 : vector<16x1xf32>
    %206 = vector.broadcast %205 : vector<16x1xf32> to vector<16x64xf32>
    %207 = arith.mulf %202, %206 : vector<16x64xf32>
    %208 = vector.shape_cast %187 : vector<64xf32> to vector<1x64xf32>
    %209 = vector.broadcast %208 : vector<1x64xf32> to vector<16x64xf32>
    %210 = arith.mulf %207, %209 : vector<16x64xf32>
    %211 = vector.shape_cast %189 : vector<64xf32> to vector<1x64xf32>
    %212 = vector.broadcast %211 : vector<1x64xf32> to vector<16x64xf32>
    %213 = arith.addf %210, %212 : vector<16x64xf32>
    %214 = vector.extract_strided_slice %177 {offsets = [0, 0, 0], sizes = [1, 64, 64], strides = [1, 1, 1]} : vector<3x64x64xf32> to vector<1x64x64xf32>
    %215 = vector.shape_cast %214 : vector<1x64x64xf32> to vector<64x64xf32>
    %cst_79 = arith.constant dense<0.000000e+00> : vector<16x64xf32>
    %216 = tpu.matmul %213, %215, %cst_79 {dimension_numbers = #tpu.dot_dimension_numbers<[1], [0], [0], [1], [0, 0, 1, 1], [], []>} : vector<16x64xf32>, vector<64x64xf32>, vector<16x64xf32> -> vector<16x64xf32>
    %217 = vector.extract_strided_slice %175 {offsets = [4, 0], sizes = [1, 64], strides = [1, 1]} : vector<9x64xf32> to vector<1x64xf32>
    %218 = vector.shape_cast %217 : vector<1x64xf32> to vector<64xf32>
    %219 = vector.shape_cast %218 : vector<64xf32> to vector<1x64xf32>
    %220 = vector.broadcast %219 : vector<1x64xf32> to vector<16x64xf32>
    %221 = arith.addf %216, %220 : vector<16x64xf32>
    %222 = vector.extract_strided_slice %177 {offsets = [1, 0, 0], sizes = [1, 64, 64], strides = [1, 1, 1]} : vector<3x64x64xf32> to vector<1x64x64xf32>
    %223 = vector.shape_cast %222 : vector<1x64x64xf32> to vector<64x64xf32>
    %cst_80 = arith.constant dense<0.000000e+00> : vector<16x64xf32>
    %224 = tpu.matmul %213, %223, %cst_80 {dimension_numbers = #tpu.dot_dimension_numbers<[1], [0], [0], [1], [0, 0, 1, 1], [], []>} : vector<16x64xf32>, vector<64x64xf32>, vector<16x64xf32> -> vector<16x64xf32>
    %225 = vector.extract_strided_slice %175 {offsets = [5, 0], sizes = [1, 64], strides = [1, 1]} : vector<9x64xf32> to vector<1x64xf32>
    %226 = vector.shape_cast %225 : vector<1x64xf32> to vector<64xf32>
    %227 = vector.shape_cast %226 : vector<64xf32> to vector<1x64xf32>
    %228 = vector.broadcast %227 : vector<1x64xf32> to vector<16x64xf32>
    %229 = arith.addf %224, %228 : vector<16x64xf32>
    %230 = vector.extract_strided_slice %177 {offsets = [2, 0, 0], sizes = [1, 64, 64], strides = [1, 1, 1]} : vector<3x64x64xf32> to vector<1x64x64xf32>
    %231 = vector.shape_cast %230 : vector<1x64x64xf32> to vector<64x64xf32>
    %cst_81 = arith.constant dense<0.000000e+00> : vector<16x64xf32>
    %232 = tpu.matmul %213, %231, %cst_81 {dimension_numbers = #tpu.dot_dimension_numbers<[1], [0], [0], [1], [0, 0, 1, 1], [], []>} : vector<16x64xf32>, vector<64x64xf32>, vector<16x64xf32> -> vector<16x64xf32>
    %233 = vector.extract_strided_slice %175 {offsets = [6, 0], sizes = [1, 64], strides = [1, 1]} : vector<9x64xf32> to vector<1x64xf32>
    %234 = vector.shape_cast %233 : vector<1x64xf32> to vector<64xf32>
    %235 = vector.shape_cast %234 : vector<64xf32> to vector<1x64xf32>
    %236 = vector.broadcast %235 : vector<1x64xf32> to vector<16x64xf32>
    %237 = arith.addf %232, %236 : vector<16x64xf32>
    %238 = vector.shape_cast %221 : vector<16x64xf32> to vector<2x8x64xf32>
    %239 = vector.shape_cast %229 : vector<16x64xf32> to vector<2x8x64xf32>
    %240 = vector.shape_cast %237 : vector<16x64xf32> to vector<2x8x64xf32>
    %241 = vector.extract_strided_slice %238 {offsets = [0, 0, 0], sizes = [2, 8, 32], strides = [1, 1, 1]} : vector<2x8x64xf32> to vector<2x8x32xf32>
    %242 = vector.extract_strided_slice %239 {offsets = [0, 0, 0], sizes = [2, 8, 32], strides = [1, 1, 1]} : vector<2x8x64xf32> to vector<2x8x32xf32>
    %243 = vector.extract_strided_slice %240 {offsets = [0, 0, 0], sizes = [2, 8, 32], strides = [1, 1, 1]} : vector<2x8x64xf32> to vector<2x8x32xf32>
    "tpu.trace_start"() <{level = 10 : i32, message = "bqd,bkd->bqk"}> : () -> ()
    %cst_82 = arith.constant dense<0.000000e+00> : vector<2x8x8xf32>
    %244 = tpu.matmul %241, %242, %cst_82 {dimension_numbers = #tpu.dot_dimension_numbers<[2], [2], [1], [1], [0, 0, 0, 1, 1, 1], [0], [0]>} : vector<2x8x32xf32>, vector<2x8x32xf32>, vector<2x8x8xf32> -> vector<2x8x8xf32>
    "tpu.trace_stop"() : () -> ()
    %cst_83 = arith.constant 0.176776692 : f32
    %245 = vector.broadcast %cst_83 : f32 to vector<2x8x8xf32>
    %246 = arith.mulf %244, %245 : vector<2x8x8xf32>
    %247 = vector.shape_cast %3 : vector<8x8xf32> to vector<1x8x8xf32>
    %248 = vector.broadcast %247 : vector<1x8x8xf32> to vector<2x8x8xf32>
    %249 = arith.addf %246, %248 : vector<2x8x8xf32>
    %cst_84 = arith.constant dense<0xFF800000> : vector<2x8xf32>
    %250 = vector.multi_reduction <maximumf>, %249, %cst_84 [2] : vector<2x8x8xf32> to vector<2x8xf32>
    %251 = vector.shape_cast %250 : vector<2x8xf32> to vector<2x8x1xf32>
    %252 = vector.broadcast %251 : vector<2x8x1xf32> to vector<2x8x8xf32>
    %253 = arith.subf %249, %252 : vector<2x8x8xf32>
    %254 = math.exp %253 : vector<2x8x8xf32>
    %cst_85 = arith.constant dense<0.000000e+00> : vector<2x8xf32>
    %255 = vector.multi_reduction <add>, %254, %cst_85 [2] : vector<2x8x8xf32> to vector<2x8xf32>
    %256 = vector.shape_cast %255 : vector<2x8xf32> to vector<2x8x1xf32>
    %257 = tpu.reciprocal %256 {approx = true} : vector<2x8x1xf32> -> vector<2x8x1xf32>
    %258 = vector.broadcast %257 : vector<2x8x1xf32> to vector<2x8x8xf32>
    %259 = arith.mulf %254, %258 : vector<2x8x8xf32>
    "tpu.trace_start"() <{level = 10 : i32, message = "bqk,bkd->bqd"}> : () -> ()
    %cst_86 = arith.constant dense<0.000000e+00> : vector<2x8x32xf32>
    %260 = tpu.matmul %259, %243, %cst_86 {dimension_numbers = #tpu.dot_dimension_numbers<[2], [1], [1], [2], [0, 0, 0, 1, 1, 2], [0], [0]>} : vector<2x8x8xf32>, vector<2x8x32xf32>, vector<2x8x32xf32> -> vector<2x8x32xf32>
    "tpu.trace_stop"() : () -> ()
    %261 = vector.shape_cast %260 : vector<2x8x32xf32> to vector<16x32xf32>
    %262 = vector.extract_strided_slice %179 {offsets = [0, 0], sizes = [32, 64], strides = [1, 1]} : vector<64x64xf32> to vector<32x64xf32>
    %cst_87 = arith.constant dense<0.000000e+00> : vector<16x64xf32>
    %263 = tpu.matmul %261, %262, %cst_87 {dimension_numbers = #tpu.dot_dimension_numbers<[1], [0], [0], [1], [0, 0, 1, 1], [], []>} : vector<16x32xf32>, vector<32x64xf32>, vector<16x64xf32> -> vector<16x64xf32>
    %264 = vector.extract_strided_slice %238 {offsets = [0, 0, 32], sizes = [2, 8, 32], strides = [1, 1, 1]} : vector<2x8x64xf32> to vector<2x8x32xf32>
    %265 = vector.extract_strided_slice %239 {offsets = [0, 0, 32], sizes = [2, 8, 32], strides = [1, 1, 1]} : vector<2x8x64xf32> to vector<2x8x32xf32>
    %266 = vector.extract_strided_slice %240 {offsets = [0, 0, 32], sizes = [2, 8, 32], strides = [1, 1, 1]} : vector<2x8x64xf32> to vector<2x8x32xf32>
    "tpu.trace_start"() <{level = 10 : i32, message = "bqd,bkd->bqk"}> : () -> ()
    %cst_88 = arith.constant dense<0.000000e+00> : vector<2x8x8xf32>
    %267 = tpu.matmul %264, %265, %cst_88 {dimension_numbers = #tpu.dot_dimension_numbers<[2], [2], [1], [1], [0, 0, 0, 1, 1, 1], [0], [0]>} : vector<2x8x32xf32>, vector<2x8x32xf32>, vector<2x8x8xf32> -> vector<2x8x8xf32>
    "tpu.trace_stop"() : () -> ()
    %cst_89 = arith.constant 0.176776692 : f32
    %268 = vector.broadcast %cst_89 : f32 to vector<2x8x8xf32>
    %269 = arith.mulf %267, %268 : vector<2x8x8xf32>
    %270 = vector.shape_cast %3 : vector<8x8xf32> to vector<1x8x8xf32>
    %271 = vector.broadcast %270 : vector<1x8x8xf32> to vector<2x8x8xf32>
    %272 = arith.addf %269, %271 : vector<2x8x8xf32>
    %cst_90 = arith.constant dense<0xFF800000> : vector<2x8xf32>
    %273 = vector.multi_reduction <maximumf>, %272, %cst_90 [2] : vector<2x8x8xf32> to vector<2x8xf32>
    %274 = vector.shape_cast %273 : vector<2x8xf32> to vector<2x8x1xf32>
    %275 = vector.broadcast %274 : vector<2x8x1xf32> to vector<2x8x8xf32>
    %276 = arith.subf %272, %275 : vector<2x8x8xf32>
    %277 = math.exp %276 : vector<2x8x8xf32>
    %cst_91 = arith.constant dense<0.000000e+00> : vector<2x8xf32>
    %278 = vector.multi_reduction <add>, %277, %cst_91 [2] : vector<2x8x8xf32> to vector<2x8xf32>
    %279 = vector.shape_cast %278 : vector<2x8xf32> to vector<2x8x1xf32>
    %280 = tpu.reciprocal %279 {approx = true} : vector<2x8x1xf32> -> vector<2x8x1xf32>
    %281 = vector.broadcast %280 : vector<2x8x1xf32> to vector<2x8x8xf32>
    %282 = arith.mulf %277, %281 : vector<2x8x8xf32>
    "tpu.trace_start"() <{level = 10 : i32, message = "bqk,bkd->bqd"}> : () -> ()
    %cst_92 = arith.constant dense<0.000000e+00> : vector<2x8x32xf32>
    %283 = tpu.matmul %282, %266, %cst_92 {dimension_numbers = #tpu.dot_dimension_numbers<[2], [1], [1], [2], [0, 0, 0, 1, 1, 2], [0], [0]>} : vector<2x8x8xf32>, vector<2x8x32xf32>, vector<2x8x32xf32> -> vector<2x8x32xf32>
    "tpu.trace_stop"() : () -> ()
    %284 = vector.shape_cast %283 : vector<2x8x32xf32> to vector<16x32xf32>
    %285 = vector.extract_strided_slice %179 {offsets = [32, 0], sizes = [32, 64], strides = [1, 1]} : vector<64x64xf32> to vector<32x64xf32>
    %cst_93 = arith.constant dense<0.000000e+00> : vector<16x64xf32>
    %286 = tpu.matmul %284, %285, %cst_93 {dimension_numbers = #tpu.dot_dimension_numbers<[1], [0], [0], [1], [0, 0, 1, 1], [], []>} : vector<16x32xf32>, vector<32x64xf32>, vector<16x64xf32> -> vector<16x64xf32>
    %287 = arith.addf %263, %286 : vector<16x64xf32>
    %288 = arith.addf %173, %287 : vector<16x64xf32>
    %289 = vector.extract_strided_slice %175 {offsets = [7, 0], sizes = [1, 64], strides = [1, 1]} : vector<9x64xf32> to vector<1x64xf32>
    %290 = vector.shape_cast %289 : vector<1x64xf32> to vector<64xf32>
    %291 = vector.shape_cast %290 : vector<64xf32> to vector<1x64xf32>
    %292 = vector.broadcast %291 : vector<1x64xf32> to vector<16x64xf32>
    %293 = arith.addf %288, %292 : vector<16x64xf32>
    %294 = vector.extract_strided_slice %175 {offsets = [2, 0], sizes = [1, 64], strides = [1, 1]} : vector<9x64xf32> to vector<1x64xf32>
    %295 = vector.shape_cast %294 : vector<1x64xf32> to vector<64xf32>
    %296 = vector.extract_strided_slice %175 {offsets = [3, 0], sizes = [1, 64], strides = [1, 1]} : vector<9x64xf32> to vector<1x64xf32>
    %297 = vector.shape_cast %296 : vector<1x64xf32> to vector<64xf32>
    %cst_94 = arith.constant dense<0.000000e+00> : vector<16xf32>
    %298 = vector.multi_reduction <add>, %293, %cst_94 [1] : vector<16x64xf32> to vector<16xf32>
    %299 = vector.shape_cast %298 : vector<16xf32> to vector<16x1xf32>
    %cst_95 = arith.constant 6.400000e+01 : f32
    %300 = vector.broadcast %cst_95 : f32 to vector<16x1xf32>
    %301 = arith.divf %299, %300 : vector<16x1xf32>
    %302 = vector.broadcast %301 : vector<16x1xf32> to vector<16x64xf32>
    %303 = arith.subf %293, %302 : vector<16x64xf32>
    %304 = arith.mulf %303, %303 : vector<16x64xf32>
    %cst_96 = arith.constant dense<0.000000e+00> : vector<16xf32>
    %305 = vector.multi_reduction <add>, %304, %cst_96 [1] : vector<16x64xf32> to vector<16xf32>
    %306 = vector.shape_cast %305 : vector<16xf32> to vector<16x1xf32>
    %cst_97 = arith.constant 6.400000e+01 : f32
    %307 = vector.broadcast %cst_97 : f32 to vector<16x1xf32>
    %308 = arith.divf %306, %307 : vector<16x1xf32>
    %309 = vector.broadcast %301 : vector<16x1xf32> to vector<16x64xf32>
    %310 = arith.subf %293, %309 : vector<16x64xf32>
    %cst_98 = arith.constant 9.99999974E-6 : f32
    %311 = vector.broadcast %cst_98 : f32 to vector<16x1xf32>
    %312 = arith.addf %308, %311 : vector<16x1xf32>
    %313 = math.rsqrt %312 : vector<16x1xf32>
    %314 = vector.broadcast %313 : vector<16x1xf32> to vector<16x64xf32>
    %315 = arith.mulf %310, %314 : vector<16x64xf32>
    %316 = vector.shape_cast %295 : vector<64xf32> to vector<1x64xf32>
    %317 = vector.broadcast %316 : vector<1x64xf32> to vector<16x64xf32>
    %318 = arith.mulf %315, %317 : vector<16x64xf32>
    %319 = vector.shape_cast %297 : vector<64xf32> to vector<1x64xf32>
    %320 = vector.broadcast %319 : vector<1x64xf32> to vector<16x64xf32>
    %321 = arith.addf %318, %320 : vector<16x64xf32>
    %cst_99 = arith.constant dense<0.000000e+00> : vector<16x256xf32>
    %322 = tpu.matmul %321, %181, %cst_99 {dimension_numbers = #tpu.dot_dimension_numbers<[1], [0], [0], [1], [0, 0, 1, 1], [], []>} : vector<16x64xf32>, vector<64x256xf32>, vector<16x256xf32> -> vector<16x256xf32>
    %323 = vector.shape_cast %183 : vector<256xf32> to vector<1x256xf32>
    %324 = vector.broadcast %323 : vector<1x256xf32> to vector<16x256xf32>
    %325 = arith.addf %322, %324 : vector<16x256xf32>
    %cst_100 = arith.constant 1.702000e+00 : f32
    %326 = vector.broadcast %cst_100 : f32 to vector<16x256xf32>
    %327 = arith.mulf %326, %325 : vector<16x256xf32>
    %328 = arith.negf %327 : vector<16x256xf32>
    %329 = math.exp %328 : vector<16x256xf32>
    %cst_101 = arith.constant 1.000000e+00 : f32
    %330 = vector.broadcast %cst_101 : f32 to vector<16x256xf32>
    %331 = arith.addf %330, %329 : vector<16x256xf32>
    %332 = arith.divf %330, %331 : vector<16x256xf32>
    %333 = arith.mulf %325, %332 : vector<16x256xf32>
    %cst_102 = arith.constant dense<0.000000e+00> : vector<16x64xf32>
    %334 = tpu.matmul %333, %185, %cst_102 {dimension_numbers = #tpu.dot_dimension_numbers<[1], [0], [0], [1], [0, 0, 1, 1], [], []>} : vector<16x256xf32>, vector<256x64xf32>, vector<16x64xf32> -> vector<16x64xf32>
    %335 = vector.extract_strided_slice %175 {offsets = [8, 0], sizes = [1, 64], strides = [1, 1]} : vector<9x64xf32> to vector<1x64xf32>
    %336 = vector.shape_cast %335 : vector<1x64xf32> to vector<64xf32>
    %337 = vector.shape_cast %336 : vector<64xf32> to vector<1x64xf32>
    %338 = vector.broadcast %337 : vector<1x64xf32> to vector<16x64xf32>
    %339 = arith.addf %334, %338 : vector<16x64xf32>
    %340 = arith.addf %293, %339 : vector<16x64xf32>
    %c0_103 = arith.constant 0 : index
    %c0_104 = arith.constant 0 : index
    %341 = vector.load %arg23[%c0_103, %c0_104] : memref<16x64xf32, #tpu.memory_space<vmem>>, vector<16x64xf32>
    tpu.vector_store %arg23[%c0_103, %c0_104], %340 {strides = array<i32>} : memref<16x64xf32, #tpu.memory_space<vmem>>, vector<16x64xf32>,
    %c1_i32 = arith.constant 1 : i32
    %342 = arith.cmpi eq, %arg0, %c1_i32 : i32
    %343 = arith.extui %342 : i1 to i32
    %c0_i32_105 = arith.constant 0 : i32
    %344 = arith.cmpi ne, %343, %c0_i32_105 : i32
    scf.if %344 {
      %348 = vector.shape_cast %171 : vector<16x32xf32> to vector<2x8x32xf32>
      %349 = vector.shape_cast %340 : vector<16x64xf32> to vector<2x8x64xf32>
      %350 = tpu.concatenate %348, %349 in 2 : vector<2x8x32xf32>, vector<2x8x64xf32> -> vector<2x8x96xf32>
      %c0_108 = arith.constant 0 : index
      %c0_109 = arith.constant 0 : index
      %c0_110 = arith.constant 0 : index
      %351 = vector.load %arg20[%c0_108, %c0_109, %c0_110] : memref<2x8x96xf32, #tpu.memory_space<vmem>>, vector<2x8x96xf32>
      tpu.vector_store %arg20[%c0_108, %c0_109, %c0_110], %350 {strides = array<i32>} : memref<2x8x96xf32, #tpu.memory_space<vmem>>, vector<2x8x96xf32>,
    } else {
    }
    %c1_i32_106 = arith.constant 1 : i32
    %345 = arith.cmpi eq, %arg0, %c1_i32_106 : i32
    %346 = arith.extui %345 : i1 to i32
    %c0_i32_107 = arith.constant 0 : i32
    %347 = arith.cmpi ne, %346, %c0_i32_107 : i32
    scf.if %347 {
      %c0_108 = arith.constant 0 : index
      %348 = memref.load %arg1[%c0_108] : memref<2xi32, #tpu.memory_space<smem>>
      %c0_i32_109 = arith.constant 0 : i32
      %349 = arith.addi %c0_i32_109, %348 : i32
      %350 = arith.index_cast %349 : i32 to index
      %c0_110 = arith.constant 0 : index
      %351 = vector.load %arg23[%350, %c0_110] : memref<16x64xf32, #tpu.memory_space<vmem>>, vector<1x64xf32>
      %c1 = arith.constant 1 : index
      %352 = memref.load %arg1[%c1] : memref<2xi32, #tpu.memory_space<smem>>
      %c8_i32 = arith.constant 8 : i32
      %353 = arith.addi %c8_i32, %352 : i32
      %354 = arith.index_cast %353 : i32 to index
      %c0_111 = arith.constant 0 : index
      %355 = vector.load %arg23[%354, %c0_111] : memref<16x64xf32, #tpu.memory_space<vmem>>, vector<1x64xf32>
      %356 = tpu.concatenate %351, %355 in 0 : vector<1x64xf32>, vector<1x64xf32> -> vector<2x64xf32>
      %c0_112 = arith.constant 0 : index
      %c0_113 = arith.constant 0 : index
      %357 = vector.load %arg17[%c0_112, %c0_113] : memref<2x64xf32, #tpu.memory_space<vmem>>, vector<2x64xf32>
      %358 = vector.extract_strided_slice %357 {offsets = [0, 0], sizes = [1, 64], strides = [1, 1]} : vector<2x64xf32> to vector<1x64xf32>
      %359 = vector.shape_cast %358 : vector<1x64xf32> to vector<64xf32>
      %360 = vector.extract_strided_slice %357 {offsets = [1, 0], sizes = [1, 64], strides = [1, 1]} : vector<2x64xf32> to vector<1x64xf32>
      %361 = vector.shape_cast %360 : vector<1x64xf32> to vector<64xf32>
      %cst_114 = arith.constant dense<0.000000e+00> : vector<2xf32>
      %362 = vector.multi_reduction <add>, %356, %cst_114 [1] : vector<2x64xf32> to vector<2xf32>
      %363 = vector.shape_cast %362 : vector<2xf32> to vector<2x1xf32>
      %cst_115 = arith.constant 6.400000e+01 : f32
      %364 = vector.broadcast %cst_115 : f32 to vector<2x1xf32>
      %365 = arith.divf %363, %364 : vector<2x1xf32>
      %366 = vector.broadcast %365 : vector<2x1xf32> to vector<2x64xf32>
      %367 = arith.subf %356, %366 : vector<2x64xf32>
      %368 = arith.mulf %367, %367 : vector<2x64xf32>
      %cst_116 = arith.constant dense<0.000000e+00> : vector<2xf32>
      %369 = vector.multi_reduction <add>, %368, %cst_116 [1] : vector<2x64xf32> to vector<2xf32>
      %370 = vector.shape_cast %369 : vector<2xf32> to vector<2x1xf32>
      %cst_117 = arith.constant 6.400000e+01 : f32
      %371 = vector.broadcast %cst_117 : f32 to vector<2x1xf32>
      %372 = arith.divf %370, %371 : vector<2x1xf32>
      %373 = vector.broadcast %365 : vector<2x1xf32> to vector<2x64xf32>
      %374 = arith.subf %356, %373 : vector<2x64xf32>
      %cst_118 = arith.constant 9.99999974E-6 : f32
      %375 = vector.broadcast %cst_118 : f32 to vector<2x1xf32>
      %376 = arith.addf %372, %375 : vector<2x1xf32>
      %377 = math.rsqrt %376 : vector<2x1xf32>
      %378 = vector.broadcast %377 : vector<2x1xf32> to vector<2x64xf32>
      %379 = arith.mulf %374, %378 : vector<2x64xf32>
      %380 = vector.shape_cast %359 : vector<64xf32> to vector<1x64xf32>
      %381 = vector.broadcast %380 : vector<1x64xf32> to vector<2x64xf32>
      %382 = arith.mulf %379, %381 : vector<2x64xf32>
      %383 = vector.shape_cast %361 : vector<64xf32> to vector<1x64xf32>
      %384 = vector.broadcast %383 : vector<1x64xf32> to vector<2x64xf32>
      %385 = arith.addf %382, %384 : vector<2x64xf32>
      %c0_119 = arith.constant 0 : index
      %c0_120 = arith.constant 0 : index
      %386 = vector.load %arg18[%c0_119, %c0_120] : memref<64x64xf32, #tpu.memory_space<vmem>>, vector<64x64xf32>
      %cst_121 = arith.constant dense<0.000000e+00> : vector<2x64xf32>
      %387 = tpu.matmul %385, %386, %cst_121 {dimension_numbers = #tpu.dot_dimension_numbers<[1], [0], [0], [1], [0, 0, 1, 1], [], []>} : vector<2x64xf32>, vector<64x64xf32>, vector<2x64xf32> -> vector<2x64xf32>
      %c0_122 = arith.constant 0 : index
      %c0_123 = arith.constant 0 : index
      %388 = vector.load %arg19[%c0_122, %c0_123] : memref<2x1xf32, #tpu.memory_space<vmem>>, vector<2x1xf32>
      %389 = vector.broadcast %388 : vector<2x1xf32> to vector<2x64xf32>
      %390 = arith.mulf %387, %389 : vector<2x64xf32>
      %c0_124 = arith.constant 0 : index
      %c0_125 = arith.constant 0 : index
      %391 = vector.load %arg21[%c0_124, %c0_125] : memref<2x64xf32, #tpu.memory_space<vmem>>, vector<2x64xf32>
      tpu.vector_store %arg21[%c0_124, %c0_125], %390 {strides = array<i32>} : memref<2x64xf32, #tpu.memory_space<vmem>>, vector<2x64xf32>,
    } else {
    }
    return
  }
  func.func @transform_0(%arg0: i32, %arg1: memref<2xi32, #tpu.memory_space<smem>>) -> (i32, i32) {
    %c0_i32 = arith.constant 0 : i32
    %c0_i32_0 = arith.constant 0 : i32
    %c0_i32_1 = arith.constant 0 : i32
    return %c0_i32, %c0_i32_0 : i32, i32
  }
  func.func @transform_1(%arg0: i32, %arg1: memref<2xi32, #tpu.memory_space<smem>>) -> (i32, i32) {
    %c0_i32 = arith.constant 0 : i32
    %c0_i32_0 = arith.constant 0 : i32
    %c0_i32_1 = arith.constant 0 : i32
    return %c0_i32, %c0_i32_0 : i32, i32
  }
  func.func @transform_2(%arg0: i32, %arg1: memref<2xi32, #tpu.memory_space<smem>>) -> (i32, i32) {
    %c0_i32 = arith.constant 0 : i32
    %c0_i32_0 = arith.constant 0 : i32
    %c0_i32_1 = arith.constant 0 : i32
    return %c0_i32, %c0_i32_0 : i32, i32
  }
  func.func @transform_3(%arg0: i32, %arg1: memref<2xi32, #tpu.memory_space<smem>>) -> (i32, i32, i32) {
    %c0_i32 = arith.constant 0 : i32
    %c0_i32_0 = arith.constant 0 : i32
    %c0_i32_1 = arith.constant 0 : i32
    return %arg0, %c0_i32, %c0_i32_0 : i32, i32, i32
  }
  func.func @transform_4(%arg0: i32, %arg1: memref<2xi32, #tpu.memory_space<smem>>) -> (i32, i32, i32, i32) {
    %c0_i32 = arith.constant 0 : i32
    %c0_i32_0 = arith.constant 0 : i32
    %c0_i32_1 = arith.constant 0 : i32
    %c0_i32_2 = arith.constant 0 : i32
    return %arg0, %c0_i32, %c0_i32_0, %c0_i32_1 : i32, i32, i32, i32
  }
  func.func @transform_5(%arg0: i32, %arg1: memref<2xi32, #tpu.memory_space<smem>>) -> (i32, i32, i32) {
    %c0_i32 = arith.constant 0 : i32
    %c0_i32_0 = arith.constant 0 : i32
    %c0_i32_1 = arith.constant 0 : i32
    return %arg0, %c0_i32, %c0_i32_0 : i32, i32, i32
  }
  func.func @transform_6(%arg0: i32, %arg1: memref<2xi32, #tpu.memory_space<smem>>) -> (i32, i32, i32) {
    %c0_i32 = arith.constant 0 : i32
    %c0_i32_0 = arith.constant 0 : i32
    %c0_i32_1 = arith.constant 0 : i32
    return %arg0, %c0_i32, %c0_i32_0 : i32, i32, i32
  }
  func.func @transform_7(%arg0: i32, %arg1: memref<2xi32, #tpu.memory_space<smem>>) -> (i32, i32, i32) {
    %c0_i32 = arith.constant 0 : i32
    %c0_i32_0 = arith.constant 0 : i32
    %c0_i32_1 = arith.constant 0 : i32
    return %arg0, %c0_i32, %c0_i32_0 : i32, i32, i32
  }
  func.func @transform_8(%arg0: i32, %arg1: memref<2xi32, #tpu.memory_space<smem>>) -> (i32, i32, i32) {
    %c0_i32 = arith.constant 0 : i32
    %c0_i32_0 = arith.constant 0 : i32
    %c0_i32_1 = arith.constant 0 : i32
    return %arg0, %c0_i32, %c0_i32_0 : i32, i32, i32
  }
  func.func @transform_9(%arg0: i32, %arg1: memref<2xi32, #tpu.memory_space<smem>>) -> (i32, i32, i32) {
    %c0_i32 = arith.constant 0 : i32
    %c0_i32_0 = arith.constant 0 : i32
    %c0_i32_1 = arith.constant 0 : i32
    return %arg0, %c0_i32, %c0_i32_0 : i32, i32, i32
  }
  func.func @transform_10(%arg0: i32, %arg1: memref<2xi32, #tpu.memory_space<smem>>) -> (i32, i32, i32, i32) {
    %c0_i32 = arith.constant 0 : i32
    %c0_i32_0 = arith.constant 0 : i32
    %c0_i32_1 = arith.constant 0 : i32
    %c0_i32_2 = arith.constant 0 : i32
    return %arg0, %c0_i32, %c0_i32_0, %c0_i32_1 : i32, i32, i32, i32
  }
  func.func @transform_11(%arg0: i32, %arg1: memref<2xi32, #tpu.memory_space<smem>>) -> (i32, i32, i32) {
    %c0_i32 = arith.constant 0 : i32
    %c0_i32_0 = arith.constant 0 : i32
    %c0_i32_1 = arith.constant 0 : i32
    return %arg0, %c0_i32, %c0_i32_0 : i32, i32, i32
  }
  func.func @transform_12(%arg0: i32, %arg1: memref<2xi32, #tpu.memory_space<smem>>) -> (i32, i32, i32) {
    %c0_i32 = arith.constant 0 : i32
    %c0_i32_0 = arith.constant 0 : i32
    %c0_i32_1 = arith.constant 0 : i32
    return %arg0, %c0_i32, %c0_i32_0 : i32, i32, i32
  }
  func.func @transform_13(%arg0: i32, %arg1: memref<2xi32, #tpu.memory_space<smem>>) -> (i32, i32, i32) {
    %c0_i32 = arith.constant 0 : i32
    %c0_i32_0 = arith.constant 0 : i32
    %c0_i32_1 = arith.constant 0 : i32
    return %arg0, %c0_i32, %c0_i32_0 : i32, i32, i32
  }
  func.func @transform_14(%arg0: i32, %arg1: memref<2xi32, #tpu.memory_space<smem>>) -> (i32, i32, i32) {
    %c0_i32 = arith.constant 0 : i32
    %c0_i32_0 = arith.constant 0 : i32
    %c0_i32_1 = arith.constant 0 : i32
    return %arg0, %c0_i32, %c0_i32_0 : i32, i32, i32
  }
  func.func @transform_15(%arg0: i32, %arg1: memref<2xi32, #tpu.memory_space<smem>>) -> (i32, i32) {
    %c0_i32 = arith.constant 0 : i32
    %c0_i32_0 = arith.constant 0 : i32
    %c0_i32_1 = arith.constant 0 : i32
    return %c0_i32, %c0_i32_0 : i32, i32
  }
  func.func @transform_16(%arg0: i32, %arg1: memref<2xi32, #tpu.memory_space<smem>>) -> (i32, i32) {
    %c0_i32 = arith.constant 0 : i32
    %c0_i32_0 = arith.constant 0 : i32
    %c0_i32_1 = arith.constant 0 : i32
    return %c0_i32, %c0_i32_0 : i32, i32
  }
  func.func @transform_17(%arg0: i32, %arg1: memref<2xi32, #tpu.memory_space<smem>>) -> (i32, i32) {
    %c0_i32 = arith.constant 0 : i32
    %c0_i32_0 = arith.constant 0 : i32
    %c0_i32_1 = arith.constant 0 : i32
    return %c0_i32, %c0_i32_0 : i32, i32
  }
  func.func @transform_18(%arg0: i32, %arg1: memref<2xi32, #tpu.memory_space<smem>>) -> (i32, i32, i32) {
    %c0_i32 = arith.constant 0 : i32
    %c0_i32_0 = arith.constant 0 : i32
    %c0_i32_1 = arith.constant 0 : i32
    %c0_i32_2 = arith.constant 0 : i32
    return %c0_i32, %c0_i32_0, %c0_i32_1 : i32, i32, i32
  }
  func.func @transform_19(%arg0: i32, %arg1: memref<2xi32, #tpu.memory_space<smem>>) -> (i32, i32) {
    %c0_i32 = arith.constant 0 : i32
    %c0_i32_0 = arith.constant 0 : i32
    %c0_i32_1 = arith.constant 0 : i32
    return %c0_i32, %c0_i32_0 : i32, i32
  }
}

</mosaic_0001>

<bundles_post_ra>
// kernel: _lambda_.1
= control target key start
LH: loop header
LB: loop body
LE: loop exit
PB: predicated region body
PF: predicated region fallthrough
CT: control target
= control target key end

     0   :  { %s6454_s0 = inlined_call_operand.vmem [shape: s32[2], index: 0, kind: input, shape index: {}]   ;;  %s6455_s1 = inlined_call_operand.vmem [shape: f32[16,32], index: 1, kind: input, shape index: {}]   ;;  %s6456_s2 = inlined_call_operand.vmem [shape: f32[16,64], index: 2, kind: input, shape index: {}]   ;;  %s6457_s3 = inlined_call_operand.vmem [shape: f32[8,8], index: 3, kind: input, shape index: {}]   ;;  %s6458_s4 = inlined_call_operand.hbm [shape: f32[2,9,32], index: 4, kind: input, shape index: {}]   ;;  %s6459_s5 = inlined_call_operand.hbm [shape: f32[2,3,32,32], index: 5, kind: input, shape index: {}]   ;;  %s6460_s6 = inlined_call_operand.hbm [shape: f32[2,32,32], index: 6, kind: input, shape index: {}]   ;;  %s6461_s7 = inlined_call_operand.hbm [shape: f32[2,32,128], index: 7, kind: input, shape index: {}]   ;;  %s6462_s8 = inlined_call_operand.vmem [shape: f32[2,1,128], index: 8, kind: input, shape index: {}]   ;;  %s6463_s9 = inlined_call_operand.hbm [shape: f32[2,128,32], index: 9, kind: input, shape index: {}]   ;;  %s6464_s10 = inlined_call_operand.vmem [shape: f32[2,9,64], index: 10, kind: input, shape index: {}]   ;;  %s6465_s11 = inlined_call_operand.vmem [shape: f32[2,3,64,64], index: 11, kind: input, shape index: {}]   ;;  %s6466_s12 = inlined_call_operand.hbm [shape: f32[2,64,64], index: 12, kind: input, shape index: {}]   ;;  %s6467_s13 = inlined_call_operand.hbm [shape: f32[2,64,256], index: 13, kind: input, shape index: {}]   ;;  %s6468_s14 = inlined_call_operand.vmem [shape: f32[2,1,256], index: 14, kind: input, shape index: {}]   ;;  %s6469_s15 = inlined_call_operand.hbm [shape: f32[2,256,64], index: 15, kind: input, shape index: {}]   ;;  %s6470_s16 = inlined_call_operand.vmem [shape: f32[2,64], index: 16, kind: input, shape index: {}]   ;;  %s6471_s17 = inlined_call_operand.hbm [shape: f32[64,64], index: 17, kind: input, shape index: {}]   ;;  %s6472_s18 = inlined_call_operand.vmem [shape: f32[2,1], index: 18, kind: input, shape index: {}]   ;;  %s6473_s19 = inlined_call_operand.hbm [shape: f32[2,8,96], index: 19, kind: output, shape index: {0}]   ;;  %s6474_s20 = inlined_call_operand.hbm [shape: f32[2,64], index: 20, kind: output, shape index: {1}]  }
   0x1   :  { %6490 = sst [smem:[#allocation37_spill]] %s6454_s0 }
   0x2   :  { %6491 = sst [smem:[#allocation38_spill]] %s6455_s1 }
   0x3   :  { %6492 = sst [smem:[#allocation39_spill]] %s6456_s2 }
   0x4   :  { %6493 = sst [smem:[#allocation40_spill]] %s6457_s3 }
   0x5   :  { %6494 = sst [smem:[#allocation41_spill]] %s6458_s4 }
   0x6   :  { %6495 = sst [smem:[#allocation42_spill]] %s6459_s5 }
   0x7   :  { %6496 = sst [smem:[#allocation43_spill]] %s6460_s6 }
   0x8   :  { %6497 = sst [smem:[#allocation44_spill]] %s6461_s7 }
   0x9   :  { %6498 = sst [smem:[#allocation45_spill]] %s6462_s8 }
   0xa   :  { %6499 = sst [smem:[#allocation46_spill]] %s6463_s9 }
   0xb   :  { %6500 = sst [smem:[#allocation47_spill]] %s6464_s10 }
   0xc   :  { %6501 = sst [smem:[#allocation48_spill]] %s6465_s11 }
   0xd   :  { %6502 = sst [smem:[#allocation49_spill]] %s6466_s12 }
   0xe   :  { %6503 = sst [smem:[#allocation50_spill]] %s6468_s14 }
   0xf   :  { %6504 = sst [smem:[#allocation51_spill]] %s6470_s16 }
  0x10   :  { %6505 = sst [smem:[#allocation52_spill]] %s6471_s17 }
  0x11   :  { %6506 = sst [smem:[#allocation53_spill]] %s6472_s18 }
  0x12   :  { %6507 = sst [smem:[#allocation54_spill]] %s6473_s19 }
  0x13   :  { %6508 = sst [smem:[#allocation55_spill]] %s6474_s20 }
  0x14   :  { %s6509_s23 = sld [smem:[#allocation37_spill]] }
  0x1a   :  { %s26_s14 = sshll.u32 %s6509_s23, 4  ;;  %s27_s14 = int_to_ptr.vmem [resolvable:$true] %s26_s14 }
  0x1b   :  { %s4995_s24 = scalar_lea.vmem %s27_s14, 16  ;;  %p5000_p1 = scmp.lt.s32.totalorder %s27_s14, %s27_s14 }
  0x1c   :  { %p4996_p0 = scmp.ne.s32.totalorder %s27_s14, %s4995_s24  ;;  %p5001_p2 = scmp.lt.s32.totalorder %s4995_s24, %s4995_s24 }
  0x1e   :  { %p5002_p3 = por %p5001_p2, %p5000_p1 }
  0x20   :  { %p5003_p4 = pnand %p5002_p3, %p4996_p0 }
  0x22   :  { %5006 = shalt.err (!%p5003_p4)  }
  0x23   :  { %s5371_s2 = smov [#allocation5]  }
  0x24   :  { %29 = dma.vmem_to_smem %s27_s14, 16, %s5371_s2, [#allocation4] }
  0x25   :  { %5321 = dma.done.wait [#allocation4], 16 }
  0x26   :  { %5322 = vsyncadd [#allocation4], 4294967280 }
  0x27   :  { %31 = sfence }
  0x28   :  { %32 = vsyncpa [#allocation7], 0 }
  0x29   :  { %34 = vsyncpa [#allocation7 + $0x1], 0 }
  0x2a   :  { %35 = vsyncpa [#allocation10], 0 }
  0x2b   :  { %37 = vsyncpa [#allocation10 + $0x1], 0 }
  0x2c   :  { %38 = vsyncpa [#allocation13], 0 }
  0x2d   :  { %40 = vsyncpa [#allocation13 + $0x1], 0 }
  0x2e   :  { %41 = vsyncpa [#allocation16], 0 }
  0x2f   :  { %43 = vsyncpa [#allocation16 + $0x1], 0 }
  0x30   :  { %44 = vsyncpa [#allocation19], 0 }
  0x31   :  { %46 = vsyncpa [#allocation19 + $0x1], 0 }
  0x32   :  { %47 = vsyncpa [#allocation8], 0 }
  0x33   :  { %48 = vsyncpa [#allocation23], 0  ;;  %s5505_s25 = smov 0   ;;  %s5507_s3 = smov 0  }
  0x34   :  { %s5509_s14 = smov 0   ;;  %s5511_s26 = smov 0  }
  0x35 LB: > { %6510 = sst [smem:[#allocation33_spill]] %s5365_s14  ;;  %s5524_s27 = sadd.s32 4294967295, %s5369_s26   ;;  %s5369_s26 = sphi %s5511_s26, %s6554_s26   ;;  %s5365_s14 = sphi %s5509_s14, %s6556_s14   ;;  %s5361_s3 = sphi %s5507_s3, %s6558_s3   ;;  %s5357_s25 = sphi %s5505_s25, %s6557_s25  }
  0x36   : > { %6511 = sst [smem:[#allocation34_spill]] %s5524_s27  ;;  %s5527_s28 = sadd.s32 1, %s5369_s26  }
  0x37   : > { %6512 = sst [smem:[#allocation35_spill]] %s5527_s28  ;;  %s121_s4 = ssub.s32 %s5369_s26, %s5527_s28 }
  0x38   : > { %s124_s29 = sadd.s32 1, %s5365_s14  ;;  %p122_p5 = scmp.eq.s32.totalorder %s121_s4, 0 }
  0x39   : > { %p131_p6 = scmp.ne.s32.totalorder %s5365_s14, %s5361_s3  ;;  %p132_p7 = scmp.eq.s32.totalorder %s5369_s26, 0 }
  0x3a   : > { %p137_p8 = scmp.ne.s32.totalorder %s5361_s3, %s5357_s25  ;;  %p6478_p10 = scmp.eq.s32.totalorder %s5524_s27, 0 }
  0x3b   : > { %s5537_s30 = scalar_select %p122_p5, %s5365_s14, %s124_s29  }
  0x3c   : > { %p5539_p9 = por %p132_p7, %p131_p6  ;;  %p4245_p11 = scmp.ge.s32.totalorder %s5369_s26, 1 }
  0x3d   : > { %6513 = sst [smem:[#allocation36_spill]] %s5537_s30  ;;  %p539_p12 = scmp.lt.s32.totalorder %s5369_s26, 3 }
  0x3e   : > { %p5548_p13 = por %p6478_p10, %p137_p8  ;;  %s5372_s22 = smov [#allocation20]  }
  0x3f   : > { %p5553_p1 = pnand %p4245_p11, %p539_p12  ;;  %s563_s23 = sshll.u32 %s5372_s22, 4  ;;  %s564_s23 = int_to_ptr.vmem [resolvable:$true] %s563_s23 }
  0x40   : > { %s6515_s21 = scalar_select %p5548_p13, 1, 0 }
  0x41   : > { %s6516_s1 = scalar_select %p5553_p1, 1, 0 }
  0x42   : > { %p4833_p2 = pneg %p5553_p1  ;;  %p4863_p4 = scmp.lt.s32.totalorder %s5369_s26, 2 }
  0x43   : > { %s5567_s2 = sand.u32 1, %s5365_s14   ;;  %s5570_s25 = sand.u32 1, %s5369_s26  }
  0x44   : > { %p5561_p3 = pnand %p4833_p2, %p6478_p10  ;;  %p5574_p5 = pnand %p4863_p4, %p5539_p9 }
  0x45   : > { %s5018_s29 = scalar_lea.vmem %s564_s23, 1024  ;;  %p5026_p12 = scmp.lt.s32.totalorder %s564_s23, %s564_s23 }
  0x46   : > { %p5009_p6 = pneg %p5561_p3  ;;  %p5019_p7 = scmp.ne.s32.totalorder %s564_s23, %s5018_s29 }
  0x47   : > { %p5027_p2 = scmp.lt.s32.totalorder %s5018_s29, %s5018_s29 }
  0x48   : > { %p5021_p8 = pnand %p5019_p7, %p5009_p6 }
  0x49   : > { %p5028_p0 = por %p5027_p2, %p5026_p12 }
  0x4a   : > { %p5022_p11 = pneg %p5021_p8 }
  0x4c   : > { %p5029_p10 = pnand %p5028_p0, %p5022_p11 }
  0x4e   : > { %5032 = shalt.err (!%p5029_p10)
}
  0x4f   : > { %s5373_s22 = smov 128   ;;  %s5374_s0 = smov 8  }
  0x50   : > { %s6519_s17 = sld [smem:[#allocation52_spill]]  ;;  %s4801_s29 = smul.u32 96, %s5567_s2 }
  0x51   : > { %s4802_s20 = smul.u32 1536, %s5369_s26  ;;  %s6482_s19 = sshll.u32 %s5369_s26, 9 }
  0x52   : > { %s6520_s5 = sld [smem:[#allocation42_spill]]  ;;  %s605_s24 = scalar_lea.vmem [#allocation9], %s4801_s29 }
  0x53   : > { %s612_s10 = sshll.u32 %s605_s24, 4  ;;  %s6521_s6 = sld [smem:[#allocation43_spill]]  ;;  %s5597_s10 = int_to_ptr.vmem [resolvable:$true] %s612_s10 }
  0x54   : > { %p5611_p10 = pneg %p5574_p5 }
  0x56   : > { %4836 = dma.hbm_to_vmem [thread:$0]  (!%p5561_p3), %s6519_s17, 1024, %s564_s23, [#allocation19], %s5373_s22, %s5373_s22, %s5374_s0  }
  0x57   : > { %s6485_s23 = scalar_lea.sflag [#allocation10], %s5570_s25 }
  0x58   : > { %s5595_s11 = scalar_lea.hbm %s6520_s5, %s4802_s20  ;;  %s5038_s29 = scalar_lea.hbm %s6520_s5, 3072 }
  0x59   : > { %s5604_s30 = scalar_lea.hbm %s6521_s6, %s6482_s19  ;;  %s5033_s28 = scalar_lea.hbm %s5595_s11, 1536 }
  0x5a   : > { %p5034_p9 = scmp.ne.s32.totalorder %s5595_s11, %s5033_s28  ;;  %p5039_p4 = scmp.lt.s32.totalorder %s5595_s11, %s6520_s5 }
  0x5b   : > { %p5040_p6 = scmp.lt.s32.totalorder %s5038_s29, %s5033_s28 }
  0x5c   : > { %p5036_p0 = pnand %p5611_p10, %p5034_p9 }
  0x5d   : > { %p5041_p7 = por %p5040_p6, %p5039_p4 }
  0x5e   : > { %p5037_p3 = pneg %p5036_p0 }
  0x60   : > { %p5042_p8 = pnand %p5041_p7, %p5037_p3 }
  0x62   : > { %5045 = shalt.err (!%p5042_p8)
}
  0x63   : > { %s5046_s14 = scalar_lea.vmem %s5597_s10, 1536  ;;  %s5375_s19 = smov [#allocation9]  }
  0x64   : > { %p5047_p11 = scmp.ne.s32.totalorder %s5597_s10, %s5046_s14  ;;  %s5051_s18 = sshll.u32 %s5375_s19, 4  ;;  %s5052_s18 = int_to_ptr.vmem [resolvable:$false] %s5051_s18 }
  0x65   : > { %s5053_s20 = scalar_lea.vmem %s5052_s18, 3072  ;;  %p5054_p9 = scmp.lt.s32.totalorder %s5597_s10, %s5052_s18 }
  0x66   : > { %p5049_p12 = pnand %p5047_p11, %p5611_p10  ;;  %p5055_p0 = scmp.lt.s32.totalorder %s5053_s20, %s5046_s14 }
  0x68   : > { %p5050_p2 = pneg %p5049_p12  ;;  %p5056_p13 = por %p5055_p0, %p5054_p9 }
  0x6a   : > { %p5057_p1 = pnand %p5056_p13, %p5050_p2 }
  0x6c   : > { %5060 = shalt.err (!%p5057_p1)
}
  0x6d   : > { %4843 = dma.hbm_to_vmem [thread:$0]  (!%p5574_p5), %s5595_s11, 1536, %s5597_s10, %s6485_s23, %s5373_s22, %s5373_s22, %s5374_s0  }
  0x6e   : > { %s6523_s19 = sshll.u32 %s5567_s2, 5  ;;  %s6524_s24 = sshll.u32 %s5369_s26, 9 }
  0x6f   : > { %s626_s28 = scalar_lea.vmem [#allocation11], %s6523_s19  ;;  %s6525_s7 = sld [smem:[#allocation44_spill]] }
  0x70   : > { %s633_s29 = sshll.u32 %s626_s28, 4  ;;  %s6526_s20 = smov %s6523_s19  ;;  %s5640_s29 = int_to_ptr.vmem [resolvable:$true] %s633_s29 }
  0x71   : > { %s647_s5 = scalar_lea.vmem [#allocation12], %s6526_s20  ;;  %s6486_s10 = scalar_lea.sflag [#allocation13], %s5570_s25 }
  0x72   : > { %s654_s17 = sshll.u32 %s647_s5, 4  ;;  %s5651_s17 = int_to_ptr.vmem [resolvable:$true] %s654_s17 }
  0x75   : > { %s5647_s18 = scalar_lea.hbm %s6525_s7, %s6524_s24  ;;  %s5066_s8 = scalar_lea.hbm %s6525_s7, 1024 }
  0x76   : > { %s5061_s11 = scalar_lea.hbm %s5647_s18, 512  ;;  %p5067_p4 = scmp.lt.s32.totalorder %s5647_s18, %s6525_s7 }
  0x77   : > { %p5062_p13 = scmp.ne.s32.totalorder %s5647_s18, %s5061_s11  ;;  %p5068_p6 = scmp.lt.s32.totalorder %s5066_s8, %s5061_s11 }
  0x79   : > { %p5064_p1 = pnand %p5062_p13, %p5611_p10  ;;  %p5069_p7 = por %p5068_p6, %p5067_p4 }
  0x7b   : > { %p5065_p3 = pneg %p5064_p1 }
  0x7d   : > { %p5070_p8 = pnand %p5069_p7, %p5065_p3 }
  0x7f   : > { %5073 = shalt.err (!%p5070_p8)
}
  0x80   : > { %s5074_s5 = scalar_lea.vmem %s5651_s17, 512  ;;  %s5376_s20 = smov [#allocation12]  }
  0x81   : > { %p5075_p11 = scmp.ne.s32.totalorder %s5651_s17, %s5074_s5  ;;  %s5079_s19 = sshll.u32 %s5376_s20, 4  ;;  %s5080_s19 = int_to_ptr.vmem [resolvable:$false] %s5079_s19 }
  0x82   : > { %s5081_s28 = scalar_lea.vmem %s5080_s19, 1024  ;;  %p5082_p9 = scmp.lt.s32.totalorder %s5651_s17, %s5080_s19 }
  0x83   : > { %p5077_p12 = pnand %p5075_p11, %p5611_p10  ;;  %p5083_p0 = scmp.lt.s32.totalorder %s5081_s28, %s5074_s5 }
  0x85   : > { %p5078_p2 = pneg %p5077_p12  ;;  %p5084_p13 = por %p5083_p0, %p5082_p9 }
  0x87   : > { %p5085_p1 = pnand %p5084_p13, %p5078_p2 }
  0x89   : > { %5088 = shalt.err (!%p5085_p1)
}
  0x8a   : > { %4849 = dma.hbm_to_vmem [thread:$0]  (!%p5574_p5), %s5647_s18, 512, %s5651_s17, %s6486_s10, %s5373_s22, %s5373_s22, %s5374_s0  }
  0x8b   : > { %s4261_s11 = sshll.u32 %s5567_s2, 6  ;;  %s4355_s8 = sshll.u32 %s5369_s26, 10 }
  0x8c   : > { %s6527_s12 = sld [smem:[#allocation49_spill]]  ;;  %s711_s20 = scalar_lea.vmem [#allocation15], %s4261_s11 }
  0x8d   : > { %s718_s19 = sshll.u32 %s711_s20, 4  ;;  %s4248_s28 = sshll.u32 %s5567_s2, 4  ;;  %s5686_s19 = int_to_ptr.vmem [resolvable:$true] %s718_s19 }
  0x8e   : > { %s708_s23 = scalar_lea.sflag [#allocation16], %s5570_s25 }
  0x92   : > { %s5684_s5 = scalar_lea.hbm %s6527_s12, %s4355_s8  ;;  %s5094_s24 = scalar_lea.hbm %s6527_s12, 2048 }
  0x93   : > { %s5089_s7 = scalar_lea.hbm %s5684_s5, 1024  ;;  %p5095_p7 = scmp.lt.s32.totalorder %s5684_s5, %s6527_s12 }
  0x94   : > { %p5090_p3 = scmp.ne.s32.totalorder %s5684_s5, %s5089_s7  ;;  %p5096_p8 = scmp.lt.s32.totalorder %s5094_s24, %s5089_s7 }
  0x96   : > { %p5092_p4 = pnand %p5090_p3, %p5611_p10  ;;  %p5097_p11 = por %p5096_p8, %p5095_p7 }
  0x98   : > { %p5093_p6 = pneg %p5092_p4 }
  0x9a   : > { %p5098_p12 = pnand %p5097_p11, %p5093_p6 }
  0x9c   : > { %5101 = shalt.err (!%p5098_p12)
}
  0x9d   : > { %s5102_s11 = scalar_lea.vmem %s5686_s19, 1024  ;;  %s5377_s20 = smov [#allocation15]  }
  0x9e   : > { %p5103_p2 = scmp.ne.s32.totalorder %s5686_s19, %s5102_s11  ;;  %s5107_s17 = sshll.u32 %s5377_s20, 4  ;;  %s5108_s17 = int_to_ptr.vmem [resolvable:$false] %s5107_s17 }
  0x9f   : > { %s5109_s18 = scalar_lea.vmem %s5108_s17, 2048  ;;  %p5110_p13 = scmp.lt.s32.totalorder %s5686_s19, %s5108_s17 }
  0xa0   : > { %p5105_p9 = pnand %p5103_p2, %p5611_p10  ;;  %p5111_p1 = scmp.lt.s32.totalorder %s5109_s18, %s5102_s11 }
  0xa2   : > { %p5106_p0 = pneg %p5105_p9  ;;  %p5112_p3 = por %p5111_p1, %p5110_p13 }
  0xa4   : > { %p5113_p4 = pnand %p5112_p3, %p5106_p0 }
  0xa6   : > { %5116 = shalt.err (!%p5113_p4)
}
  0xa7   : > { %4855 = dma.hbm_to_vmem [thread:$0]  (!%p5574_p5), %s5684_s5, 1024, %s5686_s19, %s708_s23, %s5373_s22, %s5373_s22, %s5374_s0  }
  0xa8   : > { %s4351_s7 = sshll.u32 %s5369_s26, 8  ;;  %s6528_s14 = sld [smem:[#allocation41_spill]] }
  0xa9   : > { %s584_s17 = scalar_lea.vmem [#allocation6], %s4248_s28  ;;  %s4258_s10 = sshll.u32 %s5567_s2, 7 }
  0xaa   : > { %s591_s18 = sshll.u32 %s584_s17, 4  ;;  %s581_s12 = scalar_lea.sflag [#allocation7], %s5567_s2  ;;  %s5723_s18 = int_to_ptr.vmem [resolvable:$true] %s591_s18 }
  0xae   : > { %s6529_s11 = smov %s6528_s14  ;;  %s5719_s20 = scalar_lea.hbm %s6528_s14, %s4351_s7 }
  0xaf   : > { %s5117_s27 = scalar_lea.hbm %s5719_s20, 256  ;;  %s5122_s7 = scalar_lea.hbm %s6529_s11, 512 }
  0xb0   : > { %p5118_p6 = scmp.ne.s32.totalorder %s5719_s20, %s5117_s27  ;;  %p5123_p11 = scmp.lt.s32.totalorder %s5719_s20, %s6529_s11 }
  0xb1   : > { %p5124_p12 = scmp.lt.s32.totalorder %s5122_s7, %s5117_s27 }
  0xb2   : > { %p5120_p7 = pnand %p5118_p6, %p5611_p10 }
  0xb3   : > { %p5125_p2 = por %p5124_p12, %p5123_p11 }
  0xb4   : > { %p5121_p8 = pneg %p5120_p7 }
  0xb6   : > { %p5126_p9 = pnand %p5125_p2, %p5121_p8 }
  0xb8   : > { %5129 = shalt.err (!%p5126_p9)
}
  0xb9   : > { %s5130_s28 = scalar_lea.vmem %s5723_s18, 256  ;;  %s5378_s14 = smov [#allocation6]  }
  0xba   : > { %p5131_p0 = scmp.ne.s32.totalorder %s5723_s18, %s5130_s28  ;;  %s5135_s17 = sshll.u32 %s5378_s14, 4  ;;  %s5136_s17 = int_to_ptr.vmem [resolvable:$false] %s5135_s17 }
  0xbb   : > { %s5137_s5 = scalar_lea.vmem %s5136_s17, 512  ;;  %p5138_p3 = scmp.lt.s32.totalorder %s5723_s18, %s5136_s17 }
  0xbc   : > { %p5133_p13 = pnand %p5131_p0, %p5611_p10  ;;  %p5139_p4 = scmp.lt.s32.totalorder %s5137_s5, %s5130_s28 }
  0xbe   : > { %p5134_p1 = pneg %p5133_p13  ;;  %p5140_p6 = por %p5139_p4, %p5138_p3 }
  0xc0   : > { %p5141_p7 = pnand %p5140_p6, %p5134_p1 }
  0xc2   : > { %5144 = shalt.err (!%p5141_p7)
}
  0xc3   : > { %4840 = dma.hbm_to_vmem [thread:$0]  (!%p5574_p5), %s5719_s20, 256, %s5723_s18, %s581_s12, %s5373_s22, %s5373_s22, %s5374_s0  }
  0xc4   : > { %s5145_s27 = scalar_lea.hbm %s5604_s30, 512  ;;  %s5150_s24 = scalar_lea.hbm %s6521_s6, 1024 }
  0xc5   : > { %p5146_p8 = scmp.ne.s32.totalorder %s5604_s30, %s5145_s27  ;;  %p5151_p2 = scmp.lt.s32.totalorder %s5604_s30, %s6521_s6 }
  0xc6   : > { %p5152_p9 = scmp.lt.s32.totalorder %s5150_s24, %s5145_s27 }
  0xc7   : > { %p5148_p11 = pnand %p5146_p8, %p5611_p10 }
  0xc8   : > { %p5153_p0 = por %p5152_p9, %p5151_p2 }
  0xc9   : > { %p5149_p12 = pneg %p5148_p11 }
  0xcb   : > { %p5154_p13 = pnand %p5153_p0, %p5149_p12 }
  0xcd   : > { %5157 = shalt.err (!%p5154_p13)
}
  0xce   : > { %s5158_s12 = scalar_lea.vmem %s5640_s29, 512  ;;  %s5379_s20 = smov [#allocation11]  }
  0xcf   : > { %p5159_p1 = scmp.ne.s32.totalorder %s5640_s29, %s5158_s12  ;;  %s5163_s18 = sshll.u32 %s5379_s20, 4  ;;  %s5164_s18 = int_to_ptr.vmem [resolvable:$false] %s5163_s18 }
  0xd0   : > { %s5165_s14 = scalar_lea.vmem %s5164_s18, 1024  ;;  %p5166_p6 = scmp.lt.s32.totalorder %s5640_s29, %s5164_s18 }
  0xd1   : > { %p5161_p3 = pnand %p5159_p1, %p5611_p10  ;;  %p5167_p7 = scmp.lt.s32.totalorder %s5165_s14, %s5158_s12 }
  0xd3   : > { %p5162_p4 = pneg %p5161_p3  ;;  %p5168_p8 = por %p5167_p7, %p5166_p6 }
  0xd5   : > { %p5169_p11 = pnand %p5168_p8, %p5162_p4 }
  0xd7   : > { %5172 = shalt.err (!%p5169_p11)
}
  0xd8   : > { %s6530_s17 = scalar_lea.sflag [#allocation10], %s5570_s25  ;;  %s4354_s5 = sshll.u32 %s5369_s26, 11 }
  0xd9   : > { %4846 = dma.hbm_to_vmem [thread:$0]  (!%p5574_p5), %s5604_s30, 512, %s5640_s29, %s6530_s17, %s5373_s22, %s5373_s22, %s5374_s0  }
  0xda   : > { %s6531_s9 = sld [smem:[#allocation46_spill]]  ;;  %s674_s24 = scalar_lea.vmem [#allocation14], %s4258_s10 }
  0xdb   : > { %s681_s8 = sshll.u32 %s674_s24, 4  ;;  %s682_s8 = int_to_ptr.vmem [resolvable:$true] %s681_s8 }
  0xe0   : > { %s5781_s7 = scalar_lea.hbm %s6531_s9, %s4354_s5  ;;  %s5178_s12 = scalar_lea.hbm %s6531_s9, 4096 }
  0xe1   : > { %s5173_s28 = scalar_lea.hbm %s5781_s7, 2048  ;;  %p5179_p0 = scmp.lt.s32.totalorder %s5781_s7, %s6531_s9 }
  0xe2   : > { %p5174_p12 = scmp.ne.s32.totalorder %s5781_s7, %s5173_s28  ;;  %p5180_p13 = scmp.lt.s32.totalorder %s5178_s12, %s5173_s28 }
  0xe4   : > { %p5176_p2 = pnand %p5174_p12, %p5611_p10  ;;  %p5181_p1 = por %p5180_p13, %p5179_p0 }
  0xe6   : > { %p5177_p9 = pneg %p5176_p2 }
  0xe8   : > { %p5182_p3 = pnand %p5181_p1, %p5177_p9 }
  0xea   : > { %5185 = shalt.err (!%p5182_p3)
}
  0xeb   : > { %s5186_s14 = scalar_lea.vmem %s682_s8, 2048  ;;  %s5380_s17 = smov [#allocation14]  }
  0xec   : > { %p5187_p4 = scmp.ne.s32.totalorder %s682_s8, %s5186_s14  ;;  %s5191_s27 = sshll.u32 %s5380_s17, 4  ;;  %s5192_s27 = int_to_ptr.vmem [resolvable:$false] %s5191_s27 }
  0xed   : > { %s5193_s19 = scalar_lea.vmem %s5192_s27, 4096  ;;  %p5194_p8 = scmp.lt.s32.totalorder %s682_s8, %s5192_s27 }
  0xee   : > { %p5189_p6 = pnand %p5187_p4, %p5611_p10  ;;  %p5195_p11 = scmp.lt.s32.totalorder %s5193_s19, %s5186_s14 }
  0xf0   : > { %p5190_p7 = pneg %p5189_p6  ;;  %p5196_p12 = por %p5195_p11, %p5194_p8 }
  0xf2   : > { %p5197_p2 = pnand %p5196_p12, %p5190_p7 }
  0xf4   : > { %5200 = shalt.err (!%p5197_p2)
}
  0xf5   : > { %s6532_s24 = scalar_lea.sflag [#allocation13], %s5570_s25  ;;  %s5811_s29 = scalar_lea.hbm %s6467_s13, %s4354_s5 }
  0xf6   : > { %4852 = dma.hbm_to_vmem [thread:$0]  (!%p5574_p5), %s5781_s7, 2048, %s682_s8, %s6532_s24, %s5373_s22, %s5373_s22, %s5374_s0  }
  0xf7   : > { %s732_s12 = scalar_lea.vmem [#allocation17], %s4258_s10  ;;  %s5201_s18 = scalar_lea.hbm %s5811_s29, 2048 }
  0xf8   : > { %s739_s20 = sshll.u32 %s732_s12, 4  ;;  %p5202_p9 = scmp.ne.s32.totalorder %s5811_s29, %s5201_s18  ;;  %s5815_s20 = int_to_ptr.vmem [resolvable:$true] %s739_s20 }
  0xf9   : > { %s5206_s14 = scalar_lea.hbm %s6467_s13, 4096  ;;  %p5207_p1 = scmp.lt.s32.totalorder %s5811_s29, %s6467_s13 }
  0xfa   : > { %p5204_p0 = pnand %p5202_p9, %p5611_p10  ;;  %p5208_p3 = scmp.lt.s32.totalorder %s5206_s14, %s5201_s18 }
  0xfc   : > { %p5205_p13 = pneg %p5204_p0  ;;  %p5209_p4 = por %p5208_p3, %p5207_p1 }
  0xfe   : > { %p5210_p6 = pnand %p5209_p4, %p5205_p13 }
 0x100   : > { %5213 = shalt.err (!%p5210_p6)
}
 0x101   : > { %s5214_s10 = scalar_lea.vmem %s5815_s20, 2048  ;;  %s5381_s27 = smov [#allocation17]  }
 0x102   : > { %p5215_p7 = scmp.ne.s32.totalorder %s5815_s20, %s5214_s10  ;;  %s5219_s19 = sshll.u32 %s5381_s27, 4  ;;  %s5220_s19 = int_to_ptr.vmem [resolvable:$false] %s5219_s19 }
 0x103   : > { %s5221_s24 = scalar_lea.vmem %s5220_s19, 4096  ;;  %p5222_p12 = scmp.lt.s32.totalorder %s5815_s20, %s5220_s19 }
 0x104   : > { %p5217_p8 = pnand %p5215_p7, %p5611_p10  ;;  %p5223_p2 = scmp.lt.s32.totalorder %s5221_s24, %s5214_s10 }
 0x106   : > { %p5218_p11 = pneg %p5217_p8  ;;  %p5224_p9 = por %p5223_p2, %p5222_p12 }
 0x108   : > { %p5225_p0 = pnand %p5224_p9, %p5218_p11 }
 0x10a   : > { %5228 = shalt.err (!%p5225_p0)
}
 0x10b   : > { %s5382_s28 = smov 256   ;;  %s5383_s30 = smov 16  }
 0x10c   : > { %4858 = dma.hbm_to_vmem [thread:$0]  (!%p5574_p5), %s5811_s29, 2048, %s5815_s20, %s708_s23, %s5382_s28, %s5382_s28, %s5383_s30  }
 0x10d   : > { %s4267_s12 = sshll.u32 %s5567_s2, 8  ;;  %s4357_s18 = sshll.u32 %s5369_s26, 12 }
 0x10e   : > { %s5844_s14 = scalar_lea.hbm %s6469_s15, %s4357_s18  ;;  %s760_s17 = scalar_lea.vmem [#allocation18], %s4267_s12 }
 0x10f   : > { %s767_s5 = sshll.u32 %s760_s17, 4  ;;  %s757_s10 = scalar_lea.sflag [#allocation19], %s5570_s25  ;;  %s5846_s5 = int_to_ptr.vmem [resolvable:$true] %s767_s5 }
 0x110   : > { %s5229_s27 = scalar_lea.hbm %s5844_s14, 4096  ;;  %s5234_s23 = scalar_lea.hbm %s6469_s15, 8192 }
 0x111   : > { %p5230_p13 = scmp.ne.s32.totalorder %s5844_s14, %s5229_s27  ;;  %p5235_p4 = scmp.lt.s32.totalorder %s5844_s14, %s6469_s15 }
 0x112   : > { %p5236_p6 = scmp.lt.s32.totalorder %s5234_s23, %s5229_s27 }
 0x113   : > { %p5232_p1 = pnand %p5230_p13, %p5611_p10 }
 0x114   : > { %p5237_p7 = por %p5236_p6, %p5235_p4 }
 0x115   : > { %p5233_p3 = pneg %p5232_p1 }
 0x117   : > { %p5238_p8 = pnand %p5237_p7, %p5233_p3 }
 0x119   : > { %5241 = shalt.err (!%p5238_p8)
}
 0x11a   : > { %s5242_s25 = scalar_lea.vmem %s5846_s5, 4096  ;;  %s5384_s19 = smov [#allocation18]  }
 0x11b   : > { %p5243_p11 = scmp.ne.s32.totalorder %s5846_s5, %s5242_s25  ;;  %s5247_s24 = sshll.u32 %s5384_s19, 4  ;;  %s5248_s24 = int_to_ptr.vmem [resolvable:$false] %s5247_s24 }
 0x11c   : > { %s5249_s28 = scalar_lea.vmem %s5248_s24, 8192  ;;  %p5250_p9 = scmp.lt.s32.totalorder %s5846_s5, %s5248_s24 }
 0x11d   : > { %p5245_p12 = pnand %p5243_p11, %p5611_p10  ;;  %p5251_p0 = scmp.lt.s32.totalorder %s5249_s28, %s5242_s25 }
 0x11f   : > { %p5246_p2 = pneg %p5245_p12  ;;  %p5252_p13 = por %p5251_p0, %p5250_p9 }
 0x121   : > { %p5253_p1 = pnand %p5252_p13, %p5246_p2 }
 0x123   : > { %5256 = shalt.err (!%p5253_p1)
}
 0x124   : > { %4861 = dma.hbm_to_vmem [thread:$0]  (!%p5574_p5), %s5844_s14, 4096, %s5846_s5, %s757_s10, %s5373_s22, %s5373_s22, %s5374_s0  }
 0x125   : > { %p6533_p10 = scmp.ne.s32.totalorder %s6516_s1, 0 }
 0x126   : > { %s781_s16 = sand.u32 (!%p6533_p10), 1, %s5361_s3   ;;  %p6534_p3 = scmp.ne.s32.totalorder (!%p6533_p10), %s6515_s21, 0 }
 0x127   : > { %779 = sbr.rel (%p6533_p10) target bundleno = 5546 (0x15aa), region = 92  ;;  %s4271_s30 = sshll.u32 (!%p6533_p10), %s781_s16, 4 }
 0x128   : > { %s782_s12 = scalar_lea.sflag (!%p6533_p10), [#allocation7], %s781_s16  ;;  %s5875_s18 = scalar_lea.vmem (!%p6533_p10), [#allocation6], %s4271_s30 }
 0x12c   : > { %5324 = dma.done.wait (%p6534_p3), %s782_s12, 256  }
 0x12d   : > { %5326 = vsyncadd (%p6534_p3), %s782_s12, 4294967040  ;;  %s6535_s4 = sld [smem:[#allocation34_spill]]  ;;  %s4803_s8 = smul.u32 96, %s781_s16 }
 0x12f   : > { %s5882_s0 = scalar_lea.vmem [#allocation9], %s4803_s8 }
 0x133   : > { %s790_s7 = sand.u32 1, %s6535_s4  }
 0x134   : > { %s791_s22 = scalar_lea.sflag [#allocation10], %s790_s7 }
 0x135   : > { %5328 = dma.done.wait (%p6534_p3), %s791_s22, 2048  }
 0x136   : > { %5330 = vsyncadd (%p6534_p3), %s791_s22, 4294965248  ;;  %s4272_s1 = sshll.u32 %s781_s16, 5  ;;  %s809_s17 = scalar_lea.sflag [#allocation13], %s790_s7 }
 0x137   : > { %s5888_s14 = scalar_lea.vmem [#allocation11], %s4272_s1  ;;  %s5890_s5 = scalar_lea.vmem [#allocation12], %s4272_s1 }
 0x138   : > { %5332 = dma.done.wait (%p6534_p3), %s809_s17, 2560  }
 0x139   : > { %5334 = vsyncadd (%p6534_p3), %s809_s17, 4294964736  ;;  %s4274_s10 = sshll.u32 %s781_s16, 7  ;;  %s4275_s27 = sshll.u32 %s781_s16, 6 }
 0x13a   : > { %s5896_s2 = scalar_lea.vmem [#allocation14], %s4274_s10  ;;  %s827_s26 = scalar_lea.sflag [#allocation16], %s790_s7 }
 0x13b   : > { %s5898_s23 = scalar_lea.vmem [#allocation15], %s4275_s27 }
 0x13c   : > { %5336 = dma.done.wait (%p6534_p3), %s827_s26, 3072  }
 0x13d   : > { %5338 = vsyncadd (%p6534_p3), %s827_s26, 4294964224  ;;  %s4277_s29 = sshll.u32 %s781_s16, 8  ;;  %s5904_s20 = scalar_lea.vmem [#allocation17], %s4274_s10 }
 0x13e   : > { %s845_s25 = scalar_lea.sflag [#allocation19], %s790_s7  ;;  %s5906_s19 = scalar_lea.vmem [#allocation18], %s4277_s29 }
 0x13f   : > { %5340 = dma.done.wait (%p6534_p3), %s845_s25, 4096  }
 0x140   : > { %5342 = vsyncadd (%p6534_p3), %s845_s25, 4294963200  ;;  %p6536_p5 = scmp.eq.s32.totalorder %s6535_s4, 0 }
 0x142   : > { %5344 = dma.done.wait (%p6536_p5), [#allocation19], 1024   ;;  %p6537_p4 = pmov %p6536_p5 }
 0x143   : > { %p954_p6 = scmp.lt.s32.totalorder %s6535_s4, 1  ;;  %s6539_s22 = sld [smem:[#allocation47_spill]] }
 0x144   : > { %5346 = vsyncadd (%p6537_p4), [#allocation19], 4294966272  ;;  %s6540_s29 = sld [smem:[#allocation48_spill]]  ;;  %p6542_p7 = scmp.ne.s32.totalorder %s6535_s4, 0 }
 0x145   : > { %s5918_s24 = scalar_select %p954_p6, %s6535_s4, 1 }
 0x146   : > { %s6541_s28 = sld [smem:[#allocation50_spill]] }
 0x147   : > { %s4358_s12 = sshll.u32 %s5918_s24, 4  ;;  %s4804_s17 = smul.u32 192, %s5918_s24 }
 0x148   : > { %s4282_s10 = sshll.u32 %s5918_s24, 1  ;;  %974 = sbr.rel (%p6542_p7) target bundleno = 338 (0x152), region = 132 }
 0x149   : > { %s5928_s1 = scalar_lea.vmem %s6539_s22, %s4358_s12  ;;  %s6543_s7 = sld [smem:[#allocation38_spill]] (!%p6542_p7) }
 0x14a   : > { %s5935_s25 = scalar_lea.vmem %s6540_s29, %s4804_s17  ;;  %s6544_s27 = sld [smem:[#allocation39_spill]] (!%p6542_p7) }
 0x14c   : > { %s5940_s16 = scalar_lea.vmem %s6541_s28, %s4282_s10 }
 0x14d   : > { %vm977_vm0 = vcmask 261120   ;;  %vm982_vm1 = vcmask 523264  }
 0x14f   : > { %v975_v0 = vld [vmem:[%s6543_s7] sm:$0xff]  ;;  %v976_v1 = vld [vmem:[%s6543_s7 + $0x8] sm:$0xff] }
 0x150   : > { %v980_v2 = vld [vmem:[%s6544_s27] sm:$0xff]  ;;  %978 = vst.msk [vmem:[#allocation2] sm:$0xff] %vm977_vm0, %v975_v0  ;;  %979 = vst.msk [vmem:[#allocation2 + $0x8] sm:$0xff] %vm977_vm0, %v976_v1  ;;  %v981_v3 = vld [vmem:[%s6544_s27 + $0x8] sm:$0xff] }
 0x151   : > { %983 = vst.msk [vmem:[#allocation3] sm:$0xff] %vm982_vm1, %v980_v2  ;;  %984 = vst.msk [vmem:[#allocation3 + $0x8] sm:$0xff] %vm982_vm1, %v981_v3 }
 0x152 PF: > { %vm1027_vm2 = vcmask 261120   ;;  %v993_v18 = vld [vmem:[%s5882_s0 + $0x18] sm:$0xff]  ;;  %v992_v19 = vld [vmem:[%s5882_s0 + $0x10] sm:$0xff]  ;;  %v991_v20 = vld [vmem:[%s5882_s0 + $0x8] sm:$0xff]  ;;  %v1055_v28 = vlaneseq  ;;  %v5385_v51 = vmov 0.0   ;;  %vm5386_vm3 = vmmov 0  }
 0x153   : > { %4530 = vmatprep.subr.mxu0 %v993_v18  ;;  %v990_v21 = vld [vmem:[%s5882_s0] sm:$0xff]  ;;  %v997_v22 = vld [vmem:[%s5882_s0 + $0x38] sm:$0xff]  ;;  %v996_v44 = vld [vmem:[%s5882_s0 + $0x30] sm:$0xff]  ;;  %4563 = vmatprep.subr.mxu1 %v5385_v51  ;;  %vm1310_vm4 = vcmask 130048   ;;  %s6545_s21 = sld [smem:[#allocation40_spill]]  ;;  %vm1467_vm5 = vcmask 64512  }
 0x154   : > { %4531 = vmatpush3.msra.mxu0 %v993_v18  ;;  %v5973_v30 = vshrl.u32 %v1055_v28, 7  ;;  %v5979_v32 = vld [vmem:[%s5875_s18] sm:$0xff]  ;;  %v995_v45 = vld [vmem:[%s5882_s0 + $0x28] sm:$0xff]  ;;  %v1001_v47 = vld [vmem:[%s5882_s0 + $0x58] sm:$0xff]  ;;  %4565 = vmatprep.mubr.msk.f32.mxu1 %vm5386_vm3, %v5385_v51  ;;  %s5387_s10 = smov 112   ;;  %vm2451_vm6 = vcmask 523264  }
 0x155   : > { %4532 = vmatprep.subr.mxu0 %v992_v19  ;;  %v994_v46 = vld [vmem:[%s5882_s0 + $0x20] sm:$0xff]  ;;  %v1000_v48 = vld [vmem:[%s5882_s0 + $0x50] sm:$0xff]  ;;  %v999_v49 = vld [vmem:[%s5882_s0 + $0x48] sm:$0xff]  ;;  %s6546_s26 = sld [smem:[#allocation45_spill]] }
 0x156   : > { %4533 = vmatpush3.msra.mxu0 %v992_v19  ;;  %v5976_v31 = vsub.s32 0, %v5973_v30  ;;  %v5982_v33 = vsub.s32 1, %v5973_v30  ;;  %v998_v50 = vld [vmem:[%s5882_s0 + $0x40] sm:$0xff]  ;;  %v1154_v53 = vsub.s32 5, %v5973_v30  ;;  %v1069_v55 = vsub.s32 4, %v5973_v30 }
 0x157   : > { %v5956_v4 = vld [vmem:[#allocation2] sm:$0xff]  ;;  %v5958_v5 = vld [vmem:[#allocation2 + $0x8] sm:$0xff]  ;;  %4534 = vmatprep.subr.mxu0 %v991_v20  ;;  %v1233_v60 = vsub.s32 6, %v5973_v30 }
 0x158   : > { %v1028_v6 = vsel %vm1027_vm2, %v5956_v4, 0.0  ;;  %v1031_v7 = vsel %vm1027_vm2, %v5958_v5, 0.0  ;;  %4535 = vmatpush3.msra.mxu0 %v991_v20  ;;  %v1058_v34 = vrot.slane %v5979_v32, %v5976_v31  ;;  %v1064_v37 = vrot.slane %v5979_v32, %v5982_v33 }
 0x159   : > { %1029 = vadd.xlane.f32.xlu0 %v1028_v6  ;;  %4536 = vmatprep.subr.mxu0 %v990_v21  ;;  %v1155_v57 = vrot.slane %v5979_v32, %v1154_v53  ;;  %v1070_v61 = vrot.slane %v5979_v32, %v1069_v55  ;;  %v1234_v0 = vrot.slane %v5979_v32, %v1233_v60 }
 0x15a   : > { %4537 = vmatpush3.msra.mxu0 %v990_v21 }
 0x15b   : > { %4541 = vmatprep.subr.mxu0 %v997_v22  ;;  %s6547_s29 = scalar_lea.vmem %s6546_s26, %s5918_s24 }
 0x15d   : > { %1032 = vadd.xlane.f32.xlu0 %v1031_v7 }
 0x1e2   : > { %v1030_v8 = vpop.xlane.xlu0 %1029 }
 0x1e3   : > { %v1035_v9 = vmul.f32 0.03125, %v1030_v8 }
 0x1e5   : > { %v1037_v10 = vsub.f32 %v5956_v4, %v1035_v9  ;;  %v6040_v9 = vld [vmem:[%s6545_s21] sm:$0xff] }
 0x1e6   : > { %v1033_v11 = vpop.xlane.xlu0 %1032 }
 0x1e7   : > { %v1036_v12 = vmul.f32 0.03125, %v1033_v11  ;;  %v1039_v13 = vmul.f32 %v1037_v10, %v1037_v10 }
 0x1e9   : > { %v1038_v14 = vsub.f32 %v5958_v5, %v1036_v12  ;;  %v1041_v15 = vsel %vm1027_vm2, %v1039_v13, 0.0 }
 0x1ea   : > { %1042 = vadd.xlane.f32.xlu1 %v1041_v15 }
 0x1eb   : > { %v1040_v16 = vmul.f32 %v1038_v14, %v1038_v14 }
 0x1ed   : > { %v1044_v17 = vsel %vm1027_vm2, %v1040_v16, 0.0 }
 0x1ee   : > { %1045 = vadd.xlane.f32.xlu1 %v1044_v17 }
 0x273   : > { %v1043_v23 = vpop.xlane.xlu1 %1042 }
 0x274   : > { %v1047_v24 = vmul.f32 0.03125, %v1043_v23 }
 0x276   : > { %v1049_v25 = vadd.f32 1e-05, %v1047_v24 }
 0x277   : > { %v1046_v26 = vpop.xlane.xlu1 %1045 }
 0x278   : > { %4919 = vrsqrt.f32 %v1049_v25  ;;  %v1048_v27 = vmul.f32 0.03125, %v1046_v26 }
 0x27a   : > { %v1050_v29 = vadd.f32 1e-05, %v1048_v27 }
 0x27c   : > { %4921 = vrsqrt.f32 %v1050_v29 }
 0x285   : > { %v4920_v35 = vpop.eup %4919 }
 0x286   : > { %v1053_v36 = vmul.f32 %v4920_v35, %v1037_v10 }
 0x288   : > { %v1059_v38 = vmul.f32 %v1058_v34, %v1053_v36 }
 0x289   : > { %v4922_v39 = vpop.eup %4921 }
 0x28a   : > { %v1065_v40 = vadd.f32 %v1064_v37, %v1059_v38  ;;  %v1054_v41 = vmul.f32 %v4922_v39, %v1038_v14 }
 0x28c   : > { %4538 = vmatprep.mubr.msk.f32.mxu0 %vm1027_vm2, %v1065_v40  ;;  %v1060_v42 = vmul.f32 %v1058_v34, %v1054_v41 }
 0x28e   : > { %v1066_v43 = vadd.f32 %v1064_v37, %v1060_v42 }
 0x290   : > { %4539 = vmatmul.mubr.msk.f32.vlgmr.msra.gmra.mxu0 %vm1027_vm2, %v1066_v43 }
 0x291   : > { %4542 = vmatpush3.msra.mxu0 %v997_v22  ;;  %4549 = vmatprep.mubr.msk.f32.mxu0 %vm1027_vm2, %v1065_v40 }
 0x292   : > { %4543 = vmatprep.subr.mxu0 %v996_v44 }
 0x293   : > { %4544 = vmatpush3.msra.mxu0 %v996_v44 }
 0x294   : > { %4545 = vmatprep.subr.mxu0 %v995_v45 }
 0x295   : > { %4546 = vmatpush3.msra.mxu0 %v995_v45 }
 0x296   : > { %4547 = vmatprep.subr.mxu0 %v994_v46 }
 0x297   : > { %4548 = vmatpush3.msra.mxu0 %v994_v46 }
 0x298   : > { %4550 = vmatmul.mubr.msk.f32.vlgmr.msra.gmra.mxu0 %vm1027_vm2, %v1066_v43  ;;  %4552 = vmatprep.subr.mxu0 %v1001_v47 }
 0x299   : > { %4553 = vmatpush3.msra.mxu0 %v1001_v47  ;;  %4560 = vmatprep.mubr.msk.f32.mxu0 %vm1027_vm2, %v1065_v40 }
 0x29a   : > { %4554 = vmatprep.subr.mxu0 %v1000_v48 }
 0x29b   : > { %4555 = vmatpush3.msra.mxu0 %v1000_v48 }
 0x29c   : > { %4556 = vmatprep.subr.mxu0 %v999_v49 }
 0x29d   : > { %4557 = vmatpush3.msra.mxu0 %v999_v49 }
 0x29e   : > { %4558 = vmatprep.subr.mxu0 %v998_v50 }
 0x29f   : > { %4559 = vmatpush3.msra.mxu0 %v998_v50 }
 0x2a0   : > { %4561 = vmatmul.mubr.msk.f32.vlgmr.msra.gmra.mxu0 %vm1027_vm2, %v1066_v43  ;;  %4573 = vmatprep.subr.mxu0 %v5385_v51 }
 0x2a1   : > { %4575 = vmatprep.mubr.msk.f32.mxu0 %vm5386_vm3, %v5385_v51 }
 0x350   : > { %v4540_v52 = vpop.f32.mrf.mxu0 }
 0x351   : > { %v1149_v2 = vadd.f32 %v4540_v52, %v1070_v61 }
 0x352   : > { %v1143_v54 = vpop.f32.mrf.mxu0 }
 0x353   : > { %v1144_v62 = vadd.f32 %v1143_v54, %v1070_v61 }
 0x358   : > { %v4551_v56 = vpop.f32.mrf.mxu0 }
 0x359   : > { %v1228_v63 = vadd.f32 %v4551_v56, %v1155_v57 }
 0x35a   : > { %v1222_v58 = vpop.f32.mrf.mxu0 }
 0x35b   : > { %v1223_v59 = vadd.f32 %v1222_v58, %v1155_v57 }
 0x35d   : > { %4564 = vmatpush3.xpose.msk.msra.mxu1 %vm1310_vm4, %v1223_v59 }
 0x35e   : > { %4568 = vmatprep.subr.mxu1 %v5385_v51 }
 0x360   : > { %v4562_v1 = vpop.f32.mrf.mxu0  ;;  %4566 = vmatmul.mubr.msk.f32.vlgmr.msra.gmra.mxu1 %vm1310_vm4, %v1144_v62 }
 0x361   : > { %4569 = vmatpush3.xpose.msk.msra.mxu1 %vm1310_vm4, %v1228_v63  ;;  %4570 = vmatprep.mubr.msk.f32.mxu1 %vm5386_vm3, %v5385_v51  ;;  %v6026_v6 = vadd.f32 %v4562_v1, %v1234_v0 }
 0x362   : > { %v1301_v3 = vpop.f32.mrf.mxu0  ;;  %4578 = vmatprep.subr.mxu1 %v5385_v51 }
 0x363   : > { %v6028_v7 = vadd.f32 %v1301_v3, %v1234_v0 }
 0x364   : > { %4571 = vmatmul.mubr.msk.f32.vlgmr.msra.gmra.mxu1 %vm1310_vm4, %v1149_v2 }
 0x365   : > { %4574 = vmatpush3.msra.mxu0 %v6028_v7  ;;  %4579 = vmatpush3.msra.mxu1 %v6026_v6 }
 0x366   : > { %4583 = vmatprep.subr.mxu0 %v5385_v51  ;;  %4580 = vmatprep.mubr.msk.f32.mxu1 %vm5386_vm3, %v5385_v51 }
 0x367   : > { %4588 = vmatprep.subr.mxu1 %v5385_v51 }
 0x420   : > { %v1383_v8 = vpop.f32.mrf.mxu1 }
 0x421   : > { %v1463_v10 = vmul.f32 0.25, %v1383_v8 }
 0x422   : > { %v4567_v11 = vpop.f32.mrf.mxu1 }
 0x423   : > { %v1465_v12 = vadd.f32 %v1463_v10, %v6040_v9 }
 0x424   : > { %v1459_v13 = vpop.f32.mrf.mxu1 }
 0x425   : > { %v1464_v14 = vmul.f32 0.25, %v1459_v13  ;;  %v1468_v15 = vsel %vm1467_vm5, %v1465_v12, -inf }
 0x426   : > { %v4572_v16 = vpop.f32.mrf.mxu1  ;;  %1469 = vmax.xlane.f32.xlu0 %v1468_v15 }
 0x427   : > { %v1466_v17 = vadd.f32 %v1464_v14, %v6040_v9 }
 0x429   : > { %v1471_v18 = vsel %vm1467_vm5, %v1466_v17, -inf }
 0x42a   : > { %1472 = vmax.xlane.f32.xlu1 %v1471_v18 }
 0x43b   : > { %1716 = vrot.lane.b32.xlu1 %v1228_v63, %s5387_s10 }
 0x43f   : > { %1636 = vrot.lane.b32.xlu1 %v1144_v62, %s5387_s10 }
 0x4af   : > { %v1470_v19 = vpop.xlane.xlu0 %1469 }
 0x4b0   : > { %v1474_v20 = vsub.f32 %v1465_v12, %v1470_v19 }
 0x4b2   : > { %v1476_v21 = vmul.f32 1.442695, %v1474_v20  ;;  %v1002_v20 = vld [vmem:[%s5888_s14] sm:$0xff] }
 0x4b3   : > { %v1473_v22 = vpop.xlane.xlu1 %1472 }
 0x4b4   : > { %4923 = vpow2.f32 %v1476_v21  ;;  %v1475_v23 = vsub.f32 %v1466_v17, %v1473_v22  ;;  %v1004_v21 = vld [vmem:[%s5888_s14 + $0x10] sm:$0xff] }
 0x4b6   : > { %v1478_v24 = vmul.f32 1.442695, %v1475_v23 }
 0x4b7   : > { %v1717_v29 = vpop.permute.xlu1 %1716 }
 0x4b8   : > { %4925 = vpow2.f32 %v1478_v24 }
 0x4bb   : > { %v1637_v34 = vpop.permute.xlu1 %1636 }
 0x4c1   : > { %v4924_v25 = vpop.eup %4923 }
 0x4c2   : > { %v1480_v26 = vsel %vm1467_vm5, %v4924_v25, 0.0 }
 0x4c3   : > { %1481 = vadd.xlane.f32.xlu0 %v1480_v26  ;;  %v2138_v26 = vsub.s32 7, %v5973_v30 }
 0x4c5   : > { %v4926_v27 = vpop.eup %4925 }
 0x4c6   : > { %v1483_v28 = vsel %vm1467_vm5, %v4926_v27, 0.0 }
 0x4c7   : > { %1484 = vadd.xlane.f32.xlu1 %v1483_v28 }
 0x4d8   : > { %1714 = vrot.lane.b32.xlu1 %v1149_v2, %s5387_s10 }
 0x4d9   : > { %1638 = vrot.lane.b32.xlu0 %v1223_v59, %s5387_s10 }
 0x54c   : > { %v1482_v35 = vpop.xlane.xlu0 %1481 }
 0x54d   : > { %4927 = vrcp.f32 %v1482_v35 }
 0x550   : > { %v1485_v36 = vpop.xlane.xlu1 %1484  ;;  %v1639_v39 = vpop.permute.xlu0 %1638 }
 0x551   : > { %4929 = vrcp.f32 %v1485_v36 }
 0x554   : > { %v1715_v42 = vpop.permute.xlu1 %1714 }
 0x55a   : > { %v4928_v37 = vpop.eup %4927 }
 0x55b   : > { %v1488_v38 = vmul.f32 %v4928_v37, %v4924_v25 }
 0x55d   : > { %4576 = vmatmul.mubr.msk.f32.vlgmr.msra.gmra.mxu0 %vm1467_vm5, %v1488_v38 }
 0x55e   : > { %v4930_v40 = vpop.eup %4929  ;;  %4584 = vmatpush3.xpose.msk.msra.mxu0 %vm1310_vm4, %v1639_v39  ;;  %4585 = vmatprep.mubr.msk.f32.mxu0 %vm5386_vm3, %v5385_v51 }
 0x55f   : > { %v1489_v41 = vmul.f32 %v4930_v40, %v4926_v27  ;;  %4593 = vmatprep.subr.mxu0 %v5385_v51 }
 0x561   : > { %4581 = vmatmul.mubr.msk.f32.vlgmr.msra.gmra.mxu1 %vm1467_vm5, %v1489_v41  ;;  %4586 = vmatmul.mubr.msk.f32.vlgmr.msra.gmra.mxu0 %vm1310_vm4, %v1637_v34  ;;  %v2139_v34 = vrot.slane %v5979_v32, %v2138_v26  ;;  %v6096_v41 = vld [vmem:[#allocation3] sm:$0xff] }
 0x562   : > { %4589 = vmatpush3.xpose.msk.msra.mxu1 %vm1310_vm4, %v1717_v29  ;;  %4590 = vmatprep.mubr.msk.f32.mxu1 %vm5386_vm3, %v5385_v51 }
 0x563   : > { %4598 = vmatprep.subr.mxu1 %v5385_v51  ;;  %4595 = vmatprep.mubr.msk.f32.mxu0 %vm5386_vm3, %v5385_v51 }
 0x565   : > { %4591 = vmatmul.mubr.msk.f32.vlgmr.msra.gmra.mxu1 %vm1310_vm4, %v1715_v42 }
 0x566   : > { %4600 = vmatprep.mubr.msk.f32.mxu1 %vm5386_vm3, %v5385_v51 }
 0x61d   : > { %v1559_v43 = vpop.f32.mrf.mxu0 }
 0x61f   : > { %v4577_v44 = vpop.f32.mrf.mxu0 }
 0x620   : > { %v6102_v44 = vld [vmem:[#allocation3 + $0x8] sm:$0xff] }
 0x621   : > { %v1632_v45 = vpop.f32.mrf.mxu1  ;;  %v1710_v46 = vpop.f32.mrf.mxu0 }
 0x622   : > { %v1792_v47 = vmul.f32 0.25, %v1710_v46 }
 0x623   : > { %v4582_v48 = vpop.f32.mrf.mxu1  ;;  %v4587_v49 = vpop.f32.mrf.mxu0 }
 0x624   : > { %v1794_v50 = vadd.f32 %v1792_v47, %v6040_v9 }
 0x625   : > { %v1788_v52 = vpop.f32.mrf.mxu1 }
 0x626   : > { %v1793_v54 = vmul.f32 0.25, %v1788_v52  ;;  %v1796_v56 = vsel %vm1467_vm5, %v1794_v50, -inf }
 0x627   : > { %v4592_v57 = vpop.f32.mrf.mxu1  ;;  %1797 = vmax.xlane.f32.xlu0 %v1796_v56 }
 0x628   : > { %v1795_v58 = vadd.f32 %v1793_v54, %v6040_v9 }
 0x62a   : > { %v1799_v59 = vsel %vm1467_vm5, %v1795_v58, -inf }
 0x62b   : > { %1800 = vmax.xlane.f32.xlu1 %v1799_v59 }
 0x63c   : > { %1896 = vrot.lane.b32.xlu1 %v6026_v6, %s5387_s10  ;;  %v1003_v6 = vld [vmem:[%s5888_s14 + $0x8] sm:$0xff] }
 0x6b0   : > { %v1798_v61 = vpop.xlane.xlu0 %1797 }
 0x6b1   : > { %v1802_v62 = vsub.f32 %v1794_v50, %v1798_v61 }
 0x6b3   : > { %v1804_v63 = vmul.f32 1.442695, %v1802_v62 }
 0x6b4   : > { %v1801_v0 = vpop.xlane.xlu1 %1800 }
 0x6b5   : > { %4931 = vpow2.f32 %v1804_v63  ;;  %v1803_v1 = vsub.f32 %v1795_v58, %v1801_v0 }
 0x6b7   : > { %v1806_v2 = vmul.f32 1.442695, %v1803_v1 }
 0x6b8   : > { %v1897_v3 = vpop.permute.xlu1 %1896 }
 0x6b9   : > { %4933 = vpow2.f32 %v1806_v2  ;;  %4599 = vmatpush3.msra.mxu1 %v1897_v3 }
 0x6ba   : > { %4610 = vmatprep.subr.mxu1 %v1003_v6 }
 0x6c2   : > { %v4932_v8 = vpop.eup %4931 }
 0x6c3   : > { %v1808_v10 = vsel %vm1467_vm5, %v4932_v8, 0.0 }
 0x6c4   : > { %1809 = vadd.xlane.f32.xlu0 %v1808_v10 }
 0x6c6   : > { %v4934_v11 = vpop.eup %4933 }
 0x6c7   : > { %v1811_v12 = vsel %vm1467_vm5, %v4934_v11, 0.0 }
 0x6c8   : > { %1812 = vadd.xlane.f32.xlu0 %v1811_v12  ;;  %v1008_v12 = vld [vmem:[%s5890_s5 + $0x10] sm:$0xff] }
 0x6de   : > { %1819 = vrot.lane.b32.xlu0 %v6028_v7, %s5387_s10  ;;  %v1005_v7 = vld [vmem:[%s5888_s14 + $0x18] sm:$0xff] }
 0x74d   : > { %v1810_v13 = vpop.xlane.xlu0 %1809 }
 0x74e   : > { %4935 = vrcp.f32 %v1810_v13  ;;  %v1006_v13 = vld [vmem:[%s5890_s5] sm:$0xff] }
 0x751   : > { %v1813_v14 = vpop.xlane.xlu0 %1812 }
 0x752   : > { %4937 = vrcp.f32 %v1813_v14  ;;  %v2377_v14 = vld [vmem:[%s5935_s25 + $0x38] sm:$0xff] }
 0x755   : > { %v1820_v15 = vpop.permute.xlu0 %1819 }
 0x756   : > { %4594 = vmatpush3.msra.mxu0 %v1820_v15 }
 0x757   : > { %4603 = vmatprep.subr.mxu0 %v1005_v7 }
 0x75b   : > { %v4936_v16 = vpop.eup %4935 }
 0x75c   : > { %v1816_v17 = vmul.f32 %v4936_v16, %v4932_v8 }
 0x75e   : > { %4596 = vmatmul.mubr.msk.f32.vlgmr.msra.gmra.mxu0 %vm1467_vm5, %v1816_v17 }
 0x75f   : > { %v4938_v18 = vpop.eup %4937  ;;  %4604 = vmatpush3.msra.mxu0 %v1005_v7 }
 0x760   : > { %v1817_v19 = vmul.f32 %v4938_v18, %v4934_v11  ;;  %4605 = vmatprep.subr.mxu0 %v1004_v21  ;;  %v1009_v11 = vld [vmem:[%s5890_s5 + $0x18] sm:$0xff] }
 0x761   : > { %4606 = vmatpush3.msra.mxu0 %v1004_v21 }
 0x762   : > { %4601 = vmatmul.mubr.msk.f32.vlgmr.msra.gmra.mxu1 %vm1467_vm5, %v1817_v19  ;;  %4617 = vmatprep.subr.mxu0 %v1009_v11 }
 0x763   : > { %4611 = vmatpush3.msra.mxu1 %v1003_v6  ;;  %4614 = vmatprep.mubr.msk.f32.mxu1 %vm1310_vm4, %v1559_v43  ;;  %v1007_v6 = vld [vmem:[%s5890_s5 + $0x8] sm:$0xff] }
 0x764   : > { %4612 = vmatprep.subr.mxu1 %v1002_v20 }
 0x765   : > { %4613 = vmatpush3.msra.mxu1 %v1002_v20 }
 0x766   : > { %4615 = vmatmul.mubr.msk.f32.vlgmr.msra.gmra.mxu1 %vm1310_vm4, %v1632_v45 }
 0x81e   : > { %v1891_v22 = vpop.f32.mrf.mxu0 }
 0x81f   : > { %4607 = vmatprep.mubr.msk.f32.mxu0 %vm1310_vm4, %v1891_v22 }
 0x820   : > { %v4597_v23 = vpop.f32.mrf.mxu0 }
 0x822   : > { %v1968_v24 = vpop.f32.mrf.mxu1 }
 0x823   : > { %4608 = vmatmul.mubr.msk.f32.vlgmr.msra.gmra.mxu0 %vm1310_vm4, %v1968_v24 }
 0x824   : > { %v4602_v25 = vpop.f32.mrf.mxu1  ;;  %4618 = vmatpush3.msra.mxu0 %v1009_v11  ;;  %v2381_v11 = vld [vmem:[%s5935_s25 + $0x58] sm:$0xff] }
 0x825   : > { %4619 = vmatprep.subr.mxu0 %v1008_v12 }
 0x826   : > { %v4616_v27 = vpop.f32.mrf.mxu1  ;;  %4620 = vmatpush3.msra.mxu0 %v1008_v12  ;;  %v2380_v12 = vld [vmem:[%s5935_s25 + $0x50] sm:$0xff] }
 0x827   : > { %4621 = vmatprep.subr.mxu0 %v1007_v6 }
 0x828   : > { %v2125_v35 = vpop.f32.mrf.mxu1  ;;  %4622 = vmatpush3.msra.mxu0 %v1007_v6  ;;  %v2379_v6 = vld [vmem:[%s5935_s25 + $0x48] sm:$0xff] }
 0x829   : > { %4623 = vmatprep.subr.mxu0 %v1006_v13 }
 0x82a   : > { %4624 = vmatpush3.msra.mxu0 %v1006_v13  ;;  %v2378_v13 = vld [vmem:[%s5935_s25 + $0x40] sm:$0xff] }
 0x82b   : > { %4663 = vmatprep.subr.mxu0 %v2377_v14 }
 0x8e3   : > { %v4609_v28 = vpop.f32.mrf.mxu0 }
 0x8e4   : > { %v2131_v29 = vadd.f32 %v4616_v27, %v4609_v28  ;;  %v2170_v27 = vsub.s32 2, %v5973_v30 }
 0x8e5   : > { %v2044_v36 = vpop.f32.mrf.mxu0 }
 0x8e6   : > { %v2135_v37 = vadd.f32 %v2131_v29, %v5958_v5  ;;  %v2126_v38 = vadd.f32 %v2125_v35, %v2044_v36  ;;  %v2452_v5 = vsel %vm2451_vm6, %v6096_v41, 0.0  ;;  %v2171_v29 = vrot.slane %v5979_v32, %v2170_v27 }
 0x8e8   : > { %v6093_v39 = vadd.f32 %v2139_v34, %v2135_v37  ;;  %v2134_v40 = vadd.f32 %v2126_v38, %v5956_v4  ;;  %v2455_v4 = vsel %vm2451_vm6, %v6102_v44, 0.0  ;;  %v6133_v37 = vld [vmem:[%s5928_s1] sm:$0xff] }
 0x8ea   : > { %v6098_v42 = vadd.f32 %v2139_v34, %v2134_v40  ;;  %v2145_v43 = vsel %vm1027_vm2, %v6093_v39, 0.0  ;;  %v2176_v34 = vsub.s32 3, %v5973_v30  ;;  %v2450_v30 = vld [vmem:[%s5906_s19 + $0xf8] sm:$0xff] }
 0x8eb   : > { %2146 = vadd.xlane.f32.xlu0 %v2145_v43 }
 0x8ec   : > { %v2142_v45 = vsel %vm1027_vm2, %v6098_v42, 0.0  ;;  %v2177_v43 = vrot.slane %v5979_v32, %v2176_v34  ;;  %v2375_v32 = vld [vmem:[%s5935_s25 + $0x28] sm:$0xff] }
 0x8ed   : > { %2143 = vadd.xlane.f32.xlu1 %v2142_v45 }
 0x8ef   : > { %2453 = vadd.xlane.f32.xlu0 %v2452_v5  ;;  %v2482_v5 = vrot.slane %v6133_v37, %v5976_v31 }
 0x8f1   : > { %2456 = vadd.xlane.f32.xlu1 %v2455_v4 }
 0x974   : > { %v2147_v46 = vpop.xlane.xlu0 %2146 }
 0x975   : > { %v2149_v47 = vmul.f32 0.03125, %v2147_v46 }
 0x976   : > { %v2144_v48 = vpop.xlane.xlu1 %2143 }
 0x977   : > { %v2151_v49 = vsub.f32 %v6093_v39, %v2149_v47  ;;  %v2148_v50 = vmul.f32 0.03125, %v2144_v48  ;;  %v2488_v48 = vrot.slane %v6133_v37, %v5982_v33 }
 0x978   : > { %v2454_v52 = vpop.xlane.xlu0 %2453 }
 0x979   : > { %v2150_v54 = vsub.f32 %v6098_v42, %v2148_v50  ;;  %v2459_v56 = vmul.f32 0.015625, %v2454_v52  ;;  %v2153_v57 = vmul.f32 %v2151_v49, %v2151_v49  ;;  %v2376_v50 = vld [vmem:[%s5935_s25 + $0x30] sm:$0xff] }
 0x97a   : > { %v2457_v58 = vpop.xlane.xlu1 %2456 }
 0x97b   : > { %v2461_v59 = vsub.f32 %v6096_v41, %v2459_v56  ;;  %v2460_v61 = vmul.f32 0.015625, %v2457_v58  ;;  %v2157_v62 = vsel %vm1027_vm2, %v2153_v57, 0.0  ;;  %v2152_v63 = vmul.f32 %v2150_v54, %v2150_v54  ;;  %v2374_v57 = vld [vmem:[%s5935_s25 + $0x20] sm:$0xff]  ;;  %v2373_v58 = vld [vmem:[%s5935_s25 + $0x18] sm:$0xff] }
 0x97c   : > { %2158 = vadd.xlane.f32.xlu1 %v2157_v62  ;;  %v2371_v62 = vld [vmem:[%s5935_s25 + $0x8] sm:$0xff] }
 0x97d   : > { %v6115_v0 = vsub.f32 %v6102_v44, %v2460_v61  ;;  %v2154_v1 = vsel %vm1027_vm2, %v2152_v63, 0.0  ;;  %v2463_v2 = vmul.f32 %v2461_v59, %v2461_v59  ;;  %v2372_v61 = vld [vmem:[%s5935_s25 + $0x10] sm:$0xff] }
 0x97e   : > { %2155 = vadd.xlane.f32.xlu0 %v2154_v1  ;;  %v2370_v1 = vld [vmem:[%s5935_s25] sm:$0xff] }
 0x97f   : > { %v2465_v3 = vsel %vm2451_vm6, %v2463_v2, 0.0  ;;  %v2464_v8 = vmul.f32 %v6115_v0, %v6115_v0  ;;  %v2385_v2 = vld [vmem:[%s5935_s25 + $0x78] sm:$0xff] }
 0x981   : > { %v2468_v10 = vsel %vm2451_vm6, %v2464_v8, 0.0  ;;  %v2383_v8 = vld [vmem:[%s5935_s25 + $0x68] sm:$0xff] }
 0x982   : > { %2466 = vadd.xlane.f32.xlu0 %v2465_v3  ;;  %2469 = vadd.xlane.f32.xlu1 %v2468_v10  ;;  %v2382_v10 = vld [vmem:[%s5935_s25 + $0x60] sm:$0xff] }
 0xa05   : > { %v2159_v15 = vpop.xlane.xlu1 %2158 }
 0xa06   : > { %v2161_v16 = vmul.f32 0.03125, %v2159_v15  ;;  %v1025_v15 = vld [vmem:[%s5896_s2 + $0x70] sm:$0xff] }
 0xa07   : > { %v2156_v17 = vpop.xlane.xlu0 %2155 }
 0xa08   : > { %v2163_v18 = vadd.f32 1e-05, %v2161_v16  ;;  %v2160_v19 = vmul.f32 0.03125, %v2156_v17  ;;  %v1024_v16 = vld [vmem:[%s5896_s2 + $0x68] sm:$0xff]  ;;  %v1023_v17 = vld [vmem:[%s5896_s2 + $0x60] sm:$0xff] }
 0xa0a   : > { %4939 = vrsqrt.f32 %v2163_v18  ;;  %v2162_v20 = vadd.f32 1e-05, %v2160_v19  ;;  %v1022_v18 = vld [vmem:[%s5896_s2 + $0x58] sm:$0xff]  ;;  %v1021_v19 = vld [vmem:[%s5896_s2 + $0x50] sm:$0xff] }
 0xa0b   : > { %v2467_v7 = vpop.xlane.xlu0 %2466  ;;  %v2470_v22 = vpop.xlane.xlu1 %2469 }
 0xa0c   : > { %4941 = vrsqrt.f32 %v2162_v20  ;;  %v2471_v21 = vmul.f32 0.015625, %v2467_v7  ;;  %v2472_v24 = vmul.f32 0.015625, %v2470_v22  ;;  %v1020_v20 = vld [vmem:[%s5896_s2 + $0x48] sm:$0xff]  ;;  %v1019_v7 = vld [vmem:[%s5896_s2 + $0x40] sm:$0xff]  ;;  %v1017_v22 = vld [vmem:[%s5896_s2 + $0x30] sm:$0xff] }
 0xa0e   : > { %v2473_v23 = vadd.f32 1e-05, %v2471_v21  ;;  %v2474_v25 = vadd.f32 1e-05, %v2472_v24  ;;  %v1018_v21 = vld [vmem:[%s5896_s2 + $0x38] sm:$0xff]  ;;  %v1015_v24 = vld [vmem:[%s5896_s2 + $0x20] sm:$0xff] }
 0xa10   : > { %4943 = vrsqrt.f32 %v2473_v23  ;;  %v1016_v23 = vld [vmem:[%s5896_s2 + $0x28] sm:$0xff] }
 0xa11   : > { %4945 = vrsqrt.f32 %v2474_v25  ;;  %v1014_v25 = vld [vmem:[%s5896_s2 + $0x18] sm:$0xff] }
 0xa17   : > { %v4940_v28 = vpop.eup %4939 }
 0xa18   : > { %v2167_v35 = vmul.f32 %v4940_v28, %v2151_v49  ;;  %v1013_v28 = vld [vmem:[%s5896_s2 + $0x10] sm:$0xff] }
 0xa19   : > { %v4942_v36 = vpop.eup %4941 }
 0xa1a   : > { %v2166_v38 = vmul.f32 %v4942_v36, %v2150_v54  ;;  %v2173_v40 = vmul.f32 %v2171_v29, %v2167_v35  ;;  %v1011_v35 = vld [vmem:[%s5896_s2] sm:$0xff]  ;;  %v2393_v36 = vld [vmem:[%s5935_s25 + $0xb8] sm:$0xff] }
 0xa1c   : > { %v2172_v45 = vmul.f32 %v2171_v29, %v2166_v38  ;;  %v2179_v49 = vadd.f32 %v2177_v43, %v2173_v40  ;;  %v1012_v29 = vld [vmem:[%s5896_s2 + $0x8] sm:$0xff]  ;;  %v4306_v38 = vld [vmem:[%s6547_s29] ss:$0 sm:$0xff] }
 0xa1d   : > { %v4944_v4 = vpop.eup %4943 }
 0xa1e   : > { %v2178_v46 = vadd.f32 %v2177_v43, %v2172_v45  ;;  %v2477_v47 = vmul.f32 %v4944_v4, %v2461_v59  ;;  %v4946_v56 = vpop.eup %4945 }
 0xa1f   : > { %v2478_v59 = vmul.f32 %v4946_v56, %v6115_v0  ;;  %v2384_v0 = vld [vmem:[%s5935_s25 + $0x70] sm:$0xff] }
 0xa20   : > { %4625 = vmatprep.mubr.msk.f32.mxu0 %vm1027_vm2, %v2178_v46  ;;  %v2483_v52 = vmul.f32 %v2482_v5, %v2477_v47 }
 0xa21   : > { %4626 = vmatmul.mubr.msk.f32.vlgmr.msra.gmra.mxu0 %vm1027_vm2, %v2179_v49  ;;  %v2484_v63 = vmul.f32 %v2482_v5, %v2478_v59  ;;  %v2579_v59 = vrot.slane %v6133_v37, %v1154_v53 }
 0xa22   : > { %4664 = vmatpush3.msra.mxu0 %v2377_v14  ;;  %v6146_v54 = vadd.f32 %v2488_v48, %v2483_v52  ;;  %v1026_v14 = vld [vmem:[%s5896_s2 + $0x78] sm:$0xff]  ;;  %s6548_s2 = sld [smem:[#allocation34_spill]] }
 0xa23   : > { %4665 = vmatprep.subr.mxu0 %v2376_v50  ;;  %v6157_v3 = vadd.f32 %v2488_v48, %v2484_v63  ;;  %4628 = vmatprep.subr.mxu1 %v1026_v14  ;;  %v2494_v63 = vrot.slane %v6133_v37, %v1069_v55  ;;  %v2392_v55 = vld [vmem:[%s5935_s25 + $0xb0] sm:$0xff] }
 0xa24   : > { %4666 = vmatpush3.msra.mxu0 %v2376_v50  ;;  %4679 = vmatprep.mubr.msk.f32.mxu0 %vm2451_vm6, %v6146_v54 }
 0xa25   : > { %4667 = vmatprep.subr.mxu0 %v2375_v32  ;;  %4629 = vmatpush3.msra.mxu1 %v1026_v14  ;;  %v2387_v14 = vld [vmem:[%s5935_s25 + $0x88] sm:$0xff] }
 0xa26   : > { %4668 = vmatpush3.msra.mxu0 %v2375_v32  ;;  %4630 = vmatprep.subr.mxu1 %v1025_v15 }
 0xa27   : > { %4669 = vmatprep.subr.mxu0 %v2374_v57  ;;  %4631 = vmatpush3.msra.mxu1 %v1025_v15  ;;  %v2386_v15 = vld [vmem:[%s5935_s25 + $0x80] sm:$0xff] }
 0xa28   : > { %4670 = vmatpush3.msra.mxu0 %v2374_v57  ;;  %4632 = vmatprep.subr.mxu1 %v1024_v16  ;;  %p4341_p8 = scmp.ne.s32.totalorder %s6548_s2, 1 }
 0xa29   : > { %4671 = vmatprep.subr.mxu0 %v2373_v58  ;;  %4633 = vmatpush3.msra.mxu1 %v1024_v16  ;;  %s6549_s28 = sld [smem:[#allocation53_spill]] (!%p4341_p8) }
 0xa2a   : > { %4672 = vmatpush3.msra.mxu0 %v2373_v58  ;;  %4634 = vmatprep.subr.mxu1 %v1023_v17  ;;  %s6550_s8 = sld [smem:[#allocation51_spill]] (!%p4341_p8) }
 0xa2b   : > { %4673 = vmatprep.subr.mxu0 %v2372_v61  ;;  %4635 = vmatpush3.msra.mxu1 %v1023_v17  ;;  %v4311_v17 = vld [vmem:[%s5875_s18 + $0x8] ss:$0 sm:$0xff]  ;;  %s5388_s18 = smov 96  }
 0xa2c   : > { %4674 = vmatpush3.msra.mxu0 %v2372_v61  ;;  %4636 = vmatprep.subr.mxu1 %v1022_v18 }
 0xa2d   : > { %4675 = vmatprep.subr.mxu0 %v2371_v62  ;;  %4637 = vmatpush3.msra.mxu1 %v1022_v18 }
 0xa2e   : > { %4676 = vmatpush3.msra.mxu0 %v2371_v62  ;;  %4638 = vmatprep.subr.mxu1 %v1021_v19 }
 0xa2f   : > { %4677 = vmatprep.subr.mxu0 %v2370_v1  ;;  %4639 = vmatpush3.msra.mxu1 %v1021_v19 }
 0xa30   : > { %4678 = vmatpush3.msra.mxu0 %v2370_v1  ;;  %4640 = vmatprep.subr.mxu1 %v1020_v20 }
 0xa31   : > { %4680 = vmatmul.mubr.msk.f32.vlgmr.msra.gmra.mxu0 %vm2451_vm6, %v6157_v3  ;;  %4682 = vmatprep.subr.mxu0 %v2385_v2 }
 0xa32   : > { %4683 = vmatpush3.msra.mxu0 %v2385_v2  ;;  %4698 = vmatprep.mubr.msk.f32.mxu0 %vm2451_vm6, %v6146_v54 }
 0xa33   : > { %4684 = vmatprep.subr.mxu0 %v2384_v0  ;;  %4641 = vmatpush3.msra.mxu1 %v1020_v20 }
 0xa34   : > { %4685 = vmatpush3.msra.mxu0 %v2384_v0  ;;  %4642 = vmatprep.subr.mxu1 %v1019_v7 }
 0xa35   : > { %4686 = vmatprep.subr.mxu0 %v2383_v8  ;;  %4643 = vmatpush3.msra.mxu1 %v1019_v7 }
 0xa36   : > { %4687 = vmatpush3.msra.mxu0 %v2383_v8  ;;  %4644 = vmatprep.subr.mxu1 %v1018_v21 }
 0xa37   : > { %4688 = vmatprep.subr.mxu0 %v2382_v10  ;;  %4645 = vmatpush3.msra.mxu1 %v1018_v21 }
 0xa38   : > { %4689 = vmatpush3.msra.mxu0 %v2382_v10  ;;  %4646 = vmatprep.subr.mxu1 %v1017_v22 }
 0xa39   : > { %4690 = vmatprep.subr.mxu0 %v2381_v11  ;;  %4647 = vmatpush3.msra.mxu1 %v1017_v22 }
 0xa3a   : > { %4691 = vmatpush3.msra.mxu0 %v2381_v11  ;;  %4648 = vmatprep.subr.mxu1 %v1016_v23 }
 0xa3b   : > { %4692 = vmatprep.subr.mxu0 %v2380_v12  ;;  %4649 = vmatpush3.msra.mxu1 %v1016_v23 }
 0xa3c   : > { %4693 = vmatpush3.msra.mxu0 %v2380_v12  ;;  %4650 = vmatprep.subr.mxu1 %v1015_v24  ;;  %v2391_v12 = vld [vmem:[%s5935_s25 + $0xa8] sm:$0xff] }
 0xa3d   : > { %4694 = vmatprep.subr.mxu0 %v2379_v6  ;;  %4651 = vmatpush3.msra.mxu1 %v1015_v24 }
 0xa3e   : > { %4695 = vmatpush3.msra.mxu0 %v2379_v6  ;;  %4652 = vmatprep.subr.mxu1 %v1014_v25  ;;  %v2390_v6 = vld [vmem:[%s5935_s25 + $0xa0] sm:$0xff] }
 0xa3f   : > { %4696 = vmatprep.subr.mxu0 %v2378_v13  ;;  %4653 = vmatpush3.msra.mxu1 %v1014_v25 }
 0xa40   : > { %4697 = vmatpush3.msra.mxu0 %v2378_v13  ;;  %4654 = vmatprep.subr.mxu1 %v1013_v28  ;;  %v2389_v13 = vld [vmem:[%s5935_s25 + $0x98] sm:$0xff] }
 0xa41   : > { %4699 = vmatmul.mubr.msk.f32.vlgmr.msra.gmra.mxu0 %vm2451_vm6, %v6157_v3  ;;  %4720 = vmatprep.subr.mxu0 %v5385_v51 }
 0xa42   : > { %4722 = vmatprep.mubr.msk.f32.mxu0 %vm5386_vm3, %v5385_v51  ;;  %4655 = vmatpush3.msra.mxu1 %v1013_v28 }
 0xa43   : > { %4656 = vmatprep.subr.mxu1 %v1012_v29 }
 0xa44   : > { %4657 = vmatpush3.msra.mxu1 %v1012_v29 }
 0xa45   : > { %4658 = vmatprep.subr.mxu1 %v1011_v35 }
 0xa46   : > { %4659 = vmatpush3.msra.mxu1 %v1011_v35 }
 0xa47   : > { %4701 = vmatprep.subr.mxu1 %v2393_v36 }
 0xae1   : > { %v4627_v40 = vpop.f32.mrf.mxu0 }
 0xae2   : > { %v2264_v43 = vadd.f32 %v4627_v40, %v4306_v38 }
 0xae3   : > { %v2258_v45 = vpop.f32.mrf.mxu0 }
 0xae4   : > { %v4310_v5 = vmul.f32 -1.702, %v2264_v43  ;;  %v2259_v4 = vadd.f32 %v4306_v38, %v2258_v45  ;;  %v2658_v38 = vrot.slane %v6133_v37, %v1233_v60 }
 0xae6   : > { %v2273_v46 = vmul.f32 1.442695, %v4310_v5  ;;  %v4309_v47 = vmul.f32 -1.702, %v2259_v4 }
 0xae8   : > { %4947 = vpow2.f32 %v2273_v46  ;;  %v2271_v48 = vmul.f32 1.442695, %v4309_v47 }
 0xaea   : > { %4949 = vpow2.f32 %v2271_v48 }
 0xaf1   : > { %v4681_v56 = vpop.f32.mrf.mxu0 }
 0xaf2   : > { %v6217_v11 = vadd.f32 %v4681_v56, %v2494_v63 }
 0xaf3   : > { %v2567_v57 = vpop.f32.mrf.mxu0 }
 0xaf4   : > { %v6207_v0 = vadd.f32 %v2567_v57, %v2494_v63 }
 0xaf5   : > { %v4948_v49 = vpop.eup %4947 }
 0xaf6   : > { %v2276_v50 = vadd.f32 1.0, %v4948_v49 }
 0xaf7   : > { %v4950_v52 = vpop.eup %4949 }
 0xaf8   : > { %v2275_v32 = vadd.f32 1.0, %v4950_v52  ;;  %4951 = vrcp.f32 %v2276_v50 }
 0xafa   : > { %4953 = vrcp.f32 %v2275_v32 }
 0xb01   : > { %v4700_v58 = vpop.f32.mrf.mxu0 }
 0xb02   : > { %v6210_v53 = vadd.f32 %v4700_v58, %v2579_v59 }
 0xb03   : > { %v2646_v61 = vpop.f32.mrf.mxu0 }
 0xb04   : > { %v6200_v62 = vadd.f32 %v2646_v61, %v2579_v59 }
 0xb05   : > { %v4952_v1 = vpop.eup %4951 }
 0xb06   : > { %4721 = vmatpush3.xpose.msk.msra.mxu0 %vm1027_vm2, %v6200_v62  ;;  %v2282_v10 = vmul.f32 %v4952_v1, %v2264_v43 }
 0xb07   : > { %v4954_v2 = vpop.eup %4953  ;;  %4725 = vmatprep.subr.mxu0 %v5385_v51 }
 0xb08   : > { %v2281_v8 = vmul.f32 %v4954_v2, %v2259_v4 }
 0xb09   : > { %4723 = vmatmul.mubr.msk.f32.vlgmr.msra.gmra.mxu0 %vm1027_vm2, %v6207_v0 }
 0xb0a   : > { %4726 = vmatpush3.xpose.msk.msra.mxu0 %vm1027_vm2, %v6210_v53  ;;  %4660 = vmatprep.mubr.f32.mxu1 %v2281_v8 }
 0xb0b   : > { %4661 = vmatmul.mubr.f32.vlgmr.msra.gmra.mxu1 %v2282_v10  ;;  %4727 = vmatprep.mubr.msk.f32.mxu0 %vm5386_vm3, %v5385_v51 }
 0xb0c   : > { %4702 = vmatpush3.msra.mxu1 %v2393_v36  ;;  %4717 = vmatprep.mubr.msk.f32.mxu1 %vm2451_vm6, %v6146_v54  ;;  %v2388_v54 = vld [vmem:[%s5935_s25 + $0x90] sm:$0xff] }
 0xb0d   : > { %4703 = vmatprep.subr.mxu1 %v2392_v55  ;;  %4728 = vmatmul.mubr.msk.f32.vlgmr.msra.gmra.mxu0 %vm1027_vm2, %v6217_v11 }
 0xb0e   : > { %4704 = vmatpush3.msra.mxu1 %v2392_v55  ;;  %4730 = vmatprep.subr.mxu0 %v5385_v51 }
 0xb0f   : > { %4705 = vmatprep.subr.mxu1 %v2391_v12  ;;  %4732 = vmatprep.mubr.msk.f32.mxu0 %vm5386_vm3, %v5385_v51 }
 0xb10   : > { %4706 = vmatpush3.msra.mxu1 %v2391_v12 }
 0xb11   : > { %4707 = vmatprep.subr.mxu1 %v2390_v6 }
 0xb12   : > { %4708 = vmatpush3.msra.mxu1 %v2390_v6 }
 0xb13   : > { %4709 = vmatprep.subr.mxu1 %v2389_v13 }
 0xb14   : > { %4710 = vmatpush3.msra.mxu1 %v2389_v13 }
 0xb15   : > { %4711 = vmatprep.subr.mxu1 %v2388_v54 }
 0xb16   : > { %4712 = vmatpush3.msra.mxu1 %v2388_v54 }
 0xb17   : > { %4713 = vmatprep.subr.mxu1 %v2387_v14 }
 0xb18   : > { %4714 = vmatpush3.msra.mxu1 %v2387_v14 }
 0xb19   : > { %4715 = vmatprep.subr.mxu1 %v2386_v15 }
 0xb1a   : > { %4716 = vmatpush3.msra.mxu1 %v2386_v15 }
 0xb1b   : > { %4718 = vmatmul.mubr.msk.f32.vlgmr.msra.gmra.mxu1 %vm2451_vm6, %v6157_v3  ;;  %4735 = vmatprep.subr.mxu1 %v5385_v51 }
 0xb1c   : > { %4737 = vmatprep.mubr.msk.f32.mxu1 %vm5386_vm3, %v5385_v51 }
 0xbc9   : > { %v2806_v16 = vpop.f32.mrf.mxu0 }
 0xbca   : > { %v2886_v18 = vmul.f32 0.17677669, %v2806_v16 }
 0xbcb   : > { %v4724_v19 = vpop.f32.mrf.mxu0  ;;  %v4662_v20 = vpop.f32.mrf.mxu1 }
 0xbcc   : > { %v2359_v7 = vadd.f32 %v4662_v20, %v4311_v17  ;;  %v2888_v21 = vadd.f32 %v2886_v18, %v6040_v9 }
 0xbcd   : > { %v2882_v22 = vpop.f32.mrf.mxu0  ;;  %v2353_v23 = vpop.f32.mrf.mxu1 }
 0xbce   : > { %v6242_v24 = vadd.f32 %v2359_v7, %v6093_v39  ;;  %v2887_v25 = vmul.f32 0.17677669, %v2882_v22  ;;  %v2354_v3 = vadd.f32 %v4311_v17, %v2353_v23  ;;  %v2890_v28 = vsel %vm1467_vm5, %v2888_v21, -inf }
 0xbcf   : > { %2891 = vmax.xlane.f32.xlu0 %v2890_v28  ;;  %v4729_v29 = vpop.f32.mrf.mxu0 }
 0xbd0   : > { %2365 = vst.msk [vmem:[#allocation2 + $0x8] sm:$0xff] %vm1027_vm2, %v6242_v24  ;;  %v6248_v35 = vadd.f32 %v2354_v3, %v6098_v42  ;;  %v2889_v36 = vadd.f32 %v2887_v25, %v6040_v9 }
 0xbd2   : > { %2364 = vst.msk [vmem:[#allocation2] sm:$0xff] %vm1027_vm2, %v6248_v35  ;;  %v2893_v39 = vsel %vm1467_vm5, %v2889_v36, -inf }
 0xbd3   : > { %2894 = vmax.xlane.f32.xlu1 %v2893_v39 }
 0xbdb   : > { %v4719_v40 = vpop.f32.mrf.mxu1 }
 0xbdc   : > { %v6257_v43 = vadd.f32 %v4719_v40, %v2658_v38  ;;  %v2401_v40 = vld [vmem:[%s5898_s23 + $0x38] sm:$0xff] }
 0xbdd   : > { %v2725_v45 = vpop.f32.mrf.mxu1 }
 0xbde   : > { %v6259_v5 = vadd.f32 %v2725_v45, %v2658_v38  ;;  %4736 = vmatpush3.msra.mxu1 %v6257_v43 }
 0xbdf   : > { %4745 = vmatprep.subr.mxu1 %v5385_v51 }
 0xbe0   : > { %4731 = vmatpush3.msra.mxu0 %v6259_v5 }
 0xbe1   : > { %4740 = vmatprep.subr.mxu0 %v5385_v51 }
 0xbe4   : > { %3138 = vrot.lane.b32.xlu1 %v6210_v53, %s5388_s18 }
 0xbe8   : > { %3058 = vrot.lane.b32.xlu1 %v6207_v0, %s5388_s18 }
 0xc58   : > { %v2892_v60 = vpop.xlane.xlu0 %2891 }
 0xc59   : > { %v2896_v42 = vsub.f32 %v2888_v21, %v2892_v60 }
 0xc5b   : > { %v2898_v4 = vmul.f32 1.442695, %v2896_v42  ;;  %v2400_v42 = vld [vmem:[%s5898_s23 + $0x30] sm:$0xff] }
 0xc5c   : > { %v2895_v46 = vpop.xlane.xlu1 %2894 }
 0xc5d   : > { %4955 = vpow2.f32 %v2898_v4  ;;  %v2897_v47 = vsub.f32 %v2889_v36, %v2895_v46  ;;  %v2397_v36 = vld [vmem:[%s5898_s23 + $0x18] sm:$0xff]  ;;  %v2396_v46 = vld [vmem:[%s5898_s23 + $0x10] sm:$0xff] }
 0xc5f   : > { %v2900_v48 = vmul.f32 1.442695, %v2897_v47  ;;  %v2395_v47 = vld [vmem:[%s5898_s23 + $0x8] sm:$0xff] }
 0xc60   : > { %v3139_v56 = vpop.permute.xlu1 %3138 }
 0xc61   : > { %4957 = vpow2.f32 %v2900_v48  ;;  %v2394_v48 = vld [vmem:[%s5898_s23] sm:$0xff] }
 0xc64   : > { %v3059_v57 = vpop.permute.xlu1 %3058 }
 0xc6a   : > { %v4956_v49 = vpop.eup %4955 }
 0xc6b   : > { %v2902_v50 = vsel %vm1467_vm5, %v4956_v49, 0.0 }
 0xc6c   : > { %2903 = vadd.xlane.f32.xlu0 %v2902_v50  ;;  %v2398_v50 = vld [vmem:[%s5898_s23 + $0x20] sm:$0xff] }
 0xc6e   : > { %v4958_v52 = vpop.eup %4957 }
 0xc6f   : > { %v2905_v32 = vsel %vm1467_vm5, %v4958_v52, 0.0 }
 0xc70   : > { %2906 = vadd.xlane.f32.xlu1 %v2905_v32 }
 0xc81   : > { %3136 = vrot.lane.b32.xlu1 %v6217_v11, %s5388_s18 }
 0xc82   : > { %3060 = vrot.lane.b32.xlu0 %v6200_v62, %s5388_s18 }
 0xcf5   : > { %v2904_v58 = vpop.xlane.xlu0 %2903 }
 0xcf6   : > { %4959 = vrcp.f32 %v2904_v58 }
 0xcf9   : > { %v2907_v59 = vpop.xlane.xlu1 %2906  ;;  %v3061_v1 = vpop.permute.xlu0 %3060 }
 0xcfa   : > { %4961 = vrcp.f32 %v2907_v59 }
 0xcfd   : > { %v3137_v62 = vpop.permute.xlu1 %3136 }
 0xd03   : > { %v4960_v61 = vpop.eup %4959 }
 0xd04   : > { %v2910_v63 = vmul.f32 %v4960_v61, %v4956_v49  ;;  %v2399_v49 = vld [vmem:[%s5898_s23 + $0x28] sm:$0xff]  ;;  %s3828_s23 = sld [smem:[#allocation5]] (!%p4341_p8) }
 0xd06   : > { %4733 = vmatmul.mubr.msk.f32.vlgmr.msra.gmra.mxu0 %vm1467_vm5, %v2910_v63  ;;  %v3561_v63 = vrot.slane %v6133_v37, %v2138_v26 }
 0xd07   : > { %v4962_v2 = vpop.eup %4961  ;;  %4741 = vmatpush3.xpose.msk.msra.mxu0 %vm1027_vm2, %v3061_v1  ;;  %4742 = vmatprep.mubr.msk.f32.mxu0 %vm5386_vm3, %v5385_v51 }
 0xd08   : > { %v2911_v0 = vmul.f32 %v4962_v2, %v4958_v52  ;;  %4750 = vmatprep.subr.mxu0 %v5385_v51 }
 0xd0a   : > { %4738 = vmatmul.mubr.msk.f32.vlgmr.msra.gmra.mxu1 %vm1467_vm5, %v2911_v0  ;;  %4743 = vmatmul.mubr.msk.f32.vlgmr.msra.gmra.mxu0 %vm1027_vm2, %v3059_v57 }
 0xd0b   : > { %4746 = vmatpush3.xpose.msk.msra.mxu1 %vm1027_vm2, %v3139_v56  ;;  %4747 = vmatprep.mubr.msk.f32.mxu1 %vm5386_vm3, %v5385_v51 }
 0xd0c   : > { %4755 = vmatprep.subr.mxu1 %v5385_v51  ;;  %4752 = vmatprep.mubr.msk.f32.mxu0 %vm5386_vm3, %v5385_v51 }
 0xd0e   : > { %4748 = vmatmul.mubr.msk.f32.vlgmr.msra.gmra.mxu1 %vm1027_vm2, %v3137_v62 }
 0xd0f   : > { %4757 = vmatprep.mubr.msk.f32.mxu1 %vm5386_vm3, %v5385_v51 }
 0xdc6   : > { %v2981_v8 = vpop.f32.mrf.mxu0 }
 0xdc8   : > { %v4734_v53 = vpop.f32.mrf.mxu0 }
 0xdca   : > { %v6291_v10 = vpop.f32.mrf.mxu1  ;;  %v3132_v55 = vpop.f32.mrf.mxu0 }
 0xdcb   : > { %v3214_v11 = vmul.f32 0.17677669, %v3132_v55 }
 0xdcc   : > { %v4739_v12 = vpop.f32.mrf.mxu1  ;;  %v4744_v6 = vpop.f32.mrf.mxu0 }
 0xdcd   : > { %v3216_v13 = vadd.f32 %v3214_v11, %v6040_v9 }
 0xdce   : > { %v3210_v54 = vpop.f32.mrf.mxu1 }
 0xdcf   : > { %v3215_v14 = vmul.f32 0.17677669, %v3210_v54  ;;  %v3218_v15 = vsel %vm1467_vm5, %v3216_v13, -inf }
 0xdd0   : > { %v4749_v16 = vpop.f32.mrf.mxu1  ;;  %3219 = vmax.xlane.f32.xlu0 %v3218_v15 }
 0xdd1   : > { %v3217_v17 = vadd.f32 %v3215_v14, %v6040_v9 }
 0xdd3   : > { %v3221_v18 = vsel %vm1467_vm5, %v3217_v17, -inf }
 0xdd4   : > { %3222 = vmax.xlane.f32.xlu1 %v3221_v18  ;;  %v2416_v18 = vld [vmem:[%s5904_s20 + $0x70] sm:$0xff] }
 0xde5   : > { %3318 = vrot.lane.b32.xlu1 %v6257_v43, %s5388_s18 }
 0xe59   : > { %v3220_v19 = vpop.xlane.xlu0 %3219 }
 0xe5a   : > { %v3224_v20 = vsub.f32 %v3216_v13, %v3220_v19  ;;  %v2415_v19 = vld [vmem:[%s5904_s20 + $0x68] sm:$0xff] }
 0xe5c   : > { %v3226_v7 = vmul.f32 1.442695, %v3224_v20  ;;  %v2414_v20 = vld [vmem:[%s5904_s20 + $0x60] sm:$0xff] }
 0xe5d   : > { %v3223_v21 = vpop.xlane.xlu1 %3222 }
 0xe5e   : > { %4963 = vpow2.f32 %v3226_v7  ;;  %v3225_v22 = vsub.f32 %v3217_v17, %v3223_v21  ;;  %v2417_v17 = vld [vmem:[%s5904_s20 + $0x78] sm:$0xff]  ;;  %v2412_v21 = vld [vmem:[%s5904_s20 + $0x50] sm:$0xff] }
 0xe5f   : > { %v2413_v7 = vld [vmem:[%s5904_s20 + $0x58] sm:$0xff] }
 0xe60   : > { %v3228_v23 = vmul.f32 1.442695, %v3225_v22  ;;  %v2411_v22 = vld [vmem:[%s5904_s20 + $0x48] sm:$0xff] }
 0xe61   : > { %v3319_v25 = vpop.permute.xlu1 %3318 }
 0xe62   : > { %4965 = vpow2.f32 %v3228_v23  ;;  %4756 = vmatpush3.msra.mxu1 %v3319_v25  ;;  %v2410_v23 = vld [vmem:[%s5904_s20 + $0x40] sm:$0xff]  ;;  %v2409_v25 = vld [vmem:[%s5904_s20 + $0x38] sm:$0xff] }
 0xe63   : > { %4771 = vmatprep.subr.mxu1 %v2397_v36 }
 0xe6b   : > { %v4964_v3 = vpop.eup %4963 }
 0xe6c   : > { %v3230_v9 = vsel %vm1467_vm5, %v4964_v3, 0.0 }
 0xe6d   : > { %3231 = vadd.xlane.f32.xlu0 %v3230_v9  ;;  %v2407_v9 = vld [vmem:[%s5904_s20 + $0x28] sm:$0xff] }
 0xe6f   : > { %v4966_v28 = vpop.eup %4965 }
 0xe70   : > { %v3233_v29 = vsel %vm1467_vm5, %v4966_v28, 0.0 }
 0xe71   : > { %3234 = vadd.xlane.f32.xlu0 %v3233_v29  ;;  %v2405_v29 = vld [vmem:[%s5904_s20 + $0x18] sm:$0xff] }
 0xe87   : > { %3241 = vrot.lane.b32.xlu0 %v6259_v5, %s5388_s18 }
 0xef6   : > { %v3232_v39 = vpop.xlane.xlu0 %3231 }
 0xef7   : > { %4967 = vrcp.f32 %v3232_v39  ;;  %v2403_v39 = vld [vmem:[%s5904_s20 + $0x8] sm:$0xff] }
 0xefa   : > { %v3235_v38 = vpop.xlane.xlu0 %3234 }
 0xefb   : > { %4969 = vrcp.f32 %v3235_v38  ;;  %v2402_v38 = vld [vmem:[%s5904_s20] sm:$0xff] }
 0xefe   : > { %v3242_v43 = vpop.permute.xlu0 %3241 }
 0xeff   : > { %4751 = vmatpush3.msra.mxu0 %v3242_v43 }
 0xf00   : > { %4760 = vmatprep.subr.mxu0 %v2401_v40 }
 0xf04   : > { %v4968_v45 = vpop.eup %4967 }
 0xf05   : > { %v3238_v60 = vmul.f32 %v4968_v45, %v4964_v3  ;;  %v2408_v3 = vld [vmem:[%s5904_s20 + $0x30] sm:$0xff] }
 0xf07   : > { %4753 = vmatmul.mubr.msk.f32.vlgmr.msra.gmra.mxu0 %vm1467_vm5, %v3238_v60 }
 0xf08   : > { %v4970_v4 = vpop.eup %4969  ;;  %4761 = vmatpush3.msra.mxu0 %v2401_v40 }
 0xf09   : > { %v3239_v5 = vmul.f32 %v4970_v4, %v4966_v28  ;;  %4762 = vmatprep.subr.mxu0 %v2400_v42  ;;  %v2406_v28 = vld [vmem:[%s5904_s20 + $0x20] sm:$0xff] }
 0xf0a   : > { %4763 = vmatpush3.msra.mxu0 %v2400_v42 }
 0xf0b   : > { %4758 = vmatmul.mubr.msk.f32.vlgmr.msra.gmra.mxu1 %vm1467_vm5, %v3239_v5  ;;  %4764 = vmatprep.subr.mxu0 %v2399_v49  ;;  %v3593_v5 = vrot.slane %v6133_v37, %v2170_v27  ;;  %v2434_v27 = vld [vmem:[%s5906_s19 + $0x78] sm:$0xff] }
 0xf0c   : > { %4772 = vmatpush3.msra.mxu1 %v2397_v36  ;;  %4779 = vmatprep.mubr.msk.f32.mxu1 %vm1027_vm2, %v2981_v8  ;;  %v2404_v36 = vld [vmem:[%s5904_s20 + $0x10] sm:$0xff]  ;;  %s4342_s20 = sld [smem:[#allocation5 + $0x1]] (!%p4341_p8) }
 0xf0d   : > { %4773 = vmatprep.subr.mxu1 %v2396_v46  ;;  %4765 = vmatpush3.msra.mxu0 %v2399_v49 }
 0xf0e   : > { %4774 = vmatpush3.msra.mxu1 %v2396_v46  ;;  %4766 = vmatprep.subr.mxu0 %v2398_v50 }
 0xf0f   : > { %4775 = vmatprep.subr.mxu1 %v2395_v47  ;;  %4767 = vmatpush3.msra.mxu0 %v2398_v50 }
 0xf10   : > { %4776 = vmatpush3.msra.mxu1 %v2395_v47  ;;  %3635 = vmatprep.subr.mxu0 %v2417_v17  ;;  %v3599_v47 = vrot.slane %v6133_v37, %v2176_v34  ;;  %v2449_v34 = vld [vmem:[%s5906_s19 + $0xf0] sm:$0xff] }
 0xf11   : > { %4777 = vmatprep.subr.mxu1 %v2394_v48  ;;  %v2433_v37 = vld [vmem:[%s5906_s19 + $0x70] sm:$0xff] }
 0xf12   : > { %4778 = vmatpush3.msra.mxu1 %v2394_v48  ;;  %v2437_v17 = vld [vmem:[%s5906_s19 + $0x90] sm:$0xff]  ;;  %s4120_s24 = scalar_lea.vmem (!%p4341_p8), [#allocation3], %s4342_s20 }
 0xf13   : > { %4780 = vmatmul.mubr.msk.f32.vlgmr.msra.gmra.mxu1 %vm1027_vm2, %v6291_v10  ;;  %4483 = vmatprep.subr.mxu1 %v2450_v30 }
 0xf14   : > { %4484 = vmatpush3.msra.mxu1 %v2434_v27 }
 0xf15   : > { %4485 = vmatprep.subr.mxu1 %v2449_v34 }
 0xf16   : > { %4486 = vmatpush3.msra.mxu1 %v2433_v37 }
 0xfc7   : > { %v3313_v52 = vpop.f32.mrf.mxu0 }
 0xfc8   : > { %4768 = vmatprep.mubr.msk.f32.mxu0 %vm1027_vm2, %v3313_v52 }
 0xfc9   : > { %v4754_v32 = vpop.f32.mrf.mxu0 }
 0xfcb   : > { %v3390_v56 = vpop.f32.mrf.mxu1 }
 0xfcc   : > { %4769 = vmatmul.mubr.msk.f32.vlgmr.msra.gmra.mxu0 %vm1027_vm2, %v3390_v56 }
 0xfcd   : > { %v4759_v57 = vpop.f32.mrf.mxu1  ;;  %3683 = vmatprep.mubr.f32.mxu0 %v5385_v51  ;;  %3636 = vmatpush1.msra.mxu0 %v2416_v18  ;;  %v2421_v18 = vld [vmem:[%s5906_s19 + $0x10] sm:$0xff] }
 0xfce   : > { %3637 = vmatprep.subr.mxu0 %v2415_v19  ;;  %v2436_v19 = vld [vmem:[%s5906_s19 + $0x88] sm:$0xff] }
 0xfcf   : > { %3638 = vmatpush1.msra.mxu0 %v2414_v20  ;;  %v2420_v20 = vld [vmem:[%s5906_s19 + $0x8] sm:$0xff] }
 0xfd0   : > { %3639 = vmatprep.subr.mxu0 %v2413_v7  ;;  %v2435_v7 = vld [vmem:[%s5906_s19 + $0x80] sm:$0xff] }
 0xfd1   : > { %3640 = vmatpush1.msra.mxu0 %v2412_v21  ;;  %v2419_v21 = vld [vmem:[%s5906_s19] sm:$0xff] }
 0xfd2   : > { %3641 = vmatprep.subr.mxu0 %v2411_v22  ;;  %v2418_v22 = vld [vmem:[%s5940_s16] sm:$0x3]  ;;  %s5392_s16 = smov (!%p4341_p8), 32  }
 0xfd3   : > { %v4781_v58 = vpop.f32.mrf.mxu1  ;;  %3642 = vmatpush1.msra.mxu0 %v2410_v23  ;;  %v3606_v23 = vrot.slane %v2418_v22, %v5976_v31 }
 0xfd4   : > { %3643 = vmatprep.subr.mxu0 %v2409_v25  ;;  %v3610_v25 = vrot.slane %v2418_v22, %v5982_v33 }
 0xfd5   : > { %v3547_v1 = vpop.f32.mrf.mxu1  ;;  %3644 = vmatpush1.msra.mxu0 %v2408_v3 }
 0xfd6   : > { %3645 = vmatprep.subr.mxu0 %v2407_v9 }
 0xfd7   : > { %3646 = vmatpush1.msra.mxu0 %v2406_v28 }
 0xfd8   : > { %3647 = vmatprep.subr.mxu0 %v2405_v29 }
 0xfd9   : > { %3648 = vmatpush1.msra.mxu0 %v2404_v36 }
 0xfda   : > { %3649 = vmatprep.subr.mxu0 %v2403_v39 }
 0xfdb   : > { %3650 = vmatpush1.msra.mxu0 %v2402_v38 }
0x108c   : > { %v4770_v59 = vpop.f32.mrf.mxu0 }
0x108d   : > { %v3553_v61 = vadd.f32 %v4781_v58, %v4770_v59  ;;  %v2448_v58 = vld [vmem:[%s5906_s19 + $0xe8] sm:$0xff] }
0x108e   : > { %v3466_v2 = vpop.f32.mrf.mxu0  ;;  %4487 = vmatprep.subr.mxu1 %v2448_v58  ;;  %v2432_v59 = vld [vmem:[%s5906_s19 + $0x68] sm:$0xff] }
0x108f   : > { %v3557_v0 = vadd.f32 %v3553_v61, %v6102_v44  ;;  %v3548_v62 = vadd.f32 %v3547_v1, %v3466_v2  ;;  %4488 = vmatpush3.msra.mxu1 %v2432_v59  ;;  %v2431_v61 = vld [vmem:[%s5906_s19 + $0x60] sm:$0xff]  ;;  %v2430_v1 = vld [vmem:[%s5906_s19 + $0x58] sm:$0xff]  ;;  %v2445_v2 = vld [vmem:[%s5906_s19 + $0xd0] sm:$0xff] }
0x1091   : > { %v6323_v8 = vadd.f32 %v3561_v63, %v3557_v0  ;;  %v3556_v53 = vadd.f32 %v3548_v62, %v6096_v41  ;;  %v2429_v0 = vld [vmem:[%s5906_s19 + $0x50] sm:$0xff]  ;;  %v2444_v62 = vld [vmem:[%s5906_s19 + $0xc8] sm:$0xff] }
0x1093   : > { %v6326_v10 = vadd.f32 %v3561_v63, %v3556_v53  ;;  %v3567_v55 = vsel %vm2451_vm6, %v6323_v8, 0.0  ;;  %v2446_v63 = vld [vmem:[%s5906_s19 + $0xd8] sm:$0xff]  ;;  %v2428_v53 = vld [vmem:[%s5906_s19 + $0x48] sm:$0xff] }
0x1094   : > { %3568 = vadd.xlane.f32.xlu0 %v3567_v55  ;;  %v2443_v55 = vld [vmem:[%s5906_s19 + $0xc0] sm:$0xff] }
0x1095   : > { %v3564_v11 = vsel %vm2451_vm6, %v6326_v10, 0.0 }
0x1096   : > { %3565 = vadd.xlane.f32.xlu1 %v3564_v11  ;;  %v2427_v11 = vld [vmem:[%s5906_s19 + $0x40] sm:$0xff] }
0x111d   : > { %v3569_v26 = vpop.xlane.xlu0 %3568 }
0x111e   : > { %v3571_v44 = vmul.f32 0.015625, %v3569_v26  ;;  %v2442_v26 = vld [vmem:[%s5906_s19 + $0xb8] sm:$0xff] }
0x111f   : > { %v3566_v12 = vpop.xlane.xlu1 %3565 }
0x1120   : > { %v3573_v6 = vsub.f32 %v6323_v8, %v3571_v44  ;;  %v3570_v41 = vmul.f32 0.015625, %v3566_v12  ;;  %v2426_v44 = vld [vmem:[%s5906_s19 + $0x38] sm:$0xff]  ;;  %v2441_v12 = vld [vmem:[%s5906_s19 + $0xb0] sm:$0xff] }
0x1122   : > { %v3572_v13 = vsub.f32 %v6326_v10, %v3570_v41  ;;  %v3575_v54 = vmul.f32 %v3573_v6, %v3573_v6  ;;  %v2440_v41 = vld [vmem:[%s5906_s19 + $0xa8] sm:$0xff] }
0x1124   : > { %v3579_v14 = vsel %vm2451_vm6, %v3575_v54, 0.0  ;;  %v3574_v15 = vmul.f32 %v3572_v13, %v3572_v13  ;;  %v2439_v54 = vld [vmem:[%s5906_s19 + $0xa0] sm:$0xff] }
0x1125   : > { %3580 = vadd.xlane.f32.xlu1 %v3579_v14  ;;  %v2423_v14 = vld [vmem:[%s5906_s19 + $0x20] sm:$0xff] }
0x1126   : > { %v3576_v16 = vsel %vm2451_vm6, %v3574_v15, 0.0  ;;  %v2438_v15 = vld [vmem:[%s5906_s19 + $0x98] sm:$0xff] }
0x1127   : > { %3577 = vadd.xlane.f32.xlu0 %v3576_v16  ;;  %v2422_v16 = vld [vmem:[%s5906_s19 + $0x18] sm:$0xff] }
0x11ae   : > { %v3581_v40 = vpop.xlane.xlu1 %3580 }
0x11af   : > { %v3583_v43 = vmul.f32 0.015625, %v3581_v40 }
0x11b0   : > { %v3578_v45 = vpop.xlane.xlu0 %3577 }
0x11b1   : > { %v3585_v60 = vadd.f32 1e-05, %v3583_v43  ;;  %v3582_v42 = vmul.f32 0.015625, %v3578_v45 }
0x11b3   : > { %4971 = vrsqrt.f32 %v3585_v60  ;;  %v3584_v4 = vadd.f32 1e-05, %v3582_v42 }
0x11b5   : > { %4973 = vrsqrt.f32 %v3584_v4 }
0x11c0   : > { %v4972_v46 = vpop.eup %4971 }
0x11c1   : > { %v3589_v48 = vmul.f32 %v4972_v46, %v3573_v6  ;;  %v2425_v6 = vld [vmem:[%s5906_s19 + $0x30] sm:$0xff] }
0x11c2   : > { %v4974_v49 = vpop.eup %4973 }
0x11c3   : > { %v3588_v50 = vmul.f32 %v4974_v49, %v3572_v13  ;;  %v3595_v52 = vmul.f32 %v3593_v5, %v3589_v48  ;;  %v2424_v13 = vld [vmem:[%s5906_s19 + $0x28] sm:$0xff] }
0x11c5   : > { %v3594_v32 = vmul.f32 %v3593_v5, %v3588_v50  ;;  %v3601_v56 = vadd.f32 %v3599_v47, %v3595_v52 }
0x11c7   : > { %v3600_v57 = vadd.f32 %v3599_v47, %v3594_v32 }
0x11c9   : > { %4334 = vmatmul.mubr.msk.f32.vlgmr.msra.gmra.mxu0 %vm2451_vm6, %v3600_v57 }
0x11ca   : > { %3689 = vmatprep.mubr.f32.mxu0 %v5385_v51  ;;  %v2447_v51 = vld [vmem:[%s5906_s19 + $0xe0] sm:$0xff]  ;;  %s3829_s19 = scalar_lea.vmem (!%p4341_p8), [#allocation3], %s3828_s23 }
0x11cb   : > { %4489 = vmatprep.subr.mxu1 %v2447_v51 }
0x11cc   : > { %4490 = vmatpush3.msra.mxu1 %v2431_v61 }
0x11cd   : > { %4335 = vmatmul.mubr.msk.f32.gmra.mxu0 %vm2451_vm6, %v3601_v56  ;;  %4491 = vmatprep.subr.mxu1 %v2446_v63 }
0x11ce   : > { %4492 = vmatpush3.msra.mxu1 %v2430_v1 }
0x11cf   : > { %4493 = vmatprep.subr.mxu1 %v2445_v2  ;;  %v4340_v2 = vld [vmem:[%s5928_s1 + $0x8] ss:$0 sm:$0xff] }
0x11d0   : > { %4494 = vmatpush3.msra.mxu1 %v2429_v0 }
0x11d1   : > { %4495 = vmatprep.subr.mxu1 %v2444_v62 }
0x11d2   : > { %4496 = vmatpush3.msra.mxu1 %v2428_v53 }
0x11d3   : > { %4497 = vmatprep.subr.mxu1 %v2443_v55 }
0x11d4   : > { %4498 = vmatpush3.msra.mxu1 %v2427_v11 }
0x11d5   : > { %4499 = vmatprep.subr.mxu1 %v2442_v26 }
0x11d6   : > { %4500 = vmatpush3.msra.mxu1 %v2426_v44 }
0x11d7   : > { %4501 = vmatprep.subr.mxu1 %v2441_v12 }
0x11d8   : > { %4502 = vmatpush3.msra.mxu1 %v2425_v6 }
0x11d9   : > { %4503 = vmatprep.subr.mxu1 %v2440_v41 }
0x11da   : > { %4504 = vmatpush3.msra.mxu1 %v2424_v13 }
0x11db   : > { %4505 = vmatprep.subr.mxu1 %v2439_v54 }
0x11dc   : > { %4506 = vmatpush3.msra.mxu1 %v2423_v14 }
0x11dd   : > { %4507 = vmatprep.subr.mxu1 %v2438_v15 }
0x11de   : > { %4508 = vmatpush3.msra.mxu1 %v2422_v16 }
0x11df   : > { %4509 = vmatprep.subr.mxu1 %v2437_v17 }
0x11e0   : > { %4510 = vmatpush3.msra.mxu1 %v2421_v18 }
0x11e1   : > { %4511 = vmatprep.subr.mxu1 %v2436_v19 }
0x11e2   : > { %4512 = vmatpush3.msra.mxu1 %v2420_v20 }
0x11e3   : > { %4513 = vmatprep.subr.mxu1 %v2435_v7 }
0x11e4   : > { %4514 = vmatpush3.msra.mxu1 %v2419_v21 }
0x1289   : > { %v3685_v3 = vpop.f32.mrf.mxu0 }
0x128a   : > { %v3686_v9 = vadd.f32 %v3685_v3, %v3606_v23 }
0x128b   : > { %v3687_v28 = vpop.f32.mrf.mxu0 }
0x128c   : > { %v4336_v29 = vmul.f32 -1.702, %v3686_v9  ;;  %v3688_v36 = vadd.f32 %v3687_v28, %v3610_v25 }
0x128d   : > { %v3691_v39 = vpop.f32.mrf.mxu0 }
0x128e   : > { %v3704_v38 = vmul.f32 1.442695, %v4336_v29  ;;  %v4337_v40 = vmul.f32 -1.702, %v3688_v36  ;;  %v3692_v43 = vadd.f32 %v3691_v39, %v3606_v23 }
0x128f   : > { %v3693_v45 = vpop.f32.mrf.mxu0 }
0x1290   : > { %4975 = vpow2.f32 %v3704_v38  ;;  %v3706_v60 = vmul.f32 1.442695, %v4337_v40  ;;  %v4338_v42 = vmul.f32 -1.702, %v3692_v43  ;;  %v3694_v4 = vadd.f32 %v3693_v45, %v3610_v25 }
0x1292   : > { %4977 = vpow2.f32 %v3706_v60  ;;  %v3708_v5 = vmul.f32 1.442695, %v4338_v42  ;;  %v4339_v46 = vmul.f32 -1.702, %v3694_v4 }
0x1294   : > { %4979 = vpow2.f32 %v3708_v5  ;;  %v3710_v47 = vmul.f32 1.442695, %v4339_v46 }
0x1296   : > { %4981 = vpow2.f32 %v3710_v47 }
0x129d   : > { %v4976_v48 = vpop.eup %4975 }
0x129e   : > { %v3712_v49 = vadd.f32 1.0, %v4976_v48 }
0x129f   : > { %v4978_v50 = vpop.eup %4977 }
0x12a0   : > { %v3713_v52 = vadd.f32 1.0, %v4978_v50  ;;  %4983 = vrcp.f32 %v3712_v49 }
0x12a1   : > { %v4980_v32 = vpop.eup %4979 }
0x12a2   : > { %4985 = vrcp.f32 %v3713_v52  ;;  %v3714_v56 = vadd.f32 1.0, %v4980_v32 }
0x12a3   : > { %v4982_v57 = vpop.eup %4981 }
0x12a4   : > { %v3715_v30 = vadd.f32 1.0, %v4982_v57  ;;  %4987 = vrcp.f32 %v3714_v56 }
0x12a6   : > { %4989 = vrcp.f32 %v3715_v30 }
0x12ad   : > { %v4984_v27 = vpop.eup %4983 }
0x12ae   : > { %v3724_v58 = vmul.f32 %v4984_v27, %v3686_v9 }
0x12af   : > { %v4986_v34 = vpop.eup %4985 }
0x12b0   : > { %v3725_v37 = vmul.f32 %v4986_v34, %v3688_v36 }
0x12b1   : > { %v4988_v59 = vpop.eup %4987 }
0x12b2   : > { %3796 = vmatprep.mubr.f32.mxu1 %v3725_v37  ;;  %v3726_v63 = vmul.f32 %v4988_v59, %v3692_v43 }
0x12b3   : > { %v4990_v51 = vpop.eup %4989  ;;  %3797 = vmatmul.mubr.f32.vlgmr.msra.gmra.mxu1 %v3724_v58 }
0x12b4   : > { %v3727_v61 = vmul.f32 %v4990_v51, %v3694_v4 }
0x12b6   : > { %3801 = vmatprep.mubr.f32.mxu1 %v3727_v61 }
0x12b7   : > { %3802 = vmatmul.mubr.f32.gmra.mxu1 %v3726_v63 }
0x1373   : > { %v4515_v1 = vpop.f32.mrf.mxu1 }
0x1375   : > { %v4516_v0 = vpop.f32.mrf.mxu1 }
0x1376   : > { %v4517_v62 = vadd.f32 %v4516_v0, %v4515_v1 }
0x1377   : > { %v4518_v53 = vpop.f32.mrf.mxu1 }
0x1378   : > { %v3799_v55 = vadd.f32 %v4517_v62, %v4340_v2 }
0x1379   : > { %v4519_v11 = vpop.f32.mrf.mxu1 }
0x137a   : > { %v3807_v26 = vadd.f32 %v3799_v55, %v6326_v10  ;;  %v4520_v44 = vadd.f32 %v4519_v11, %v4518_v53 }
0x137c   : > { %3809 = vst.msk [vmem:[#allocation3] sm:$0xff] %vm2451_vm6, %v3807_v26  ;;  %v3804_v12 = vadd.f32 %v4520_v44, %v4340_v2  ;;  %3814 = sbr.rel (%p4341_p8) target bundleno = 5507 (0x1583), region = 136 }
0x137e   : > { %v3808_v6 = vadd.f32 %v3804_v12, %v6323_v8 }
0x1380   : > { %3810 = vst.msk [vmem:[#allocation3 + $0x8] sm:$0xff] %vm2451_vm6, %v3808_v6 }
0x1381   : > { %vm3838_vm7 = vcmask 1040384   ;;  %vm3841_vm8 = vcmask 517120   ;;  %v3872_v19 = vld [vmem:[#allocation20 + $0x38] sm:$0xff]  ;;  %v5389_v20 = vmov 0.0   ;;  %v3871_v7 = vld [vmem:[#allocation20 + $0x30] sm:$0xff]  ;;  %vm5390_vm9 = vmmov 0  }
0x1382   : > { %4782 = vmatprep.subr.mxu0 %v5389_v20  ;;  %4798 = vmatprep.mubr.msk.f32.mxu0 %vm5390_vm9, %v5389_v20  ;;  %v3870_v21 = vld [vmem:[#allocation20 + $0x28] sm:$0xff]  ;;  %v3869_v22 = vld [vmem:[#allocation20 + $0x20] sm:$0xff]  ;;  %v3868_v23 = vld [vmem:[#allocation20 + $0x18] sm:$0xff]  ;;  %v5391_v29 = vmov 0   ;;  %vm3825_vm10 = vcmask 785408  }
0x1383   : > { %4783 = vmatpush3.msra.mxu0 %v3872_v19  ;;  %v3867_v25 = vld [vmem:[#allocation20 + $0x10] sm:$0xff]  ;;  %v3866_v3 = vld [vmem:[#allocation20 + $0x8] sm:$0xff]  ;;  %v3865_v9 = vld [vmem:[#allocation20] sm:$0xff]  ;;  %4991 = vset.pattern.permute.xlu1 %v5391_v29 }
0x1384   : > { %4784 = vmatprep.subr.mxu0 %v5389_v20  ;;  %v3946_v28 = vld [vmem:[%s6549_s28] sm:$0x3]  ;;  %4992 = vset.pattern.permute.xlu0 %v5391_v29 }
0x1385   : > { %4785 = vmatpush3.msra.mxu0 %v3871_v7  ;;  %3949 = vperm.xlu1 %4991, %v3946_v28   ;;  %v3840_v40 = vld [vmem:[%s6550_s8] sm:$0x3] }
0x1386   : > { %4786 = vmatprep.subr.mxu0 %v5389_v20  ;;  %v3858_v43 = vrot.slane %v3840_v40, %v5976_v31  ;;  %v3863_v42 = vrot.slane %v3840_v40, %v5982_v33 }
0x1387   : > { %v3830_v41 = vld [vmem:[%s3829_s19] sm:$0x1]  ;;  %v4343_v13 = vld [vmem:[%s4120_s24 + $0x8] sm:$0x1]  ;;  %4787 = vmatpush3.msra.mxu0 %v3870_v21 }
0x1388   : > { %v3836_v54 = vrot.slane %v4343_v13, 7  ;;  %4788 = vmatprep.subr.mxu0 %v5389_v20 }
0x1389   : > { %4789 = vmatpush3.msra.mxu0 %v3869_v22  ;;  %3817 = vrot.lane.b32.xlu1 %v3807_v26, %s5392_s16 }
0x138a   : > { %v3839_v10 = vsel %vm3838_vm7, %v3830_v41, %v3836_v54  ;;  %4790 = vmatprep.subr.mxu0 %v5389_v20 }
0x138b   : > { %v3842_v14 = vsel %vm3841_vm8, %v3839_v10, 0.0  ;;  %4791 = vmatpush3.msra.mxu0 %v3868_v23 }
0x138c   : > { %3843 = vadd.xlane.f32.xlu0 %v3842_v14  ;;  %4792 = vmatprep.subr.mxu0 %v5389_v20 }
0x138d   : > { %4793 = vmatpush3.msra.mxu0 %v3867_v25 }
0x138e   : > { %4794 = vmatprep.subr.mxu0 %v5389_v20 }
0x138f   : > { %4795 = vmatpush3.msra.mxu0 %v3866_v3 }
0x1390   : > { %4796 = vmatprep.subr.mxu0 %v5389_v20 }
0x1391   : > { %4797 = vmatpush3.msra.mxu0 %v3865_v9 }
0x1400   : > { %v3950_v46 = vpop.permute.xlu1 %3949 }
0x1404   : > { %v3818_v48 = vpop.permute.xlu1 %3817 }
0x1405   : > { %v3823_v50 = vsel %vm1027_vm2, %v6248_v35, %v3818_v48 }
0x1406   : > { %3826 = vst.msk [vmem:[#allocation21] sm:$0xff] %vm3825_vm10, %v3823_v50 }
0x1415   : > { %v3844_v15 = vpop.xlane.xlu0 %3843 }
0x1416   : > { %v3845_v8 = vmul.f32 0.015625, %v3844_v15 }
0x1418   : > { %v3846_v16 = vsub.f32 %v3839_v10, %v3845_v8 }
0x141a   : > { %v3847_v17 = vmul.f32 %v3846_v16, %v3846_v16 }
0x141c   : > { %v3848_v18 = vsel %vm3841_vm8, %v3847_v17, 0.0 }
0x141d   : > { %3849 = vadd.xlane.f32.xlu0 %v3848_v18 }
0x1433   : > { %3819 = vrot.lane.b32.xlu0 %v3808_v6, %s5392_s16 }
0x14a6   : > { %v3850_v36 = vpop.xlane.xlu0 %3849 }
0x14a7   : > { %v3851_v39 = vmul.f32 0.015625, %v3850_v36 }
0x14a9   : > { %v3852_v38 = vadd.f32 1e-05, %v3851_v39 }
0x14aa   : > { %v3820_v47 = vpop.permute.xlu0 %3819 }
0x14ab   : > { %4993 = vrsqrt.f32 %v3852_v38  ;;  %v3824_v49 = vsel %vm1027_vm2, %v6242_v24, %v3820_v47 }
0x14ac   : > { %3827 = vst.msk [vmem:[#allocation21 + $0x8] sm:$0xff] %vm3825_vm10, %v3824_v49 }
0x14b8   : > { %v4994_v45 = vpop.eup %4993 }
0x14b9   : > { %v3854_v60 = vmul.f32 %v4994_v45, %v3846_v16 }
0x14bb   : > { %v3859_v4 = vmul.f32 %v3858_v43, %v3854_v60 }
0x14bd   : > { %v3864_v5 = vadd.f32 %v3863_v42, %v3859_v4 }
0x14bf   : > { %4799 = vmatmul.mubr.msk.f32.vlgmr.msra.gmra.mxu0 %vm2451_vm6, %v3864_v5 }
0x157f   : > { %v3942_v31 = vpop.f32.mrf.mxu0 }
0x1580   : > { %v3952_v52 = vmul.f32 %v3950_v46, %v3942_v31 }
0x1581   : > { %v4800_v32 = vpop.f32.mrf.mxu0 }
0x1582   : > { %3953 = vst.msk [vmem:[#allocation22] sm:$0x3] %vm3841_vm8, %v3952_v52 }
0x1583 PF: > { %s6551_s22 = sld [smem:[#allocation34_spill]]  ;;  %s5393_s17 = smov [#allocation21]  }
0x1584   : > { %s3960_s6 = sshll.u32 %s5393_s17, 4  ;;  %s3961_s6 = int_to_ptr.vmem [resolvable:$true] %s3960_s6 }
0x1585   : > { %s5257_s9 = scalar_lea.vmem %s3961_s6, 256  ;;  %p5264_p0 = scmp.lt.s32.totalorder %s3961_s6, %s3961_s6 }
0x1586   : > { %p5258_p12 = scmp.ne.s32.totalorder %s3961_s6, %s5257_s9  ;;  %p5265_p13 = scmp.lt.s32.totalorder %s5257_s9, %s5257_s9 }
0x1588   : > { %p5266_p1 = por %p5265_p13, %p5264_p0 }
0x1589   : > { %p4865_p11 = scmp.eq.s32.totalorder %s6551_s22, 1 }
0x158b   : > { %p5259_p2 = pnand %p5258_p12, %p4865_p11 }
0x158d   : > { %p5260_p9 = pneg %p5259_p2 }
0x158f   : > { %p5267_p10 = pnand %p5266_p1, %p5260_p9 }
0x1591   : > { %5270 = shalt.err (!%p5267_p10)
}
0x1592   : > { %s5394_s4 = smov 128   ;;  %s5395_s0 = smov 8  }
0x1593   : > { %s6552_s14 = sld [smem:[#allocation54_spill]]  ;;  %s5396_s5 = smov [#allocation22]  }
0x1594   : > { %s3974_s26 = sshll.u32 %s5396_s5, 4  ;;  %s3975_s26 = int_to_ptr.vmem [resolvable:$true] %s3974_s26 }
0x1595   : > { %s5281_s29 = scalar_lea.vmem %s3975_s26, 32  ;;  %p5288_p6 = scmp.lt.s32.totalorder %s3975_s26, %s3975_s26 }
0x1596   : > { %p5282_p3 = scmp.ne.s32.totalorder %s3975_s26, %s5281_s29  ;;  %p5289_p7 = scmp.lt.s32.totalorder %s5281_s29, %s5281_s29 }
0x1598   : > { %p5283_p5 = pnand %p5282_p3, %p4865_p11  ;;  %p5290_p8 = por %p5289_p7, %p5288_p6 }
0x1599   : > { %4826 = dma.vmem_to_hbm [thread:$0]  (%p4865_p11), %s3961_s6, 256, %s6552_s14, [#allocation8], %s5394_s4, %s5394_s4, %s5395_s0  }
0x159a   : > { %p5284_p4 = pneg %p5283_p5 }
0x159c   : > { %p5291_p12 = pnand %p5290_p8, %p5284_p4 }
0x159e   : > { %5294 = shalt.err (!%p5291_p12)
}
0x159f   : > { %s6553_s23 = sld [smem:[#allocation55_spill]] }
0x15a5   : > { %4828 = dma.vmem_to_hbm [thread:$0]  (%p4865_p11), %s3975_s26, 32, %s6553_s23, [#allocation23]  }
0x15a6   : > { %5348 = dma.done.wait (%p4865_p11), [#allocation8], 256  }
0x15a7   : > { %5350 = vsyncadd (%p4865_p11), [#allocation8], 4294967040 }
0x15a8   : > { %5352 = dma.done.wait (%p4865_p11), [#allocation23], 32  }
0x15a9   : > { %5354 = vsyncadd (%p4865_p11), [#allocation23], 4294967264 }
0x15aa PF: > { %s6554_s26 = sld [smem:[#allocation35_spill]]  ;;  %s6557_s25 = smov %s5361_s3 }
0x15ab   : > { %s6555_s20 = sld [smem:[#allocation33_spill]] }
0x15ac   : > { %s6556_s14 = sld [smem:[#allocation36_spill]] }
0x15b0   : > { %p51_p2 = scmp.ge.s32.totalorder %s6554_s26, 4  }
0x15b1   : > { %s6558_s3 = smov %s6555_s20 }
0x15b2   :  { %53 = sbr.rel (!%p51_p2) target bundleno = 53 (0x35), region = 248 }
0x15b7   :  { %3991 = vsyncpa [#allocation7], 1 }
0x15b8   :  { %3993 = vsyncpa [#allocation7 + $0x1], 1 }
0x15b9   :  { %3994 = vsyncpa [#allocation10], 1 }
0x15ba   :  { %3996 = vsyncpa [#allocation10 + $0x1], 1 }
0x15bb   :  { %3997 = vsyncpa [#allocation13], 1 }
0x15bc   :  { %3999 = vsyncpa [#allocation13 + $0x1], 1 }
0x15bd   :  { %4000 = vsyncpa [#allocation16], 1 }
0x15be   :  { %4002 = vsyncpa [#allocation16 + $0x1], 1 }
0x15bf   :  { %4003 = vsyncpa [#allocation19], 1 }
0x15c0   :  { %4005 = vsyncpa [#allocation19 + $0x1], 1 }
0x15c1   :  { %4006 = vsyncpa [#allocation8], 1 }
0x15c2   :  { %4008 = vsyncpa [#allocation8 + $0x1], 1 }
0x15c3   :  { %4009 = vsyncpa [#allocation23], 1 }

</bundles_post_ra>
